<compile_context>
chip_gen: v5e
topology: v5e:2x2
jax: 0.10.0
libtpu: 0.0.40
codegen_flags: <defaults>
</compile_context>

<pallas_src>
import math
import functools

import jax
import jax.numpy as jnp
from jax.experimental import pallas as pl
from jax.experimental.pallas import tpu as pltpu

# ------------------------- static configuration -------------------------
D_MODEL = 256          # d_model (sine embedding hard-codes 128 per coordinate)
N_HEADS = 8
N_LEVELS = 2
N_POINTS = 2
N_LAYERS = 2
D_FFN = 256
TOPK = 30
HLP = N_HEADS * N_LEVELS * N_POINTS   # 32 (>= TOPK)
OFF_DIM = HLP * 2                     # 64 sampling-offset channels
PACK = 128                            # lane-dense packed width: off | aw | pad
VMEM_BYTES = 32 * 1024 * 1024         # explicit scoped-VMEM limit (fits v5e..v7x)

_VMEM = pl.BlockSpec(memory_space=pltpu.MemorySpace.VMEM)


def _const_spec(shape):
    """Full-array block whose index never changes over the layer grid axis
    (weights / constants are DMA'd once and stay resident)."""
    zeros = (0,) * len(shape)
    return pl.BlockSpec(shape, lambda l: zeros)


# ------------------------------ Pallas kernels ------------------------------
def _ctx_kernel(src_ref, wval_ref, ctx_ref, *, row_slices):
    """Per-level mean pooling of the flattened encoder memory followed by the
    value projection. Equivalent to mean(src @ w_val) per level (linearity),
    computed ONCE instead of inside every decoder layer."""
    pooled = jnp.concatenate(
        [jnp.mean(src_ref[start:start + length, :], axis=0, keepdims=True)
         for (start, length) in row_slices], axis=0)            # (B*L, D)
    ctx_ref[...] = jnp.dot(pooled.astype(jnp.bfloat16), wval_ref[...],
                           preferred_element_type=jnp.float32)


def _decoder_kernel(tgt_ref, pos_ref, dimt_ref, G_ref, GlB_ref, bmask_ref, ctx_ref,
                    rph_w1_ref, rph_b1_ref, rph_w2_ref, rph_b2_ref,
                    qs_w1_ref, qs_b1_ref, qs_w2_ref, qs_b2_ref,
                    wproj_ref, bproj_ref, wout_ref, bout_ref,
                    wffn1_ref, bffn1_ref, wffn2_ref, bffn2_ref,
                    state_ref, offaw_ref, raw_qpos_ref):
    lid = pl.program_id(0)

    def mm(x, w_ref):   # bf16 MXU matmul, f32 accumulate
        return jnp.dot(x.astype(jnp.bfloat16), w_ref[...],
                       preferred_element_type=jnp.float32)

    @pl.when(lid == 0)
    def _init():
        # decoder state carried resident in VMEM across the layer grid axis
        state_ref[...] = tgt_ref[...]
        # DAB sine embedding + ref_point_head MLP: reference points (and hence
        # raw_query_pos) do not change across layers (bbox_embed is None), so
        # compute once and stash in scratch.
        pos = pos_ref[...]                  # (BN, 4): x, y, w, h
        dim_t = dimt_ref[...]               # (1, 128) precomputed frequencies
        parity = jax.lax.broadcasted_iota(jnp.int32, (1, 128), 1) % 2

        def emb(col):
            v = pos[:, col:col + 1] * (2.0 * math.pi) / dim_t
            # interleaved sin/cos exactly like stack((sin(0::2), cos(1::2)), -1).flatten
            return jnp.where(parity == 0, jnp.sin(v), jnp.cos(v))

        qse = jnp.concatenate([emb(1), emb(0), emb(2), emb(3)], axis=-1)  # y,x,w,h
        h = jnp.maximum(mm(qse, rph_w1_ref) + rph_b1_ref[...], 0.0)
        raw_qpos_ref[...] = mm(h, rph_w2_ref) + rph_b2_ref[...]

    out = state_ref[...]                    # (BN, D)
    raw_qpos = raw_qpos_ref[...]

    # query_scale MLP (pos_scale == 1 on the first layer)
    hs = jnp.maximum(mm(out, qs_w1_ref) + qs_b1_ref[...], 0.0)
    pos_scale = mm(hs, qs_w2_ref) + qs_b2_ref[...]
    is_first = jnp.where(lid == 0, 1.0, 0.0)
    query_pos = (is_first + (1.0 - is_first) * pos_scale) * raw_qpos

    q = out + query_pos
    # fused sampling-offset + attention-logit projection (one lane-dense matmul)
    qproj = mm(q, wproj_ref) + bproj_ref[...]        # (BN, 128): off | logits | pad
    off = qproj[:, :OFF_DIM]                         # (BN, 64)
    logits = qproj[:, OFF_DIM:OFF_DIM + HLP]         # (BN, 32)

    # per-head softmax over (levels * points); grouped denominator via matmul
    m = jnp.max(logits, axis=-1, keepdims=True)
    e = jnp.exp(logits - m)
    denom = jnp.dot(e, G_ref[...], preferred_element_type=jnp.float32)
    aw = e * pl.reciprocal(denom, approx=True)       # (BN, HLP)

    # level-pooled context aggregation (ctx precomputed once outside the layers)
    awl = jnp.dot(aw, GlB_ref[...], preferred_element_type=jnp.float32) * bmask_ref[...]
    attn_out = jnp.dot(awl, ctx_ref[...],
                       preferred_element_type=jnp.float32) * (1.0 / N_HEADS)

    # output projection + residual + FFN
    out2 = out + mm(attn_out, wout_ref) + bout_ref[...]
    hf = jnp.maximum(mm(out2, wffn1_ref) + bffn1_ref[...], 0.0)
    state_ref[...] = out2 + mm(hf, wffn2_ref) + bffn2_ref[...]

    # lane-dense packed (off | attention weights | zero pad); only the final
    # layer's content is consumed (single writeback at the end of the grid).
    offaw_ref[...] = jnp.concatenate(
        [off, aw, jnp.zeros((off.shape[0], PACK - OFF_DIM - HLP), jnp.float32)],
        axis=-1)


# ------------------------------ decoder forward ------------------------------
def decoder_forward(params, tgt, reference_points, src, src_spatial_shapes,
                    src_level_start_index, src_valid_ratios):
    """use_dab=True, bbox_embed=None, return_intermediate=False."""
    f32, bf16 = jnp.float32, jnp.bfloat16
    bs, nq, d = tgt.shape
    BN = bs * nq
    S = src.shape[1]
    lp = params['layer']

    # ---- static constants, precomputed once in the wrapper ----
    idx = jnp.arange(128, dtype=f32)
    dim_t = (10000.0 ** (2.0 * jnp.floor(idx / 2.0) / 128.0)).reshape(1, 128)

    a_idx = jnp.arange(HLP)
    head_of = a_idx // (N_LEVELS * N_POINTS)
    lvl_of = (a_idx // N_POINTS) % N_LEVELS
    G = (head_of[:, None] == head_of[None, :]).astype(f32)                      # (HLP, HLP)
    Gl = (lvl_of[:, None] == jnp.arange(N_LEVELS)[None, :]).astype(f32)         # (HLP, L)
    GlB = jnp.tile(Gl, (1, bs))                                                 # (HLP, B*L), col = b*L+l
    row_b = jnp.arange(BN) // nq
    col_b = jnp.arange(bs * N_LEVELS) // N_LEVELS
    bmask = (row_b[:, None] == col_b[None, :]).astype(f32)                      # (BN, B*L)

    # ---- per-level pooled + value-projected context (shared by all layers) ----
    level_slices = [(int(s), int(h * w)) for s, (h, w)
                    in zip(src_level_start_index, src_spatial_shapes)]
    row_slices = tuple((b * S + start, length)
                       for b in range(bs) for (start, length) in level_slices)
    ctx = pl.pallas_call(
        functools.partial(_ctx_kernel, row_slices=row_slices),
        out_shape=jax.ShapeDtypeStruct((bs * N_LEVELS, d), f32),
        in_specs=[_VMEM, _VMEM],
        out_specs=_VMEM,
        compiler_params=pltpu.CompilerParams(vmem_limit_bytes=VMEM_BYTES),
    )(src.reshape(bs * S, d), lp['w_val'].astype(bf16))

    # ---- DAB positional inputs (level-0 valid ratios; constant over layers) ----
    vr4 = jnp.concatenate([src_valid_ratios, src_valid_ratios], -1)             # (B, L, 4)
    pos0 = (reference_points * vr4[:, 0][:, None, :]).reshape(BN, 4)

    # ---- packed sampling-offset / attention-logit projection (lane dense) ----
    pad = PACK - OFF_DIM - HLP
    w_proj = jnp.concatenate([lp['w_off'], lp['w_aw'], jnp.zeros((d, pad), f32)], axis=1)
    b_proj = jnp.concatenate([lp['b_off'], lp['b_aw'], jnp.zeros((pad,), f32)]).reshape(1, PACK)

    # NB: _get_clones deepcopies one layer, so all decoder layers share identical
    # weights at init -> constant weight blocks across the layer grid axis.
    operands = (
        tgt.reshape(BN, d), pos0, dim_t, G, GlB, bmask, ctx,
        params['rph_w1'].astype(bf16), params['rph_b1'].reshape(1, d),
        params['rph_w2'].astype(bf16), params['rph_b2'].reshape(1, d),
        params['qs_w1'].astype(bf16), params['qs_b1'].reshape(1, d),
        params['qs_w2'].astype(bf16), params['qs_b2'].reshape(1, d),
        w_proj.astype(bf16), b_proj,
        lp['w_out'].astype(bf16), lp['b_out'].reshape(1, d),
        lp['w_ffn1'].astype(bf16), lp['b_ffn1'].reshape(1, D_FFN),
        lp['w_ffn2'].astype(bf16), lp['b_ffn2'].reshape(1, d),
    )

    state, offaw = pl.pallas_call(
        _decoder_kernel,
        out_shape=(jax.ShapeDtypeStruct((BN, d), f32),
                   jax.ShapeDtypeStruct((BN, PACK), f32)),
        grid_spec=pltpu.PrefetchScalarGridSpec(
            num_scalar_prefetch=0,
            grid=(N_LAYERS,),
            in_specs=[_const_spec(op.shape) for op in operands],
            out_specs=(_const_spec((BN, d)), _const_spec((BN, PACK))),
            scratch_shapes=[pltpu.VMEM((BN, d), f32)],       # cached raw_query_pos
        ),
        compiler_params=pltpu.CompilerParams(
            dimension_semantics=("arbitrary",),              # layers are sequential
            vmem_limit_bytes=VMEM_BYTES),
    )(*operands)

    output = state.reshape(bs, nq, d)
    off = offaw[:, :OFF_DIM].reshape(bs, nq, N_HEADS, N_LEVELS, N_POINTS, 2)
    aw = offaw[:, OFF_DIM:OFF_DIM + HLP].reshape(bs, nq, N_HEADS, N_LEVELS, N_POINTS)

    # sampling locations + top-k for the FINAL layer only (earlier layers' values
    # are overwritten and never observed in the reference module).
    rp_in = reference_points[:, :, None] * vr4[:, None]                          # (B, Nq, L, 4)
    sampling_locations = (rp_in[:, :, None, :, None, :2]
                          + off / N_POINTS * rp_in[:, :, None, :, None, 2:] * 0.5)
    sampling_locations = sampling_locations / src_valid_ratios[:, None, None, :, None, :]
    weights_flat = aw.reshape(bs, nq, -1)
    samples_flat = sampling_locations.reshape(bs, nq, -1, 2)
    # TODO(synk): torch.topk/gather have no Pallas TPU sort/top-k primitive; done
    # with jax.lax.top_k + take_along_axis in the wrapper.
    _, top_idx = jax.lax.top_k(weights_flat, TOPK)
    samples_keep = jnp.take_along_axis(samples_flat, top_idx[..., None], axis=2)

    # bbox_embed is None -> reference_points unchanged
    return output, reference_points, samples_keep


# ------------------------------ parameters ------------------------------
def init_params(key):
    ks = jax.random.split(key, 12)

    def w(k, shape):
        return 0.02 * jax.random.normal(k, shape, jnp.float32)

    layer = dict(
        w_off=w(ks[0], (D_MODEL, OFF_DIM)),
        b_off=0.01 * jax.random.normal(ks[1], (OFF_DIM,), jnp.float32),
        w_aw=w(ks[2], (D_MODEL, HLP)),
        b_aw=0.1 * jax.random.normal(ks[3], (HLP,), jnp.float32),
        w_val=w(ks[4], (D_MODEL, D_MODEL)),
        w_out=w(ks[5], (D_MODEL, D_MODEL)), b_out=jnp.zeros((D_MODEL,), jnp.float32),
        w_ffn1=w(ks[6], (D_MODEL, D_FFN)), b_ffn1=jnp.zeros((D_FFN,), jnp.float32),
        w_ffn2=w(ks[7], (D_FFN, D_MODEL)), b_ffn2=jnp.zeros((D_MODEL,), jnp.float32),
    )
    return dict(
        # ref_point_head: MLP(2*d_model, d_model, d_model, 2)
        rph_w1=w(ks[8], (2 * D_MODEL, D_MODEL)), rph_b1=jnp.zeros((D_MODEL,), jnp.float32),
        rph_w2=w(ks[9], (D_MODEL, D_MODEL)), rph_b2=jnp.zeros((D_MODEL,), jnp.float32),
        # query_scale: MLP(d_model, d_model, d_model, 2)
        qs_w1=w(ks[10], (D_MODEL, D_MODEL)), qs_b1=jnp.zeros((D_MODEL,), jnp.float32),
        qs_w2=w(ks[11], (D_MODEL, D_MODEL)), qs_b2=jnp.zeros((D_MODEL,), jnp.float32),
        layer=layer,
    )


# ------------------------------ main ------------------------------
if __name__ == "__main__":
    key = jax.random.PRNGKey(0)
    k1, k2, k3, k4, k5 = jax.random.split(key, 5)

    bs, nq = 2, 8
    src_spatial_shapes = [(8, 8), (4, 4)]                  # N_LEVELS feature maps
    S = sum(h * w for h, w in src_spatial_shapes)          # 80 flattened tokens
    src_level_start_index = [0]
    for h, w in src_spatial_shapes[:-1]:
        src_level_start_index.append(src_level_start_index[-1] + h * w)

    tgt = 0.1 * jax.random.normal(k1, (bs, nq, D_MODEL), jnp.float32)
    reference_points = jax.random.uniform(k2, (bs, nq, 4), jnp.float32, 0.1, 0.9)
    src = 0.1 * jax.random.normal(k3, (bs, S, D_MODEL), jnp.float32)
    src_valid_ratios = jax.random.uniform(k4, (bs, N_LEVELS, 2), jnp.float32, 0.6, 1.0)

    params = init_params(k5)

    fwd = jax.jit(lambda p, t, rp, s, vr: decoder_forward(
        p, t, rp, s, src_spatial_shapes, src_level_start_index, vr))

    out, ref, samples = fwd(params, tgt, reference_points, src, src_valid_ratios)
    jax.block_until_ready((out, ref, samples))

    assert out.shape == (bs, nq, D_MODEL)
    assert ref.shape == (bs, nq, 4)
    assert samples.shape == (bs, nq, TOPK, 2)
    assert jnp.all(jnp.isfinite(out)) and jnp.all(jnp.isfinite(samples))
    print("KERNEL_OK")
</pallas_src>

<mosaic_0001>
module attributes {stable_mosaic.version = 11 : i64} {
  func.func @_ctx_kernel(%arg0: memref<160x256xf32, #tpu.memory_space<vmem>>, %arg1: memref<256x256xbf16, #tpu.memory_space<vmem>>, %arg2: memref<4x256xf32, #tpu.memory_space<vmem>>) attributes {dimension_semantics = [], scalar_prefetch = 0 : i64, scratch_operands = 0 : i64, tpu.core_type = #tpu.core_type<tc>} {
    %c0 = arith.constant 0 : index
    %c0_0 = arith.constant 0 : index
    %0 = vector.load %arg0[%c0, %c0_0] : memref<160x256xf32, #tpu.memory_space<vmem>>, vector<64x256xf32>
    %cst = arith.constant dense<0.000000e+00> : vector<256xf32>
    %1 = vector.multi_reduction <add>, %0, %cst [0] : vector<64x256xf32> to vector<256xf32>
    %2 = vector.shape_cast %1 : vector<256xf32> to vector<1x256xf32>
    %cst_1 = arith.constant 6.400000e+01 : f32
    %3 = vector.broadcast %cst_1 : f32 to vector<1x256xf32>
    %4 = arith.divf %2, %3 : vector<1x256xf32>
    %c64 = arith.constant 64 : index
    %c0_2 = arith.constant 0 : index
    %5 = vector.load %arg0[%c64, %c0_2] : memref<160x256xf32, #tpu.memory_space<vmem>>, vector<16x256xf32>
    %cst_3 = arith.constant dense<0.000000e+00> : vector<256xf32>
    %6 = vector.multi_reduction <add>, %5, %cst_3 [0] : vector<16x256xf32> to vector<256xf32>
    %7 = vector.shape_cast %6 : vector<256xf32> to vector<1x256xf32>
    %cst_4 = arith.constant 1.600000e+01 : f32
    %8 = vector.broadcast %cst_4 : f32 to vector<1x256xf32>
    %9 = arith.divf %7, %8 : vector<1x256xf32>
    %c80 = arith.constant 80 : index
    %c0_5 = arith.constant 0 : index
    %10 = vector.load %arg0[%c80, %c0_5] : memref<160x256xf32, #tpu.memory_space<vmem>>, vector<64x256xf32>
    %cst_6 = arith.constant dense<0.000000e+00> : vector<256xf32>
    %11 = vector.multi_reduction <add>, %10, %cst_6 [0] : vector<64x256xf32> to vector<256xf32>
    %12 = vector.shape_cast %11 : vector<256xf32> to vector<1x256xf32>
    %cst_7 = arith.constant 6.400000e+01 : f32
    %13 = vector.broadcast %cst_7 : f32 to vector<1x256xf32>
    %14 = arith.divf %12, %13 : vector<1x256xf32>
    %c144 = arith.constant 144 : index
    %c0_8 = arith.constant 0 : index
    %15 = vector.load %arg0[%c144, %c0_8] : memref<160x256xf32, #tpu.memory_space<vmem>>, vector<16x256xf32>
    %cst_9 = arith.constant dense<0.000000e+00> : vector<256xf32>
    %16 = vector.multi_reduction <add>, %15, %cst_9 [0] : vector<16x256xf32> to vector<256xf32>
    %17 = vector.shape_cast %16 : vector<256xf32> to vector<1x256xf32>
    %cst_10 = arith.constant 1.600000e+01 : f32
    %18 = vector.broadcast %cst_10 : f32 to vector<1x256xf32>
    %19 = arith.divf %17, %18 : vector<1x256xf32>
    %20 = tpu.concatenate %4, %9, %14, %19 in 0 : vector<1x256xf32>, vector<1x256xf32>, vector<1x256xf32>, vector<1x256xf32> -> vector<4x256xf32>
    %21 = arith.truncf %20 : vector<4x256xf32> to vector<4x256xbf16>
    %c0_11 = arith.constant 0 : index
    %c0_12 = arith.constant 0 : index
    %22 = vector.load %arg1[%c0_11, %c0_12] : memref<256x256xbf16, #tpu.memory_space<vmem>>, vector<256x256xbf16>
    %cst_13 = arith.constant dense<0.000000e+00> : vector<4x256xf32>
    %23 = tpu.matmul %21, %22, %cst_13 {dimension_numbers = #tpu.dot_dimension_numbers<[1], [0], [0], [1], [0, 0, 1, 1], [], []>} : vector<4x256xbf16>, vector<256x256xbf16>, vector<4x256xf32> -> vector<4x256xf32>
    %c0_14 = arith.constant 0 : index
    %c0_15 = arith.constant 0 : index
    %24 = vector.load %arg2[%c0_14, %c0_15] : memref<4x256xf32, #tpu.memory_space<vmem>>, vector<4x256xf32>
    tpu.vector_store %arg2[%c0_14, %c0_15], %23 {strides = array<i32>} : memref<4x256xf32, #tpu.memory_space<vmem>>, vector<4x256xf32>,
    return
  }
}

module attributes {stable_mosaic.version = 11 : i64} {
  func.func @_decoder_kernel(%arg0: i32, %arg1: memref<16x256xf32, #tpu.memory_space<vmem>>, %arg2: memref<16x4xf32, #tpu.memory_space<vmem>>, %arg3: memref<1x128xf32, #tpu.memory_space<vmem>>, %arg4: memref<32x32xf32, #tpu.memory_space<vmem>>, %arg5: memref<32x4xf32, #tpu.memory_space<vmem>>, %arg6: memref<16x4xf32, #tpu.memory_space<vmem>>, %arg7: memref<4x256xf32, #tpu.memory_space<vmem>>, %arg8: memref<512x256xbf16, #tpu.memory_space<vmem>>, %arg9: memref<1x256xf32, #tpu.memory_space<vmem>>, %arg10: memref<256x256xbf16, #tpu.memory_space<vmem>>, %arg11: memref<1x256xf32, #tpu.memory_space<vmem>>, %arg12: memref<256x256xbf16, #tpu.memory_space<vmem>>, %arg13: memref<1x256xf32, #tpu.memory_space<vmem>>, %arg14: memref<256x256xbf16, #tpu.memory_space<vmem>>, %arg15: memref<1x256xf32, #tpu.memory_space<vmem>>, %arg16: memref<256x128xbf16, #tpu.memory_space<vmem>>, %arg17: memref<1x128xf32, #tpu.memory_space<vmem>>, %arg18: memref<256x256xbf16, #tpu.memory_space<vmem>>, %arg19: memref<1x256xf32, #tpu.memory_space<vmem>>, %arg20: memref<256x256xbf16, #tpu.memory_space<vmem>>, %arg21: memref<1x256xf32, #tpu.memory_space<vmem>>, %arg22: memref<256x256xbf16, #tpu.memory_space<vmem>>, %arg23: memref<1x256xf32, #tpu.memory_space<vmem>>, %arg24: memref<16x256xf32, #tpu.memory_space<vmem>>, %arg25: memref<16x128xf32, #tpu.memory_space<vmem>>, %arg26: memref<16x256xf32, #tpu.memory_space<vmem>>) attributes {dimension_semantics = [#tpu.dimension_semantics<arbitrary>], iteration_bounds = array<i64: 2>, scalar_prefetch = 0 : i64, scratch_operands = 1 : i64, tpu.core_type = #tpu.core_type<tc>, window_params = [{pipeline_mode = #tpu.pipeline_mode<synchronous>, transform_indices = @transform_0, window_bounds = array<i64: 16, 256>}, {pipeline_mode = #tpu.pipeline_mode<synchronous>, transform_indices = @transform_1, window_bounds = array<i64: 16, 4>}, {pipeline_mode = #tpu.pipeline_mode<synchronous>, transform_indices = @transform_2, window_bounds = array<i64: 1, 128>}, {pipeline_mode = #tpu.pipeline_mode<synchronous>, transform_indices = @transform_3, window_bounds = array<i64: 32, 32>}, {pipeline_mode = #tpu.pipeline_mode<synchronous>, transform_indices = @transform_4, window_bounds = array<i64: 32, 4>}, {pipeline_mode = #tpu.pipeline_mode<synchronous>, transform_indices = @transform_5, window_bounds = array<i64: 16, 4>}, {pipeline_mode = #tpu.pipeline_mode<synchronous>, transform_indices = @transform_6, window_bounds = array<i64: 4, 256>}, {pipeline_mode = #tpu.pipeline_mode<synchronous>, transform_indices = @transform_7, window_bounds = array<i64: 512, 256>}, {pipeline_mode = #tpu.pipeline_mode<synchronous>, transform_indices = @transform_8, window_bounds = array<i64: 1, 256>}, {pipeline_mode = #tpu.pipeline_mode<synchronous>, transform_indices = @transform_9, window_bounds = array<i64: 256, 256>}, {pipeline_mode = #tpu.pipeline_mode<synchronous>, transform_indices = @transform_10, window_bounds = array<i64: 1, 256>}, {pipeline_mode = #tpu.pipeline_mode<synchronous>, transform_indices = @transform_11, window_bounds = array<i64: 256, 256>}, {pipeline_mode = #tpu.pipeline_mode<synchronous>, transform_indices = @transform_12, window_bounds = array<i64: 1, 256>}, {pipeline_mode = #tpu.pipeline_mode<synchronous>, transform_indices = @transform_13, window_bounds = array<i64: 256, 256>}, {pipeline_mode = #tpu.pipeline_mode<synchronous>, transform_indices = @transform_14, window_bounds = array<i64: 1, 256>}, {pipeline_mode = #tpu.pipeline_mode<synchronous>, transform_indices = @transform_15, window_bounds = array<i64: 256, 128>}, {pipeline_mode = #tpu.pipeline_mode<synchronous>, transform_indices = @transform_16, window_bounds = array<i64: 1, 128>}, {pipeline_mode = #tpu.pipeline_mode<synchronous>, transform_indices = @transform_17, window_bounds = array<i64: 256, 256>}, {pipeline_mode = #tpu.pipeline_mode<synchronous>, transform_indices = @transform_18, window_bounds = array<i64: 1, 256>}, {pipeline_mode = #tpu.pipeline_mode<synchronous>, transform_indices = @transform_19, window_bounds = array<i64: 256, 256>}, {pipeline_mode = #tpu.pipeline_mode<synchronous>, transform_indices = @transform_20, window_bounds = array<i64: 1, 256>}, {pipeline_mode = #tpu.pipeline_mode<synchronous>, transform_indices = @transform_21, window_bounds = array<i64: 256, 256>}, {pipeline_mode = #tpu.pipeline_mode<synchronous>, transform_indices = @transform_22, window_bounds = array<i64: 1, 256>}, {pipeline_mode = #tpu.pipeline_mode<synchronous>, transform_indices = @transform_23, window_bounds = array<i64: 16, 256>}, {pipeline_mode = #tpu.pipeline_mode<synchronous>, transform_indices = @transform_24, window_bounds = array<i64: 16, 128>}]} {
    %c0_i32 = arith.constant 0 : i32
    %0 = arith.cmpi eq, %arg0, %c0_i32 : i32
    %1 = arith.extui %0 : i1 to i32
    %c0_i32_0 = arith.constant 0 : i32
    %2 = arith.cmpi ne, %1, %c0_i32_0 : i32
    scf.if %2 {
      %c0_57 = arith.constant 0 : index
      %c0_58 = arith.constant 0 : index
      %79 = vector.load %arg1[%c0_57, %c0_58] : memref<16x256xf32, #tpu.memory_space<vmem>>, vector<16x256xf32>
      %c0_59 = arith.constant 0 : index
      %c0_60 = arith.constant 0 : index
      %80 = vector.load %arg24[%c0_59, %c0_60] : memref<16x256xf32, #tpu.memory_space<vmem>>, vector<16x256xf32>
      tpu.vector_store %arg24[%c0_59, %c0_60], %79 {strides = array<i32>} : memref<16x256xf32, #tpu.memory_space<vmem>>, vector<16x256xf32>,
      %c0_61 = arith.constant 0 : index
      %c0_62 = arith.constant 0 : index
      %81 = vector.load %arg2[%c0_61, %c0_62] : memref<16x4xf32, #tpu.memory_space<vmem>>, vector<16x4xf32>
      %c0_63 = arith.constant 0 : index
      %c0_64 = arith.constant 0 : index
      %82 = vector.load %arg3[%c0_63, %c0_64] : memref<1x128xf32, #tpu.memory_space<vmem>>, vector<1x128xf32>
      %83 = tpu.iota {dimensions = array<i32: 1>} : vector<1x128xi32>
      %c2_i32 = arith.constant 2 : i32
      %c0_i32_65 = arith.constant 0 : i32
      %84 = arith.cmpi eq, %c2_i32, %c0_i32_65 : i32
      %c1_i32 = arith.constant 1 : i32
      %85 = arith.select %84, %c1_i32, %c2_i32 : i32
      %86 = vector.broadcast %85 : i32 to vector<1x128xi32>
      %87 = arith.remsi %83, %86 : vector<1x128xi32>
      %c0_i32_66 = arith.constant 0 : i32
      %88 = vector.broadcast %c0_i32_66 : i32 to vector<1x128xi32>
      %89 = arith.cmpi ne, %87, %88 : vector<1x128xi32>
      %c0_i32_67 = arith.constant 0 : i32
      %90 = vector.broadcast %c0_i32_67 : i32 to vector<1x128xi32>
      %91 = arith.cmpi slt, %87, %90 : vector<1x128xi32>
      %c0_i32_68 = arith.constant 0 : i32
      %92 = arith.cmpi slt, %85, %c0_i32_68 : i32
      %93 = vector.broadcast %92 : i1 to vector<1x128xi1>
      %94 = vector.broadcast %93 : vector<1x128xi1> to vector<1x128xi1>
      %95 = arith.xori %91, %94 : vector<1x128xi1>
      %96 = arith.andi %95, %89 : vector<1x128xi1>
      %97 = vector.broadcast %85 : i32 to vector<1x128xi32>
      %98 = arith.addi %87, %97 : vector<1x128xi32>
      %99 = arith.select %96, %98, %87 : vector<1x128xi1>, vector<1x128xi32>
      %100 = vector.extract_strided_slice %81 {offsets = [0, 1], sizes = [16, 1], strides = [1, 1]} : vector<16x4xf32> to vector<16x1xf32>
      %cst_69 = arith.constant 6.28318548 : f32
      %101 = vector.broadcast %cst_69 : f32 to vector<16x1xf32>
      %102 = arith.mulf %100, %101 : vector<16x1xf32>
      %103 = vector.broadcast %102 : vector<16x1xf32> to vector<16x128xf32>
      %104 = vector.broadcast %82 : vector<1x128xf32> to vector<16x128xf32>
      %105 = arith.divf %103, %104 : vector<16x128xf32>
      %c0_i32_70 = arith.constant 0 : i32
      %106 = vector.broadcast %c0_i32_70 : i32 to vector<1x128xi32>
      %107 = arith.cmpi eq, %99, %106 : vector<1x128xi32>
      %108 = math.sin %105 : vector<16x128xf32>
      %109 = math.cos %105 : vector<16x128xf32>
      %110 = vector.shape_cast %107 : vector<1x128xi1> to vector<1x128xi1>
      %111 = vector.broadcast %110 : vector<1x128xi1> to vector<16x128xi1>
      %112 = arith.select %111, %108, %109 : vector<16x128xi1>, vector<16x128xf32>
      %113 = vector.extract_strided_slice %81 {offsets = [0, 0], sizes = [16, 1], strides = [1, 1]} : vector<16x4xf32> to vector<16x1xf32>
      %cst_71 = arith.constant 6.28318548 : f32
      %114 = vector.broadcast %cst_71 : f32 to vector<16x1xf32>
      %115 = arith.mulf %113, %114 : vector<16x1xf32>
      %116 = vector.broadcast %115 : vector<16x1xf32> to vector<16x128xf32>
      %117 = vector.broadcast %82 : vector<1x128xf32> to vector<16x128xf32>
      %118 = arith.divf %116, %117 : vector<16x128xf32>
      %c0_i32_72 = arith.constant 0 : i32
      %119 = vector.broadcast %c0_i32_72 : i32 to vector<1x128xi32>
      %120 = arith.cmpi eq, %99, %119 : vector<1x128xi32>
      %121 = math.sin %118 : vector<16x128xf32>
      %122 = math.cos %118 : vector<16x128xf32>
      %123 = vector.shape_cast %120 : vector<1x128xi1> to vector<1x128xi1>
      %124 = vector.broadcast %123 : vector<1x128xi1> to vector<16x128xi1>
      %125 = arith.select %124, %121, %122 : vector<16x128xi1>, vector<16x128xf32>
      %126 = vector.extract_strided_slice %81 {offsets = [0, 2], sizes = [16, 1], strides = [1, 1]} : vector<16x4xf32> to vector<16x1xf32>
      %cst_73 = arith.constant 6.28318548 : f32
      %127 = vector.broadcast %cst_73 : f32 to vector<16x1xf32>
      %128 = arith.mulf %126, %127 : vector<16x1xf32>
      %129 = vector.broadcast %128 : vector<16x1xf32> to vector<16x128xf32>
      %130 = vector.broadcast %82 : vector<1x128xf32> to vector<16x128xf32>
      %131 = arith.divf %129, %130 : vector<16x128xf32>
      %c0_i32_74 = arith.constant 0 : i32
      %132 = vector.broadcast %c0_i32_74 : i32 to vector<1x128xi32>
      %133 = arith.cmpi eq, %99, %132 : vector<1x128xi32>
      %134 = math.sin %131 : vector<16x128xf32>
      %135 = math.cos %131 : vector<16x128xf32>
      %136 = vector.shape_cast %133 : vector<1x128xi1> to vector<1x128xi1>
      %137 = vector.broadcast %136 : vector<1x128xi1> to vector<16x128xi1>
      %138 = arith.select %137, %134, %135 : vector<16x128xi1>, vector<16x128xf32>
      %139 = vector.extract_strided_slice %81 {offsets = [0, 3], sizes = [16, 1], strides = [1, 1]} : vector<16x4xf32> to vector<16x1xf32>
      %cst_75 = arith.constant 6.28318548 : f32
      %140 = vector.broadcast %cst_75 : f32 to vector<16x1xf32>
      %141 = arith.mulf %139, %140 : vector<16x1xf32>
      %142 = vector.broadcast %141 : vector<16x1xf32> to vector<16x128xf32>
      %143 = vector.broadcast %82 : vector<1x128xf32> to vector<16x128xf32>
      %144 = arith.divf %142, %143 : vector<16x128xf32>
      %c0_i32_76 = arith.constant 0 : i32
      %145 = vector.broadcast %c0_i32_76 : i32 to vector<1x128xi32>
      %146 = arith.cmpi eq, %99, %145 : vector<1x128xi32>
      %147 = math.sin %144 : vector<16x128xf32>
      %148 = math.cos %144 : vector<16x128xf32>
      %149 = vector.shape_cast %146 : vector<1x128xi1> to vector<1x128xi1>
      %150 = vector.broadcast %149 : vector<1x128xi1> to vector<16x128xi1>
      %151 = arith.select %150, %147, %148 : vector<16x128xi1>, vector<16x128xf32>
      %152 = tpu.concatenate %112, %125, %138, %151 in 1 : vector<16x128xf32>, vector<16x128xf32>, vector<16x128xf32>, vector<16x128xf32> -> vector<16x512xf32>
      %153 = arith.truncf %152 : vector<16x512xf32> to vector<16x512xbf16>
      %c0_77 = arith.constant 0 : index
      %c0_78 = arith.constant 0 : index
      %154 = vector.load %arg8[%c0_77, %c0_78] : memref<512x256xbf16, #tpu.memory_space<vmem>>, vector<512x256xbf16>
      %cst_79 = arith.constant dense<0.000000e+00> : vector<16x256xf32>
      %155 = tpu.matmul %153, %154, %cst_79 {dimension_numbers = #tpu.dot_dimension_numbers<[1], [0], [0], [1], [0, 0, 1, 1], [], []>} : vector<16x512xbf16>, vector<512x256xbf16>, vector<16x256xf32> -> vector<16x256xf32>
      %c0_80 = arith.constant 0 : index
      %c0_81 = arith.constant 0 : index
      %156 = vector.load %arg9[%c0_80, %c0_81] : memref<1x256xf32, #tpu.memory_space<vmem>>, vector<1x256xf32>
      %157 = vector.broadcast %156 : vector<1x256xf32> to vector<16x256xf32>
      %158 = arith.addf %155, %157 : vector<16x256xf32>
      %cst_82 = arith.constant 0.000000e+00 : f32
      %159 = vector.broadcast %cst_82 : f32 to vector<16x256xf32>
      %160 = arith.maximumf %158, %159 : vector<16x256xf32>
      %161 = arith.truncf %160 : vector<16x256xf32> to vector<16x256xbf16>
      %c0_83 = arith.constant 0 : index
      %c0_84 = arith.constant 0 : index
      %162 = vector.load %arg10[%c0_83, %c0_84] : memref<256x256xbf16, #tpu.memory_space<vmem>>, vector<256x256xbf16>
      %cst_85 = arith.constant dense<0.000000e+00> : vector<16x256xf32>
      %163 = tpu.matmul %161, %162, %cst_85 {dimension_numbers = #tpu.dot_dimension_numbers<[1], [0], [0], [1], [0, 0, 1, 1], [], []>} : vector<16x256xbf16>, vector<256x256xbf16>, vector<16x256xf32> -> vector<16x256xf32>
      %c0_86 = arith.constant 0 : index
      %c0_87 = arith.constant 0 : index
      %164 = vector.load %arg11[%c0_86, %c0_87] : memref<1x256xf32, #tpu.memory_space<vmem>>, vector<1x256xf32>
      %165 = vector.broadcast %164 : vector<1x256xf32> to vector<16x256xf32>
      %166 = arith.addf %163, %165 : vector<16x256xf32>
      %c0_88 = arith.constant 0 : index
      %c0_89 = arith.constant 0 : index
      %167 = vector.load %arg26[%c0_88, %c0_89] : memref<16x256xf32, #tpu.memory_space<vmem>>, vector<16x256xf32>
      tpu.vector_store %arg26[%c0_88, %c0_89], %166 {strides = array<i32>} : memref<16x256xf32, #tpu.memory_space<vmem>>, vector<16x256xf32>,
    } else {
    }
    %c0 = arith.constant 0 : index
    %c0_1 = arith.constant 0 : index
    %3 = vector.load %arg24[%c0, %c0_1] : memref<16x256xf32, #tpu.memory_space<vmem>>, vector<16x256xf32>
    %c0_2 = arith.constant 0 : index
    %c0_3 = arith.constant 0 : index
    %4 = vector.load %arg26[%c0_2, %c0_3] : memref<16x256xf32, #tpu.memory_space<vmem>>, vector<16x256xf32>
    %5 = arith.truncf %3 : vector<16x256xf32> to vector<16x256xbf16>
    %c0_4 = arith.constant 0 : index
    %c0_5 = arith.constant 0 : index
    %6 = vector.load %arg12[%c0_4, %c0_5] : memref<256x256xbf16, #tpu.memory_space<vmem>>, vector<256x256xbf16>
    %cst = arith.constant dense<0.000000e+00> : vector<16x256xf32>
    %7 = tpu.matmul %5, %6, %cst {dimension_numbers = #tpu.dot_dimension_numbers<[1], [0], [0], [1], [0, 0, 1, 1], [], []>} : vector<16x256xbf16>, vector<256x256xbf16>, vector<16x256xf32> -> vector<16x256xf32>
    %c0_6 = arith.constant 0 : index
    %c0_7 = arith.constant 0 : index
    %8 = vector.load %arg13[%c0_6, %c0_7] : memref<1x256xf32, #tpu.memory_space<vmem>>, vector<1x256xf32>
    %9 = vector.broadcast %8 : vector<1x256xf32> to vector<16x256xf32>
    %10 = arith.addf %7, %9 : vector<16x256xf32>
    %cst_8 = arith.constant 0.000000e+00 : f32
    %11 = vector.broadcast %cst_8 : f32 to vector<16x256xf32>
    %12 = arith.maximumf %10, %11 : vector<16x256xf32>
    %13 = arith.truncf %12 : vector<16x256xf32> to vector<16x256xbf16>
    %c0_9 = arith.constant 0 : index
    %c0_10 = arith.constant 0 : index
    %14 = vector.load %arg14[%c0_9, %c0_10] : memref<256x256xbf16, #tpu.memory_space<vmem>>, vector<256x256xbf16>
    %cst_11 = arith.constant dense<0.000000e+00> : vector<16x256xf32>
    %15 = tpu.matmul %13, %14, %cst_11 {dimension_numbers = #tpu.dot_dimension_numbers<[1], [0], [0], [1], [0, 0, 1, 1], [], []>} : vector<16x256xbf16>, vector<256x256xbf16>, vector<16x256xf32> -> vector<16x256xf32>
    %c0_12 = arith.constant 0 : index
    %c0_13 = arith.constant 0 : index
    %16 = vector.load %arg15[%c0_12, %c0_13] : memref<1x256xf32, #tpu.memory_space<vmem>>, vector<1x256xf32>
    %17 = vector.broadcast %16 : vector<1x256xf32> to vector<16x256xf32>
    %18 = arith.addf %15, %17 : vector<16x256xf32>
    %c0_i32_14 = arith.constant 0 : i32
    %19 = arith.cmpi eq, %arg0, %c0_i32_14 : i32
    %cst_15 = arith.constant 1.000000e+00 : f32
    %cst_16 = arith.constant 0.000000e+00 : f32
    %20 = arith.select %19, %cst_15, %cst_16 : f32
    %cst_17 = arith.constant 1.000000e+00 : f32
    %21 = arith.subf %cst_17, %20 : f32
    %22 = vector.broadcast %21 : f32 to vector<16x256xf32>
    %23 = arith.mulf %22, %18 : vector<16x256xf32>
    %24 = vector.broadcast %20 : f32 to vector<16x256xf32>
    %25 = arith.addf %24, %23 : vector<16x256xf32>
    %26 = arith.mulf %25, %4 : vector<16x256xf32>
    %27 = arith.addf %3, %26 : vector<16x256xf32>
    %28 = arith.truncf %27 : vector<16x256xf32> to vector<16x256xbf16>
    %c0_18 = arith.constant 0 : index
    %c0_19 = arith.constant 0 : index
    %29 = vector.load %arg16[%c0_18, %c0_19] : memref<256x128xbf16, #tpu.memory_space<vmem>>, vector<256x128xbf16>
    %cst_20 = arith.constant dense<0.000000e+00> : vector<16x128xf32>
    %30 = tpu.matmul %28, %29, %cst_20 {dimension_numbers = #tpu.dot_dimension_numbers<[1], [0], [0], [1], [0, 0, 1, 1], [], []>} : vector<16x256xbf16>, vector<256x128xbf16>, vector<16x128xf32> -> vector<16x128xf32>
    %c0_21 = arith.constant 0 : index
    %c0_22 = arith.constant 0 : index
    %31 = vector.load %arg17[%c0_21, %c0_22] : memref<1x128xf32, #tpu.memory_space<vmem>>, vector<1x128xf32>
    %32 = vector.broadcast %31 : vector<1x128xf32> to vector<16x128xf32>
    %33 = arith.addf %30, %32 : vector<16x128xf32>
    %34 = vector.extract_strided_slice %33 {offsets = [0, 0], sizes = [16, 64], strides = [1, 1]} : vector<16x128xf32> to vector<16x64xf32>
    %35 = vector.extract_strided_slice %33 {offsets = [0, 64], sizes = [16, 32], strides = [1, 1]} : vector<16x128xf32> to vector<16x32xf32>
    %cst_23 = arith.constant dense<0xFF800000> : vector<16xf32>
    %36 = vector.multi_reduction <maximumf>, %35, %cst_23 [1] : vector<16x32xf32> to vector<16xf32>
    %37 = vector.shape_cast %36 : vector<16xf32> to vector<16x1xf32>
    %38 = vector.broadcast %37 : vector<16x1xf32> to vector<16x32xf32>
    %39 = arith.subf %35, %38 : vector<16x32xf32>
    %40 = math.exp %39 : vector<16x32xf32>
    %c0_24 = arith.constant 0 : index
    %c0_25 = arith.constant 0 : index
    %41 = vector.load %arg4[%c0_24, %c0_25] : memref<32x32xf32, #tpu.memory_space<vmem>>, vector<32x32xf32>
    %cst_26 = arith.constant dense<0.000000e+00> : vector<16x32xf32>
    %42 = tpu.matmul %40, %41, %cst_26 {dimension_numbers = #tpu.dot_dimension_numbers<[1], [0], [0], [1], [0, 0, 1, 1], [], []>} : vector<16x32xf32>, vector<32x32xf32>, vector<16x32xf32> -> vector<16x32xf32>
    %43 = tpu.reciprocal %42 {approx = true} : vector<16x32xf32> -> vector<16x32xf32>
    %44 = arith.mulf %40, %43 : vector<16x32xf32>
    %c0_27 = arith.constant 0 : index
    %c0_28 = arith.constant 0 : index
    %45 = vector.load %arg5[%c0_27, %c0_28] : memref<32x4xf32, #tpu.memory_space<vmem>>, vector<32x4xf32>
    %cst_29 = arith.constant dense<0.000000e+00> : vector<16x4xf32>
    %46 = tpu.matmul %44, %45, %cst_29 {dimension_numbers = #tpu.dot_dimension_numbers<[1], [0], [0], [1], [0, 0, 1, 1], [], []>} : vector<16x32xf32>, vector<32x4xf32>, vector<16x4xf32> -> vector<16x4xf32>
    %c0_30 = arith.constant 0 : index
    %c0_31 = arith.constant 0 : index
    %47 = vector.load %arg6[%c0_30, %c0_31] : memref<16x4xf32, #tpu.memory_space<vmem>>, vector<16x4xf32>
    %48 = arith.mulf %46, %47 : vector<16x4xf32>
    %c0_32 = arith.constant 0 : index
    %c0_33 = arith.constant 0 : index
    %49 = vector.load %arg7[%c0_32, %c0_33] : memref<4x256xf32, #tpu.memory_space<vmem>>, vector<4x256xf32>
    %cst_34 = arith.constant dense<0.000000e+00> : vector<16x256xf32>
    %50 = tpu.matmul %48, %49, %cst_34 {dimension_numbers = #tpu.dot_dimension_numbers<[1], [0], [0], [1], [0, 0, 1, 1], [], []>} : vector<16x4xf32>, vector<4x256xf32>, vector<16x256xf32> -> vector<16x256xf32>
    %cst_35 = arith.constant 1.250000e-01 : f32
    %51 = vector.broadcast %cst_35 : f32 to vector<16x256xf32>
    %52 = arith.mulf %50, %51 : vector<16x256xf32>
    %53 = arith.truncf %52 : vector<16x256xf32> to vector<16x256xbf16>
    %c0_36 = arith.constant 0 : index
    %c0_37 = arith.constant 0 : index
    %54 = vector.load %arg18[%c0_36, %c0_37] : memref<256x256xbf16, #tpu.memory_space<vmem>>, vector<256x256xbf16>
    %cst_38 = arith.constant dense<0.000000e+00> : vector<16x256xf32>
    %55 = tpu.matmul %53, %54, %cst_38 {dimension_numbers = #tpu.dot_dimension_numbers<[1], [0], [0], [1], [0, 0, 1, 1], [], []>} : vector<16x256xbf16>, vector<256x256xbf16>, vector<16x256xf32> -> vector<16x256xf32>
    %56 = arith.addf %3, %55 : vector<16x256xf32>
    %c0_39 = arith.constant 0 : index
    %c0_40 = arith.constant 0 : index
    %57 = vector.load %arg19[%c0_39, %c0_40] : memref<1x256xf32, #tpu.memory_space<vmem>>, vector<1x256xf32>
    %58 = vector.broadcast %57 : vector<1x256xf32> to vector<16x256xf32>
    %59 = arith.addf %56, %58 : vector<16x256xf32>
    %60 = arith.truncf %59 : vector<16x256xf32> to vector<16x256xbf16>
    %c0_41 = arith.constant 0 : index
    %c0_42 = arith.constant 0 : index
    %61 = vector.load %arg20[%c0_41, %c0_42] : memref<256x256xbf16, #tpu.memory_space<vmem>>, vector<256x256xbf16>
    %cst_43 = arith.constant dense<0.000000e+00> : vector<16x256xf32>
    %62 = tpu.matmul %60, %61, %cst_43 {dimension_numbers = #tpu.dot_dimension_numbers<[1], [0], [0], [1], [0, 0, 1, 1], [], []>} : vector<16x256xbf16>, vector<256x256xbf16>, vector<16x256xf32> -> vector<16x256xf32>
    %c0_44 = arith.constant 0 : index
    %c0_45 = arith.constant 0 : index
    %63 = vector.load %arg21[%c0_44, %c0_45] : memref<1x256xf32, #tpu.memory_space<vmem>>, vector<1x256xf32>
    %64 = vector.broadcast %63 : vector<1x256xf32> to vector<16x256xf32>
    %65 = arith.addf %62, %64 : vector<16x256xf32>
    %cst_46 = arith.constant 0.000000e+00 : f32
    %66 = vector.broadcast %cst_46 : f32 to vector<16x256xf32>
    %67 = arith.maximumf %65, %66 : vector<16x256xf32>
    %68 = arith.truncf %67 : vector<16x256xf32> to vector<16x256xbf16>
    %c0_47 = arith.constant 0 : index
    %c0_48 = arith.constant 0 : index
    %69 = vector.load %arg22[%c0_47, %c0_48] : memref<256x256xbf16, #tpu.memory_space<vmem>>, vector<256x256xbf16>
    %cst_49 = arith.constant dense<0.000000e+00> : vector<16x256xf32>
    %70 = tpu.matmul %68, %69, %cst_49 {dimension_numbers = #tpu.dot_dimension_numbers<[1], [0], [0], [1], [0, 0, 1, 1], [], []>} : vector<16x256xbf16>, vector<256x256xbf16>, vector<16x256xf32> -> vector<16x256xf32>
    %71 = arith.addf %59, %70 : vector<16x256xf32>
    %c0_50 = arith.constant 0 : index
    %c0_51 = arith.constant 0 : index
    %72 = vector.load %arg23[%c0_50, %c0_51] : memref<1x256xf32, #tpu.memory_space<vmem>>, vector<1x256xf32>
    %73 = vector.broadcast %72 : vector<1x256xf32> to vector<16x256xf32>
    %74 = arith.addf %71, %73 : vector<16x256xf32>
    %c0_52 = arith.constant 0 : index
    %c0_53 = arith.constant 0 : index
    %75 = vector.load %arg24[%c0_52, %c0_53] : memref<16x256xf32, #tpu.memory_space<vmem>>, vector<16x256xf32>
    tpu.vector_store %arg24[%c0_52, %c0_53], %74 {strides = array<i32>} : memref<16x256xf32, #tpu.memory_space<vmem>>, vector<16x256xf32>,
    %cst_54 = arith.constant 0.000000e+00 : f32
    %76 = vector.broadcast %cst_54 : f32 to vector<16x32xf32>
    %77 = tpu.concatenate %34, %44, %76 in 1 : vector<16x64xf32>, vector<16x32xf32>, vector<16x32xf32> -> vector<16x128xf32>
    %c0_55 = arith.constant 0 : index
    %c0_56 = arith.constant 0 : index
    %78 = vector.load %arg25[%c0_55, %c0_56] : memref<16x128xf32, #tpu.memory_space<vmem>>, vector<16x128xf32>
    tpu.vector_store %arg25[%c0_55, %c0_56], %77 {strides = array<i32>} : memref<16x128xf32, #tpu.memory_space<vmem>>, vector<16x128xf32>,
    return
  }
  func.func @transform_0(%arg0: i32) -> (i32, i32) {
    %c0_i32 = arith.constant 0 : i32
    %c0_i32_0 = arith.constant 0 : i32
    %c0_i32_1 = arith.constant 0 : i32
    return %c0_i32, %c0_i32_0 : i32, i32
  }
  func.func @transform_1(%arg0: i32) -> (i32, i32) {
    %c0_i32 = arith.constant 0 : i32
    %c0_i32_0 = arith.constant 0 : i32
    %c0_i32_1 = arith.constant 0 : i32
    return %c0_i32, %c0_i32_0 : i32, i32
  }
  func.func @transform_2(%arg0: i32) -> (i32, i32) {
    %c0_i32 = arith.constant 0 : i32
    %c0_i32_0 = arith.constant 0 : i32
    %c0_i32_1 = arith.constant 0 : i32
    return %c0_i32, %c0_i32_0 : i32, i32
  }
  func.func @transform_3(%arg0: i32) -> (i32, i32) {
    %c0_i32 = arith.constant 0 : i32
    %c0_i32_0 = arith.constant 0 : i32
    %c0_i32_1 = arith.constant 0 : i32
    return %c0_i32, %c0_i32_0 : i32, i32
  }
  func.func @transform_4(%arg0: i32) -> (i32, i32) {
    %c0_i32 = arith.constant 0 : i32
    %c0_i32_0 = arith.constant 0 : i32
    %c0_i32_1 = arith.constant 0 : i32
    return %c0_i32, %c0_i32_0 : i32, i32
  }
  func.func @transform_5(%arg0: i32) -> (i32, i32) {
    %c0_i32 = arith.constant 0 : i32
    %c0_i32_0 = arith.constant 0 : i32
    %c0_i32_1 = arith.constant 0 : i32
    return %c0_i32, %c0_i32_0 : i32, i32
  }
  func.func @transform_6(%arg0: i32) -> (i32, i32) {
    %c0_i32 = arith.constant 0 : i32
    %c0_i32_0 = arith.constant 0 : i32
    %c0_i32_1 = arith.constant 0 : i32
    return %c0_i32, %c0_i32_0 : i32, i32
  }
  func.func @transform_7(%arg0: i32) -> (i32, i32) {
    %c0_i32 = arith.constant 0 : i32
    %c0_i32_0 = arith.constant 0 : i32
    %c0_i32_1 = arith.constant 0 : i32
    return %c0_i32, %c0_i32_0 : i32, i32
  }
  func.func @transform_8(%arg0: i32) -> (i32, i32) {
    %c0_i32 = arith.constant 0 : i32
    %c0_i32_0 = arith.constant 0 : i32
    %c0_i32_1 = arith.constant 0 : i32
    return %c0_i32, %c0_i32_0 : i32, i32
  }
  func.func @transform_9(%arg0: i32) -> (i32, i32) {
    %c0_i32 = arith.constant 0 : i32
    %c0_i32_0 = arith.constant 0 : i32
    %c0_i32_1 = arith.constant 0 : i32
    return %c0_i32, %c0_i32_0 : i32, i32
  }
  func.func @transform_10(%arg0: i32) -> (i32, i32) {
    %c0_i32 = arith.constant 0 : i32
    %c0_i32_0 = arith.constant 0 : i32
    %c0_i32_1 = arith.constant 0 : i32
    return %c0_i32, %c0_i32_0 : i32, i32
  }
  func.func @transform_11(%arg0: i32) -> (i32, i32) {
    %c0_i32 = arith.constant 0 : i32
    %c0_i32_0 = arith.constant 0 : i32
    %c0_i32_1 = arith.constant 0 : i32
    return %c0_i32, %c0_i32_0 : i32, i32
  }
  func.func @transform_12(%arg0: i32) -> (i32, i32) {
    %c0_i32 = arith.constant 0 : i32
    %c0_i32_0 = arith.constant 0 : i32
    %c0_i32_1 = arith.constant 0 : i32
    return %c0_i32, %c0_i32_0 : i32, i32
  }
  func.func @transform_13(%arg0: i32) -> (i32, i32) {
    %c0_i32 = arith.constant 0 : i32
    %c0_i32_0 = arith.constant 0 : i32
    %c0_i32_1 = arith.constant 0 : i32
    return %c0_i32, %c0_i32_0 : i32, i32
  }
  func.func @transform_14(%arg0: i32) -> (i32, i32) {
    %c0_i32 = arith.constant 0 : i32
    %c0_i32_0 = arith.constant 0 : i32
    %c0_i32_1 = arith.constant 0 : i32
    return %c0_i32, %c0_i32_0 : i32, i32
  }
  func.func @transform_15(%arg0: i32) -> (i32, i32) {
    %c0_i32 = arith.constant 0 : i32
    %c0_i32_0 = arith.constant 0 : i32
    %c0_i32_1 = arith.constant 0 : i32
    return %c0_i32, %c0_i32_0 : i32, i32
  }
  func.func @transform_16(%arg0: i32) -> (i32, i32) {
    %c0_i32 = arith.constant 0 : i32
    %c0_i32_0 = arith.constant 0 : i32
    %c0_i32_1 = arith.constant 0 : i32
    return %c0_i32, %c0_i32_0 : i32, i32
  }
  func.func @transform_17(%arg0: i32) -> (i32, i32) {
    %c0_i32 = arith.constant 0 : i32
    %c0_i32_0 = arith.constant 0 : i32
    %c0_i32_1 = arith.constant 0 : i32
    return %c0_i32, %c0_i32_0 : i32, i32
  }
  func.func @transform_18(%arg0: i32) -> (i32, i32) {
    %c0_i32 = arith.constant 0 : i32
    %c0_i32_0 = arith.constant 0 : i32
    %c0_i32_1 = arith.constant 0 : i32
    return %c0_i32, %c0_i32_0 : i32, i32
  }
  func.func @transform_19(%arg0: i32) -> (i32, i32) {
    %c0_i32 = arith.constant 0 : i32
    %c0_i32_0 = arith.constant 0 : i32
    %c0_i32_1 = arith.constant 0 : i32
    return %c0_i32, %c0_i32_0 : i32, i32
  }
  func.func @transform_20(%arg0: i32) -> (i32, i32) {
    %c0_i32 = arith.constant 0 : i32
    %c0_i32_0 = arith.constant 0 : i32
    %c0_i32_1 = arith.constant 0 : i32
    return %c0_i32, %c0_i32_0 : i32, i32
  }
  func.func @transform_21(%arg0: i32) -> (i32, i32) {
    %c0_i32 = arith.constant 0 : i32
    %c0_i32_0 = arith.constant 0 : i32
    %c0_i32_1 = arith.constant 0 : i32
    return %c0_i32, %c0_i32_0 : i32, i32
  }
  func.func @transform_22(%arg0: i32) -> (i32, i32) {
    %c0_i32 = arith.constant 0 : i32
    %c0_i32_0 = arith.constant 0 : i32
    %c0_i32_1 = arith.constant 0 : i32
    return %c0_i32, %c0_i32_0 : i32, i32
  }
  func.func @transform_23(%arg0: i32) -> (i32, i32) {
    %c0_i32 = arith.constant 0 : i32
    %c0_i32_0 = arith.constant 0 : i32
    %c0_i32_1 = arith.constant 0 : i32
    return %c0_i32, %c0_i32_0 : i32, i32
  }
  func.func @transform_24(%arg0: i32) -> (i32, i32) {
    %c0_i32 = arith.constant 0 : i32
    %c0_i32_0 = arith.constant 0 : i32
    %c0_i32_1 = arith.constant 0 : i32
    return %c0_i32, %c0_i32_0 : i32, i32
  }
}

</mosaic_0001>

<bundles_post_ra>
// kernel: _lambda_.2
= control target key start
LH: loop header
LB: loop body
LE: loop exit
PB: predicated region body
PF: predicated region fallthrough
CT: control target
= control target key end

     0   :  { %vm153_vm2 = vcmask 1040384   ;;  %vm156_vm3 = vcmask 1041408   ;;  %vm159_vm4 = vcmask 1042432   ;;  %vm411_vm5 = vcmask 1043456   ;;  %s948_s1 = inlined_call_operand.vmem [shape: bf16[256,256], index: 1, kind: input, shape index: {}]   ;;  %s949_s0 = inlined_call_operand.vmem [shape: f32[160,256], index: 0, kind: input, shape index: {}]   ;;  %s950_s2 = inlined_call_operand.vmem [shape: f32[4,256], index: 2, kind: output, shape index: {}]  }
   0x1   :  { %v477_v0 = vld [vmem:[%s948_s1 + $0x70] sm:$0xf]  ;;  %v562_v1 = vld [vmem:[%s948_s1 + $0x74] sm:$0xf0]  ;;  %v561_v5 = vld [vmem:[%s948_s1 + $0x74] sm:$0xf] }
   0x2   :  { %v541_v2 = vld [vmem:[%s948_s1 + $0xf0] sm:$0xf]  ;;  %v478_v3 = vor.u32 %v562_v1, %v477_v0  ;;  %v578_v4 = vld [vmem:[%s948_s1 + $0xf4] sm:$0xf0]  ;;  %v479_v6 = vld [vmem:[%s948_s1 + $0x78] sm:$0xf0] }
   0x3   :  { %v542_v7 = vor.u32 %v578_v4, %v541_v2  ;;  %v482_v8 = vor.u32 %v561_v5, %v479_v6  ;;  %v577_v9 = vld [vmem:[%s948_s1 + $0xf4] sm:$0xf]  ;;  %v543_v10 = vld [vmem:[%s948_s1 + $0xf8] sm:$0xf0]  ;;  %v469_v11 = vld [vmem:[%s948_s1 + $0x60] sm:$0xf] }
   0x4   :  { %356 = vmatpush.bf16.msra.mxu0 %v478_v3  ;;  %v546_v12 = vor.u32 %v577_v9, %v543_v10  ;;  %v560_v13 = vld [vmem:[%s948_s1 + $0x64] sm:$0xf0]  ;;  %v533_v14 = vld [vmem:[%s948_s1 + $0xe0] sm:$0xf]  ;;  %v559_v18 = vld [vmem:[%s948_s1 + $0x64] sm:$0xf] }
   0x5   :  { %v576_v15 = vld [vmem:[%s948_s1 + $0xe4] sm:$0xf0]  ;;  %369 = vmatpush.bf16.msra.mxu1 %v542_v7  ;;  %382 = vmatpush.bf16.msra.mxu2 %v482_v8  ;;  %v470_v16 = vor.u32 %v560_v13, %v469_v11  ;;  %v471_v19 = vld [vmem:[%s948_s1 + $0x68] sm:$0xf0]  ;;  %v575_v20 = vld [vmem:[%s948_s1 + $0xe4] sm:$0xf] }
   0x6   :  { %v534_v17 = vor.u32 %v576_v15, %v533_v14  ;;  %395 = vmatpush.bf16.msra.mxu3 %v546_v12  ;;  %v474_v21 = vor.u32 %v559_v18, %v471_v19  ;;  %v535_v22 = vld [vmem:[%s948_s1 + $0xe8] sm:$0xf0]  ;;  %v461_v23 = vld [vmem:[%s948_s1 + $0x50] sm:$0xf]  ;;  %v558_v24 = vld [vmem:[%s948_s1 + $0x54] sm:$0xf0] }
   0x7   :  { %v538_v25 = vor.u32 %v575_v20, %v535_v22  ;;  %v525_v26 = vld [vmem:[%s948_s1 + $0xd0] sm:$0xf]  ;;  %v574_v27 = vld [vmem:[%s948_s1 + $0xd4] sm:$0xf0]  ;;  %v557_v28 = vld [vmem:[%s948_s1 + $0x54] sm:$0xf]  ;;  %v462_v29 = vor.u32 %v558_v24, %v461_v23 }
   0x8   :  { %357 = vmatpush.bf16.msra.mxu0 %v470_v16  ;;  %v463_v30 = vld [vmem:[%s948_s1 + $0x58] sm:$0xf0]  ;;  %v573_v31 = vld [vmem:[%s948_s1 + $0xd4] sm:$0xf]  ;;  %v526_v33 = vor.u32 %v574_v27, %v525_v26  ;;  %v453_v35 = vld [vmem:[%s948_s1 + $0x40] sm:$0xf] }
   0x9   :  { %v527_v32 = vld [vmem:[%s948_s1 + $0xd8] sm:$0xf0]  ;;  %370 = vmatpush.bf16.msra.mxu1 %v534_v17  ;;  %383 = vmatpush.bf16.msra.mxu2 %v474_v21  ;;  %v466_v34 = vor.u32 %v557_v28, %v463_v30  ;;  %v556_v36 = vld [vmem:[%s948_s1 + $0x44] sm:$0xf0]  ;;  %v517_v37 = vld [vmem:[%s948_s1 + $0xc0] sm:$0xf] }
   0xa   :  { %396 = vmatpush.bf16.msra.mxu3 %v538_v25  ;;  %v530_v38 = vor.u32 %v573_v31, %v527_v32  ;;  %v572_v39 = vld [vmem:[%s948_s1 + $0xc4] sm:$0xf0]  ;;  %v555_v40 = vld [vmem:[%s948_s1 + $0x44] sm:$0xf]  ;;  %v455_v41 = vld [vmem:[%s948_s1 + $0x48] sm:$0xf0]  ;;  %v454_v44 = vor.u32 %v556_v36, %v453_v35 }
   0xb   :  { %v571_v42 = vld [vmem:[%s948_s1 + $0xc4] sm:$0xf]  ;;  %v519_v43 = vld [vmem:[%s948_s1 + $0xc8] sm:$0xf0]  ;;  %v518_v45 = vor.u32 %v572_v39, %v517_v37  ;;  %v458_v46 = vor.u32 %v555_v40, %v455_v41  ;;  %v445_v47 = vld [vmem:[%s948_s1 + $0x30] sm:$0xf] }
   0xc   :  { %358 = vmatpush.bf16.msra.mxu0 %v462_v29  ;;  %v554_v48 = vld [vmem:[%s948_s1 + $0x34] sm:$0xf0]  ;;  %v509_v49 = vld [vmem:[%s948_s1 + $0xb0] sm:$0xf]  ;;  %v522_v50 = vor.u32 %v571_v42, %v519_v43  ;;  %v553_v52 = vld [vmem:[%s948_s1 + $0x34] sm:$0xf] }
   0xd   :  { %371 = vmatpush.bf16.msra.mxu1 %v526_v33  ;;  %384 = vmatpush.bf16.msra.mxu2 %v466_v34  ;;  %v570_v51 = vld [vmem:[%s948_s1 + $0xb4] sm:$0xf0]  ;;  %v447_v53 = vld [vmem:[%s948_s1 + $0x38] sm:$0xf0]  ;;  %v569_v54 = vld [vmem:[%s948_s1 + $0xb4] sm:$0xf]  ;;  %v446_v56 = vor.u32 %v554_v48, %v445_v47 }
   0xe   :  { %397 = vmatpush.bf16.msra.mxu3 %v530_v38  ;;  %v511_v55 = vld [vmem:[%s948_s1 + $0xb8] sm:$0xf0]  ;;  %v510_v57 = vor.u32 %v570_v51, %v509_v49  ;;  %v450_v58 = vor.u32 %v553_v52, %v447_v53  ;;  %v437_v59 = vld [vmem:[%s948_s1 + $0x20] sm:$0xf]  ;;  %v552_v60 = vld [vmem:[%s948_s1 + $0x24] sm:$0xf0] }
   0xf   :  { %v501_v61 = vld [vmem:[%s948_s1 + $0xa0] sm:$0xf]  ;;  %v514_v62 = vor.u32 %v569_v54, %v511_v55  ;;  %v568_v63 = vld [vmem:[%s948_s1 + $0xa4] sm:$0xf0]  ;;  %v551_v0 = vld [vmem:[%s948_s1 + $0x24] sm:$0xf]  ;;  %v438_v5 = vor.u32 %v552_v60, %v437_v59 }
  0x10   :  { %359 = vmatpush.bf16.msra.mxu0 %v454_v44  ;;  %v439_v1 = vld [vmem:[%s948_s1 + $0x28] sm:$0xf0]  ;;  %v567_v2 = vld [vmem:[%s948_s1 + $0xa4] sm:$0xf]  ;;  %v429_v4 = vld [vmem:[%s948_s1 + $0x10] sm:$0xf]  ;;  %v502_v10 = vor.u32 %v568_v63, %v501_v61 }
  0x11   :  { %372 = vmatpush.bf16.msra.mxu1 %v518_v45  ;;  %385 = vmatpush.bf16.msra.mxu2 %v458_v46  ;;  %v503_v3 = vld [vmem:[%s948_s1 + $0xa8] sm:$0xf0]  ;;  %v550_v6 = vld [vmem:[%s948_s1 + $0x14] sm:$0xf0]  ;;  %v493_v7 = vld [vmem:[%s948_s1 + $0x90] sm:$0xf]  ;;  %v442_v11 = vor.u32 %v551_v0, %v439_v1 }
  0x12   :  { %398 = vmatpush.bf16.msra.mxu3 %v522_v50  ;;  %v566_v8 = vld [vmem:[%s948_s1 + $0x94] sm:$0xf0]  ;;  %v585_v9 = vmov 16.0   ;;  %v549_v12 = vld [vmem:[%s948_s1 + $0x14] sm:$0xf]  ;;  %v586_v15 = vmov 64.0   ;;  %v506_v16 = vor.u32 %v567_v2, %v503_v3  ;;  %v430_v26 = vor.u32 %v550_v6, %v429_v4 }
  0x13   :  { %581 = vrcp.f32 %v585_v9  ;;  %v431_v13 = vld [vmem:[%s948_s1 + $0x18] sm:$0xf0]  ;;  %v565_v14 = vld [vmem:[%s948_s1 + $0x94] sm:$0xf]  ;;  %v11_v18 = vld [vmem:[%s949_s0] sm:$0xff]  ;;  %v494_v30 = vor.u32 %v566_v8, %v493_v7 }
  0x14   :  { %360 = vmatpush.bf16.msra.mxu0 %v446_v56  ;;  %583 = vrcp.f32 %v586_v15  ;;  %v495_v17 = vld [vmem:[%s948_s1 + $0x98] sm:$0xf0]  ;;  %v13_v19 = vld [vmem:[%s949_s0 + $0x10] sm:$0xff]  ;;  %v779_v20 = vld [vmem:[%s948_s1] sm:$0xf]  ;;  %v434_v31 = vor.u32 %v549_v12, %v431_v13 }
  0x15   :  { %373 = vmatpush.bf16.msra.mxu1 %v510_v57  ;;  %386 = vmatpush.bf16.msra.mxu2 %v450_v58  ;;  %v548_v21 = vld [vmem:[%s948_s1 + $0x4] sm:$0xf0]  ;;  %v787_v22 = vld [vmem:[%s948_s1 + $0x80] sm:$0xf]  ;;  %v27_v25 = vadd.f32 %v13_v19, %v11_v18  ;;  %v547_v27 = vld [vmem:[%s948_s1 + $0x4] sm:$0xf]  ;;  %v498_v37 = vor.u32 %v565_v14, %v495_v17 }
  0x16   :  { %399 = vmatpush.bf16.msra.mxu3 %v514_v62  ;;  %v792_v23 = vld [vmem:[%s948_s1 + $0x84] sm:$0xf0]  ;;  %v15_v24 = vld [vmem:[%s949_s0 + $0x20] sm:$0xff]  ;;  %v423_v28 = vld [vmem:[%s948_s1 + $0x8] sm:$0xf0]  ;;  %v422_v48 = vor.u32 %v548_v21, %v779_v20 }
  0x17   :  { %v17_v29 = vld [vmem:[%s949_s0 + $0x30] sm:$0xff]  ;;  %v28_v32 = vadd.f32 %v27_v25, %v15_v24  ;;  %v62_v33 = vld [vmem:[%s949_s0 + $0x80] sm:$0xff]  ;;  %v487_v44 = vld [vmem:[%s948_s1 + $0x88] sm:$0xf0]  ;;  %v486_v49 = vor.u32 %v792_v23, %v787_v22  ;;  %v426_v50 = vor.u32 %v547_v27, %v423_v28 }
  0x18   :  { %361 = vmatpush.bf16.msra.mxu0 %v438_v5  ;;  %v64_v34 = vld [vmem:[%s949_s0 + $0x90] sm:$0xff]  ;;  %v89_v35 = vld [vmem:[%s949_s0 + $0xa0] sm:$0xff]  ;;  %v12_v59 = vld [vmem:[%s949_s0 + $0x8] sm:$0xff] }
  0x19   :  { %374 = vmatpush.bf16.msra.mxu1 %v502_v10  ;;  %387 = vmatpush.bf16.msra.mxu2 %v442_v11  ;;  %v815_v36 = vpop.eup %581  ;;  %v19_v38 = vld [vmem:[%s949_s0 + $0x40] sm:$0xff]  ;;  %v66_v39 = vadd.f32 %v64_v34, %v62_v33  ;;  %v91_v40 = vld [vmem:[%s949_s0 + $0xb0] sm:$0xff]  ;;  %v29_v46 = vadd.f32 %v28_v32, %v17_v29  ;;  %v14_v60 = vld [vmem:[%s949_s0 + $0x18] sm:$0xff] }
  0x1a   :  { %400 = vmatpush.bf16.msra.mxu3 %v506_v16  ;;  %v93_v41 = vld [vmem:[%s949_s0 + $0xc0] sm:$0xff]  ;;  %v826_v42 = vpop.eup %583  ;;  %v21_v45 = vld [vmem:[%s949_s0 + $0x50] sm:$0xff]  ;;  %v105_v47 = vadd.f32 %v91_v40, %v89_v35  ;;  %v81_v56 = vmul.f32 16.0, %v815_v36  ;;  %v16_v61 = vld [vmem:[%s949_s0 + $0x28] sm:$0xff]  ;;  %v40_v4 = vadd.f32 %v14_v60, %v12_v59  ;;  %vm85_vm1 = vweird.f32 %v815_v36 }
  0x1b   :  { %v563_v43 = vld [vmem:[%s948_s1 + $0x84] sm:$0xf]  ;;  %v67_v51 = vrot.slane %v66_v39, 4  ;;  %v95_v52 = vld [vmem:[%s949_s0 + $0xd0] sm:$0xff]  ;;  %v30_v55 = vadd.f32 %v29_v46, %v19_v38  ;;  %v54_v1 = vmul.f32 64.0, %v826_v42  ;;  %v18_v9 = vld [vmem:[%s949_s0 + $0x38] sm:$0xff]  ;;  %vm58_vm0 = vweird.f32 %v826_v42 }
  0x1c   :  { %362 = vmatpush.bf16.msra.mxu0 %v430_v26  ;;  %v133_v53 = vld [vmem:[%s949_s0 + $0x120] sm:$0xff]  ;;  %v135_v54 = vld [vmem:[%s949_s0 + $0x130] sm:$0xff]  ;;  %v106_v57 = vadd.f32 %v105_v47, %v93_v41  ;;  %v490_v62 = vor.u32 %v563_v43, %v487_v44  ;;  %v63_v10 = vld [vmem:[%s949_s0 + $0x88] sm:$0xff]  ;;  %v41_v12 = vadd.f32 %v40_v4, %v16_v61  ;;  %v82_v17 = vsub.f32 1.0, %v81_v56 }
  0x1d   :  { %375 = vmatpush.bf16.msra.mxu1 %v494_v30  ;;  %388 = vmatpush.bf16.msra.mxu2 %v434_v31  ;;  %v137_v58 = vadd.f32 %v135_v54, %v133_v53  ;;  %v23_v63 = vld [vmem:[%s949_s0 + $0x60] sm:$0xff]  ;;  %v25_v0 = vld [vmem:[%s949_s0 + $0x70] sm:$0xff]  ;;  %v68_v2 = vadd.f32 %v67_v51, %v66_v39  ;;  %v31_v5 = vadd.f32 %v30_v55, %v21_v45  ;;  %v65_v13 = vld [vmem:[%s949_s0 + $0x98] sm:$0xff]  ;;  %v55_v22 = vsub.f32 1.0, %v54_v1 }
  0x1e   :  { %401 = vmatpush.bf16.msra.mxu3 %v498_v37  ;;  %v97_v3 = vld [vmem:[%s949_s0 + $0xe0] sm:$0xff]  ;;  %v99_v6 = vld [vmem:[%s949_s0 + $0xf0] sm:$0xff]  ;;  %v107_v7 = vadd.f32 %v106_v57, %v95_v52  ;;  %v90_v14 = vld [vmem:[%s949_s0 + $0xa8] sm:$0xff]  ;;  %v42_v25 = vadd.f32 %v41_v12, %v18_v9  ;;  %v73_v26 = vadd.f32 %v65_v13, %v63_v10  ;;  %v83_v41 = vmul.f32 %v815_v36, %v82_v17 }
  0x1f   :  { %v138_v8 = vrot.slane %v137_v58, 4  ;;  %v69_v11 = vrot.slane %v68_v2, 2  ;;  %v92_v15 = vld [vmem:[%s949_s0 + $0xb8] sm:$0xff]  ;;  %v32_v16 = vadd.f32 %v31_v5, %v23_v63  ;;  %v20_v20 = vld [vmem:[%s949_s0 + $0x48] sm:$0xff]  ;;  %v101_v23 = vld [vmem:[%s949_s0 + $0x100] sm:$0xff]  ;;  %v56_v47 = vmul.f32 %v826_v42, %v55_v22 }
  0x20   :  { %363 = vmatpush.bf16.msra.mxu0 %v422_v48  ;;  %v108_v18 = vadd.f32 %v107_v7, %v97_v3  ;;  %v94_v21 = vld [vmem:[%s949_s0 + $0xc8] sm:$0xff]  ;;  %v22_v24 = vld [vmem:[%s949_s0 + $0x58] sm:$0xff]  ;;  %v118_v27 = vadd.f32 %v92_v15, %v90_v14  ;;  %v103_v34 = vld [vmem:[%s949_s0 + $0x110] sm:$0xff]  ;;  %v43_v37 = vadd.f32 %v42_v25, %v20_v20  ;;  %v74_v38 = vrot.slane %v73_v26, 4 }
  0x21   :  { %376 = vmatpush.bf16.msra.mxu1 %v486_v49  ;;  %389 = vmatpush.bf16.msra.mxu2 %v426_v50  ;;  %v139_v19 = vadd.f32 %v138_v8, %v137_v58  ;;  %v33_v28 = vadd.f32 %v32_v16, %v25_v0  ;;  %v70_v29 = vadd.f32 %v69_v11, %v68_v2  ;;  %v96_v31 = vld [vmem:[%s949_s0 + $0xd8] sm:$0xff]  ;;  %v134_v32 = vld [vmem:[%s949_s0 + $0x128] sm:$0xff] }
  0x22   :  { %402 = vmatpush.bf16.msra.mxu3 %v490_v62  ;;  %v109_v30 = vadd.f32 %v108_v18, %v99_v6  ;;  %v136_v33 = vld [vmem:[%s949_s0 + $0x138] sm:$0xff]  ;;  %v119_v39 = vadd.f32 %v118_v27, %v94_v21  ;;  %v24_v44 = vld [vmem:[%s949_s0 + $0x68] sm:$0xff]  ;;  %v44_v48 = vadd.f32 %v43_v37, %v22_v24  ;;  %v75_v49 = vadd.f32 %v74_v38, %v73_v26 }
  0x23   :  { %v140_v35 = vrot.slane %v139_v19, 2  ;;  %v34_v40 = vrot.slane %v33_v28, 4  ;;  %v98_v45 = vld [vmem:[%s949_s0 + $0xe8] sm:$0xff]  ;;  %v144_v46 = vadd.f32 %v136_v33, %v134_v32  ;;  %v71_v52 = vrot.slane %v70_v29, 1  ;;  %v26_v54 = vld [vmem:[%s949_s0 + $0x78] sm:$0xff] }
  0x24   :  { %v110_v43 = vadd.f32 %v109_v30, %v101_v23  ;;  %v120_v50 = vadd.f32 %v119_v39, %v96_v31  ;;  %v100_v55 = vld [vmem:[%s949_s0 + $0xf8] sm:$0xff]  ;;  %v45_v58 = vadd.f32 %v44_v48, %v24_v44  ;;  %v76_v59 = vrot.slane %v75_v49, 2  ;;  %v102_v0 = vld [vmem:[%s949_s0 + $0x108] sm:$0xff] }
  0x25   :  { %v35_v51 = vadd.f32 %v34_v40, %v33_v28  ;;  %v145_v56 = vrot.slane %v144_v46, 4  ;;  %v141_v57 = vadd.f32 %v140_v35, %v139_v19  ;;  %v84_v62 = vadd.f32 %v815_v36, %v83_v41  ;;  %v104_v8 = vld [vmem:[%s949_s0 + $0x118] sm:$0xff] }
  0x26   :  { %v111_v53 = vadd.f32 %v110_v43, %v103_v34  ;;  %v121_v60 = vadd.f32 %v120_v50, %v98_v45  ;;  %v57_v2 = vadd.f32 %v826_v42, %v56_v47  ;;  %v46_v3 = vadd.f32 %v45_v58, %v26_v54 }
  0x27   :  { %v36_v61 = vrot.slane %v35_v51, 2  ;;  %v146_v1 = vadd.f32 %v145_v56, %v144_v46  ;;  %v77_v7 = vadd.f32 %v76_v59, %v75_v49  ;;  %v72_v10 = vadd.f32 %v71_v52, %v70_v29 }
  0x28   :  { %v112_v63 = vrot.slane %v111_v53, 4  ;;  %v122_v4 = vadd.f32 %v121_v60, %v100_v55  ;;  %v142_v11 = vrot.slane %v141_v57, 1  ;;  %v47_v12 = vrot.slane %v46_v3, 4 }
  0x29   :  { %v37_v5 = vadd.f32 %v36_v61, %v35_v51  ;;  %v147_v9 = vrot.slane %v146_v1, 2  ;;  %v86_v15 = vsel %vm85_vm1, %v815_v36, %v84_v62  ;;  %v59_v17 = vsel %vm58_vm0, %v826_v42, %v57_v2 }
  0x2a   :  { %v113_v6 = vadd.f32 %v112_v63, %v111_v53  ;;  %v123_v13 = vadd.f32 %v122_v4, %v102_v0  ;;  %v48_v18 = vadd.f32 %v47_v12, %v46_v3  ;;  %v78_v22 = vrot.slane %v77_v7, 1 }
  0x2b   :  { %v38_v14 = vrot.slane %v37_v5, 1  ;;  %v148_v23 = vadd.f32 %v147_v9, %v146_v1  ;;  %v87_v24 = vmul.f32 %v86_v15, %v72_v10  ;;  %v143_v25 = vadd.f32 %v142_v11, %v141_v57 }
  0x2c   :  { %v114_v16 = vrot.slane %v113_v6, 2  ;;  %v124_v19 = vadd.f32 %v123_v13, %v104_v8  ;;  %v49_v26 = vrot.slane %v48_v18, 2  ;;  %v79_v32 = vadd.f32 %v78_v22, %v77_v7 }
  0x2d   :  { %v39_v20 = vadd.f32 %v38_v14, %v37_v5  ;;  %v149_v33 = vrot.slane %v148_v23, 1  ;;  %v151_v42 = vmul.f32 %v143_v25, %v86_v15 }
  0x2e   :  { %v115_v21 = vadd.f32 %v114_v16, %v113_v6  ;;  %v125_v27 = vrot.slane %v124_v19, 4  ;;  %v50_v30 = vadd.f32 %v49_v26, %v48_v18  ;;  %v88_v43 = vmul.f32 %v86_v15, %v79_v32 }
  0x2f   :  { %v60_v28 = vmul.f32 %v59_v17, %v39_v20  ;;  %v150_v44 = vadd.f32 %v149_v33, %v148_v23 }
  0x30   :  { %v116_v29 = vrot.slane %v115_v21, 1  ;;  %v126_v36 = vadd.f32 %v125_v27, %v124_v19  ;;  %v51_v35 = vrot.slane %v50_v30, 1 }
  0x31   :  { %v154_v34 = vsel %vm153_vm2, %v60_v28, %v87_v24  ;;  %v152_v50 = vmul.f32 %v150_v44, %v86_v15 }
  0x32   :  { %v117_v31 = vadd.f32 %v116_v29, %v115_v21  ;;  %v127_v37 = vrot.slane %v126_v36, 2  ;;  %v52_v39 = vadd.f32 %v51_v35, %v50_v30 }
  0x34   :  { %v131_v38 = vmul.f32 %v117_v31, %v59_v17  ;;  %v128_v40 = vadd.f32 %v127_v37, %v126_v36  ;;  %v61_v46 = vmul.f32 %v59_v17, %v52_v39 }
  0x36   :  { %v157_v41 = vsel %vm156_vm3, %v154_v34, %v131_v38  ;;  %v129_v47 = vrot.slane %v128_v40, 1  ;;  %v155_v51 = vsel %vm153_vm2, %v61_v46, %v88_v43 }
  0x37   :  { %v160_v45 = vsel %vm159_vm4, %v157_v41, %v151_v42 }
  0x38   :  { %v162_v48 = vpack.c.bf16 %v160_v45, %v160_v45  ;;  %v130_v49 = vadd.f32 %v129_v47, %v128_v40 }
  0x3a   :  { %364 = vmatmul.bf16.vlgmr.msra.gmra.mxu0 %v162_v48  ;;  %390 = vmatmul.bf16.vlgmr.msra.gmra.mxu2 %v162_v48  ;;  %v132_v52 = vmul.f32 %v130_v49, %v59_v17 }
  0x3c   :  { %v158_v53 = vsel %vm156_vm3, %v155_v51, %v132_v52 }
  0x3d   :  { %v161_v54 = vsel %vm159_vm4, %v158_v53, %v152_v50 }
  0x3e   :  { %v163_v55 = vpack.c.bf16 %v161_v54, %v161_v54 }
  0x40   :  { %377 = vmatmul.bf16.vlgmr.msra.gmra.mxu1 %v163_v55  ;;  %403 = vmatmul.bf16.vlgmr.msra.gmra.mxu3 %v163_v55 }
  0xb7   :  { %v365_v56 = vpop.f32.mrf.mxu0 }
  0xbd   :  { %v391_v57 = vpop.f32.mrf.mxu2  ;;  %v378_v58 = vpop.f32.mrf.mxu1 }
  0xbe   :  { %v379_v0 = vadd.f32 %v378_v58, %v365_v56 }
  0xbf   :  { %v367_v59 = vpop.f32.mrf.mxu0 }
  0xc3   :  { %v404_v60 = vpop.f32.mrf.mxu3 }
  0xc4   :  { %v405_v61 = vadd.f32 %v404_v60, %v391_v57 }
  0xc5   :  { %v393_v62 = vpop.f32.mrf.mxu2  ;;  %v380_v63 = vpop.f32.mrf.mxu1 }
  0xc6   :  { %v410_v1 = vrot.slane %v405_v61, 4 }
  0xc8   :  { %v412_v2 = vsel %vm411_vm5, %v379_v0, %v410_v1 }
  0xc9   :  { %414 = vst [vmem:[%s950_s2] sm:$0xff] %v412_v2 }
  0xcb   :  { %v406_v3 = vpop.f32.mrf.mxu3 }

// kernel: _lambda_.3
= control target key start
LH: loop header
LB: loop body
LE: loop exit
PB: predicated region body
PF: predicated region fallthrough
CT: control target
= control target key end

     0   :  { %s10266_s0 = inlined_call_operand.vmem [shape: f32[16,256], index: 0, kind: input, shape index: {}]   ;;  %s10267_s1 = inlined_call_operand.vmem [shape: f32[16,4], index: 1, kind: input, shape index: {}]   ;;  %s10268_s2 = inlined_call_operand.vmem [shape: f32[1,128], index: 2, kind: input, shape index: {}]   ;;  %s10269_s3 = inlined_call_operand.vmem [shape: f32[32,32], index: 3, kind: input, shape index: {}]   ;;  %s10270_s4 = inlined_call_operand.vmem [shape: f32[32,4], index: 4, kind: input, shape index: {}]   ;;  %s10271_s5 = inlined_call_operand.vmem [shape: f32[16,4], index: 5, kind: input, shape index: {}]   ;;  %s10272_s6 = inlined_call_operand.vmem [shape: f32[4,256], index: 6, kind: input, shape index: {}]   ;;  %s10273_s7 = inlined_call_operand.vmem [shape: bf16[512,256], index: 7, kind: input, shape index: {}]   ;;  %s10274_s8 = inlined_call_operand.vmem [shape: f32[1,256], index: 8, kind: input, shape index: {}]   ;;  %s10275_s9 = inlined_call_operand.vmem [shape: bf16[256,256], index: 9, kind: input, shape index: {}]   ;;  %s10276_s10 = inlined_call_operand.vmem [shape: f32[1,256], index: 10, kind: input, shape index: {}]   ;;  %s10277_s11 = inlined_call_operand.vmem [shape: bf16[256,256], index: 11, kind: input, shape index: {}]   ;;  %s10278_s12 = inlined_call_operand.vmem [shape: f32[1,256], index: 12, kind: input, shape index: {}]   ;;  %s10279_s13 = inlined_call_operand.vmem [shape: bf16[256,256], index: 13, kind: input, shape index: {}]   ;;  %s10280_s14 = inlined_call_operand.vmem [shape: f32[1,256], index: 14, kind: input, shape index: {}]   ;;  %s10281_s15 = inlined_call_operand.vmem [shape: bf16[256,128], index: 15, kind: input, shape index: {}]   ;;  %s10282_s16 = inlined_call_operand.vmem [shape: f32[1,128], index: 16, kind: input, shape index: {}]   ;;  %s10283_s17 = inlined_call_operand.vmem [shape: bf16[256,256], index: 17, kind: input, shape index: {}]   ;;  %s10284_s18 = inlined_call_operand.vmem [shape: f32[1,256], index: 18, kind: input, shape index: {}]   ;;  %s10285_s19 = inlined_call_operand.vmem [shape: bf16[256,256], index: 19, kind: input, shape index: {}]   ;;  %s10286_s20 = inlined_call_operand.vmem [shape: f32[1,256], index: 20, kind: input, shape index: {}]   ;;  %s10287_s21 = inlined_call_operand.vmem [shape: bf16[256,256], index: 21, kind: input, shape index: {}]   ;;  %s10288_s22 = inlined_call_operand.vmem [shape: f32[1,256], index: 22, kind: input, shape index: {}]   ;;  %s10289_s23 = inlined_call_operand.hbm [shape: f32[16,256], index: 23, kind: output, shape index: {0}]   ;;  %s10290_s24 = inlined_call_operand.vmem [shape: f32[16,128], index: 24, kind: output, shape index: {1}]  }
   0x1   :  { %10317 = sst [smem:[#allocation7_spill]] %s10266_s0 }
   0x2   :  { %10318 = sst [smem:[#allocation8_spill]] %s10267_s1 }
   0x3   :  { %10319 = sst [smem:[#allocation9_spill]] %s10268_s2 }
   0x4   :  { %10320 = sst [smem:[#allocation10_spill]] %s10269_s3 }
   0x5   :  { %10321 = sst [smem:[#allocation11_spill]] %s10270_s4 }
   0x6   :  { %10322 = sst [smem:[#allocation12_spill]] %s10271_s5 }
   0x7   :  { %10323 = sst [smem:[#allocation13_spill]] %s10272_s6 }
   0x8   :  { %10324 = sst [smem:[#allocation14_spill]] %s10273_s7 }
   0x9   :  { %10325 = sst [smem:[#allocation15_spill]] %s10274_s8 }
   0xa   :  { %30 = vsyncpa [#allocation4], 0  ;;  %s7421_s5 = smov 0  }
   0xb LB: > { %s7427_s26 = sadd.s32 4294967295, %s7280_s5   ;;  %p5768_p0 = scmp.ge.s32.totalorder %s7280_s5, 1  ;;  %s7280_s5 = sphi %s7421_s5, %s36_s5  }
   0xc   : > { %p646_p1 = scmp.lt.s32.totalorder %s7280_s5, 3 }
   0xe   : > { %p647_p2 = pnand %p5768_p0, %p646_p1 }
   0xf   : > { %p702_p3 = scmp.eq.s32.totalorder (!%p647_p2), %s7427_s26, 0  ;;  %p5769_p4 = scmp.ne.s32.totalorder (!%p647_p2), %s7427_s26, 0 }
  0x10   : > { %650 = sbr.rel (%p647_p2) target bundleno = 2559 (0x9ff), region = 112 }
  0x15   : > { %705 = sbr.rel (%p5769_p4) target bundleno = 781 (0x30d), region = 116 }
  0x1a   : > { %s10326_s6 = sld [smem:[#allocation8_spill]]  ;;  %v7282_v1 = vmov 3   ;;  %v7283_v2 = vmov 2   ;;  %v7284_v4 = vmov 1   ;;  %v7285_v7 = vmov 0  }
  0x1b   : > { %7222 = vset.pattern.permute.xlu2 %v7282_v1  ;;  %7220 = vset.pattern.permute.xlu0 %v7283_v2  ;;  %s10327_s30 = sld [smem:[#allocation9_spill]]  ;;  %v7286_v38 = vmov 683565275   ;;  %v7287_v40 = vmov 2475754826  }
  0x1c   : > { %7221 = vset.pattern.permute.xlu1 %v7284_v4  ;;  %v7288_v42 = vmov 2131351028   ;;  %v7289_v44 = vmov 2102212464   ;;  %v7290_v46 = vmov 920167782  }
  0x1d   : > { %v10303_v55 = vmov 1326507024   ;;  %s10332_s8 = sld [smem:[#allocation14_spill]] }
  0x1e   : > { %s10349_s3 = sld [smem:[#allocation7_spill]] }
  0x1f   : > { %s10371_s28 = sld [smem:[#allocation15_spill]] }
  0x20   : > { %v714_v0 = vld [vmem:[%s10326_s6] sm:$0xff]  ;;  %v715_v5 = vld [vmem:[%s10326_s6 + $0x8] sm:$0xff] }
  0x21   : > { %v731_v3 = vmul.f32 6.2831855, %v714_v0  ;;  %v732_v6 = vmul.f32 6.2831855, %v715_v5  ;;  %v7226_v8 = vld [vmem:[%s10327_s30] ss:$0 sm:$0xff] }
  0x22   : > { %7227 = vrcp.f32 %v7226_v8  ;;  %vm751_vm0 = vweird.f32 %v7226_v8  ;;  %v757_v13 = vand.u32 2147483648, %v7226_v8  ;;  %v755_v15 = vand.u32 2147483647, %v7226_v8 }
  0x23   : > { %2646 = vperm.xlu2 %7222, %v731_v3   ;;  %735 = vperm.xlu1 %7221, %v731_v3  }
  0x24   : > { %2016 = vperm.xlu0 %7220, %v731_v3   ;;  %v758_v16 = vor.u32 1.1754944e-38, %v757_v13  ;;  %vm756_vm3 = vcmp.eq.f32.partialorder %v755_v15, 8.507059e+37 }
  0x28   : > { %v7228_v9 = vpop.eup %7227 }
  0x29   : > { %v747_v10 = vmul.f32 %v7228_v9, %v7226_v8  ;;  %vm752_vm1 = vweird.f32 %v7228_v9 }
  0x2a   : > { %vm753_vm2 = vmor %vm751_vm0, %vm752_vm1 }
  0x2b   : > { %2650 = vperm.xlu2 %7222, %v732_v6   ;;  %740 = vperm.xlu1 %7221, %v732_v6   ;;  %v748_v11 = vsub.f32 1.0, %v747_v10 }
  0x2c   : > { %2020 = vperm.xlu0 %7220, %v732_v6  }
  0x2d   : > { %v749_v12 = vmul.f32 %v7228_v9, %v748_v11 }
  0x2f   : > { %v750_v14 = vadd.f32 %v7228_v9, %v749_v12 }
  0x31   : > { %v754_v17 = vsel %vm753_vm2, %v7228_v9, %v750_v14 }
  0x32   : > { %v7444_v18 = vsel %vm756_vm3, %v758_v16, %v754_v17 }
  0x33   : > { %7224 = vset.pattern.permute.xlu1 %v7285_v7 }
  0x34   : > { %7223 = vset.pattern.permute.xlu0 %v7285_v7  ;;  %1390 = vperm.xlu1 %7224, %v732_v6  }
  0x35   : > { %1386 = vperm.xlu0 %7223, %v731_v3  }
  0x3d   : > { %7225 = vset.pattern.permute.xlu0 %v7282_v1 }
  0x7d   : > { %v2647_v19 = vpop.permute.xlu2 %2646 }
  0x7e   : > { %v7447_v20 = vmul.f32 %v2647_v19, %v7444_v18 }
  0x80   : > { %v2655_v21 = vand.u32 2147483647, %v7447_v20  ;;  %v2658_v22 = vand.u32 2139095040, %v7447_v20 }
  0x82   : > { %v2659_v23 = vshrl.u32 %v2658_v22, 23  ;;  %v2662_v24 = vand.u32 8388607, %v2655_v21 }
  0x84   : > { %v5806_v25 = vadd.s32 4294967169, %v2659_v23  ;;  %v2663_v26 = vor.u32 8388608, %v2662_v24 }
  0x85   : > { %v2651_v27 = vpop.permute.xlu2 %2650 }
  0x86   : > { %v2665_v28 = vadd.s32 1, %v5806_v25  ;;  %v7454_v29 = vmul.f32 %v2651_v27, %v7444_v18  ;;  %v7456_v31 = vshll.u32 %v2663_v26, 8 }
  0x88   : > { %vm2666_vm4 = vcmp.gt.s32.totalorder %v2665_v28, 0  ;;  %v2810_v32 = vand.u32 2147483647, %v7454_v29  ;;  %v2813_v33 = vand.u32 2139095040, %v7454_v29  ;;  %v2704_v48 = vand.u32 65535, %v7456_v31 }
  0x89   : > { %v2667_v30 = vsel %vm2666_vm4, %v2665_v28, 0  ;;  %v2705_v63 = vshrl.u32 %v7456_v31, 16 }
  0x8a   : > { %v2668_v34 = vshrl.u32 %v2667_v30, 5  ;;  %v2669_v35 = vand.u32 31, %v2667_v30  ;;  %v2814_v36 = vshrl.u32 %v2813_v33, 23  ;;  %v2817_v49 = vand.u32 8388607, %v2810_v32 }
  0x8c   : > { %v2670_v37 = vsub.s32 32, %v2669_v35  ;;  %v2672_v39 = vshll.u32 %v7286_v38, %v2669_v35  ;;  %v2675_v41 = vshll.u32 %v7287_v40, %v2669_v35  ;;  %v2678_v43 = vshll.u32 %v7288_v42, %v2669_v35 }
  0x8d   : > { %v2681_v45 = vshll.u32 %v7289_v44, %v2669_v35  ;;  %v2684_v47 = vshll.u32 %v7290_v46, %v2669_v35  ;;  %vm2687_vm5 = vcmp.lt.s32.totalorder %v2668_v34, 1  ;;  %vm2690_vm6 = vcmp.lt.s32.totalorder %v2668_v34, 4 }
  0x8e   : > { %v2673_v50 = vshrl.u32 %v7287_v40, %v2670_v37  ;;  %v2676_v51 = vshrl.u32 %v7288_v42, %v2670_v37  ;;  %v2679_v52 = vshrl.u32 %v7289_v44, %v2670_v37  ;;  %v2671_v53 = vshrl.u32 %v7286_v38, %v2670_v37 }
  0x8f   : > { %v2682_v54 = vshrl.u32 %v7290_v46, %v2670_v37  ;;  %v2685_v56 = vshrl.u32 %v10303_v55, %v2670_v37  ;;  %v5809_v60 = vadd.s32 4294967169, %v2814_v36  ;;  %vm2689_vm7 = vcmp.lt.s32.totalorder %v2668_v34, 3 }
  0x90   : > { %v2674_v57 = vor.u32 %v2673_v50, %v2672_v39  ;;  %v2677_v58 = vor.u32 %v2676_v51, %v2675_v41  ;;  %v2680_v59 = vor.u32 %v2679_v52, %v2678_v43  ;;  %vm2688_vm8 = vcmp.lt.s32.totalorder %v2668_v34, 2 }
  0x91   : > { %v2683_v61 = vor.u32 %v2682_v54, %v2681_v45  ;;  %v2686_v62 = vor.u32 %v2685_v56, %v2684_v47  ;;  %v2818_v5 = vor.u32 8388608, %v2817_v49  ;;  %v2820_v6 = vadd.s32 1, %v5809_v60 }
  0x92   : > { %v2692_v0 = vsel %vm2690_vm6, %v2680_v59, 2102212464  ;;  %v2695_v1 = vsel %vm2687_vm5, %v2674_v57, %v2677_v58  ;;  %v2699_v2 = vsel %vm2687_vm5, %v2677_v58, %v2680_v59  ;;  %v2691_v8 = vsel %vm2687_vm5, %v2671_v53, %v2674_v57 }
  0x93   : > { %v2696_v3 = vsel %vm2690_vm6, %v2683_v61, 920167782  ;;  %v2700_v4 = vsel %vm2690_vm6, %v2686_v62, 1326507024  ;;  %v2693_v9 = vsel %vm2689_vm7, %v2677_v58, %v2692_v0  ;;  %vm2821_vm9 = vcmp.gt.s32.totalorder %v2820_v6, 0 }
  0x94   : > { %v2697_v10 = vsel %vm2689_vm7, %v2680_v59, %v2696_v3  ;;  %v2701_v11 = vsel %vm2689_vm7, %v2683_v61, %v2700_v4  ;;  %v7481_v19 = vsel %vm2688_vm8, %v2691_v8, %v2693_v9  ;;  %v7483_v25 = vshll.u32 %v2818_v5, 8 }
  0x95   : > { %v2698_v12 = vsel %vm2688_vm8, %v2695_v1, %v2697_v10  ;;  %v2702_v13 = vsel %vm2688_vm8, %v2699_v2, %v2701_v11  ;;  %v2822_v30 = vsel %vm2821_vm9, %v2820_v6, 0 }
  0x96   : > { %v2706_v14 = vand.u32 65535, %v2702_v13  ;;  %v2707_v15 = vshrl.u32 %v2702_v13, 16  ;;  %v2728_v16 = vand.u32 65535, %v2698_v12  ;;  %v2729_v17 = vshrl.u32 %v2698_v12, 16 }
  0x97   : > { %v2824_v49 = vand.u32 31, %v2822_v30  ;;  %v7488_v58 = vshrl.u32 %v2822_v30, 5 }
  0x98   : > { %v2708_v22 = vmul.u32 %v2706_v14, %v2704_v48  ;;  %v2709_v23 = vmul.u32 %v2707_v15, %v2704_v48  ;;  %v2710_v24 = vmul.u32 %v2706_v14, %v2705_v63  ;;  %v2730_v26 = vmul.u32 %v2728_v16, %v2704_v48 }
  0x99   : > { %v2731_v27 = vmul.u32 %v2729_v17, %v2704_v48  ;;  %v2732_v28 = vmul.u32 %v2728_v16, %v2705_v63  ;;  %v2711_v33 = vmul.u32 %v2707_v15, %v2705_v63  ;;  %v2733_v37 = vmul.u32 %v2729_v17, %v2705_v63 }
  0x9a   : > { %v2712_v35 = vshll.u32 %v2709_v23, 16  ;;  %v2714_v36 = vshll.u32 %v2710_v24, 16  ;;  %v2713_v39 = vshrl.u32 %v2709_v23, 16  ;;  %v2715_v41 = vshrl.u32 %v2710_v24, 16  ;;  %v736_v23 = vpop.permute.xlu1 %735 }
  0x9b   : > { %v2734_v43 = vshll.u32 %v2731_v27, 16  ;;  %v2736_v45 = vshll.u32 %v2732_v28, 16  ;;  %v2735_v47 = vshrl.u32 %v2731_v27, 16  ;;  %v2737_v51 = vshrl.u32 %v2732_v28, 16 }
  0x9c   : > { %vm2716_vm10 = vc.u32 %v2708_v22, %v2712_v35  ;;  %v2718_v34 = vadd.s32 %v2712_v35, %v2708_v22  ;;  %v2825_v54 = vsub.s32 32, %v2824_v49  ;;  %v2827_v62 = vshll.u32 %v7286_v38, %v2824_v49 }
  0x9d   : > { %v2717_v50 = vsel %vm2716_vm10, 1, %v7285_v7  ;;  %vm2738_vm11 = vc.u32 %v2730_v26, %v2734_v43  ;;  %v2740_v52 = vadd.s32 %v2734_v43, %v2730_v26  ;;  %v2830_v1 = vshll.u32 %v7287_v40, %v2824_v49 }
  0x9e   : > { %v2719_v48 = vadd.s32 %v2717_v50, %v2711_v33  ;;  %vm2720_vm12 = vc.u32 %v2718_v34, %v2714_v36  ;;  %v2739_v53 = vsel %vm2738_vm11, 1, %v7285_v7  ;;  %v2828_v0 = vshrl.u32 %v7287_v40, %v2825_v54 }
  0x9f   : > { %v2721_v56 = vsel %vm2720_vm12, 1, %v7285_v7  ;;  %v2741_v57 = vadd.s32 %v2739_v53, %v2733_v37  ;;  %vm2742_vm13 = vc.u32 %v2740_v52, %v2736_v45  ;;  %v7491_v61 = vadd.s32 %v2740_v52, %v2736_v45 }
  0xa0   : > { %v2723_v59 = vadd.s32 %v2721_v56, %v2719_v48  ;;  %v2743_v60 = vsel %vm2742_vm13, 1, %v7285_v7  ;;  %v2831_v2 = vshrl.u32 %v7288_v42, %v2825_v54  ;;  %v2833_v4 = vshll.u32 %v7288_v42, %v2824_v49 }
  0xa1   : > { %v2745_v63 = vadd.s32 %v2743_v60, %v2741_v57  ;;  %v2834_v5 = vshrl.u32 %v7289_v44, %v2825_v54  ;;  %v2836_v6 = vshll.u32 %v7289_v44, %v2824_v49  ;;  %v7500_v9 = vor.u32 %v2828_v0, %v2827_v62 }
  0xa2   : > { %v2724_v3 = vadd.s32 %v2723_v59, %v2713_v39  ;;  %v7502_v10 = vor.u32 %v2831_v2, %v2830_v1  ;;  %v2837_v11 = vshrl.u32 %v7290_v46, %v2825_v54  ;;  %v2839_v14 = vshll.u32 %v7290_v46, %v2824_v49 }
  0xa3   : > { %v2746_v8 = vadd.s32 %v2745_v63, %v2735_v47  ;;  %v2835_v13 = vor.u32 %v2834_v5, %v2833_v4  ;;  %v2840_v15 = vshrl.u32 %v10303_v55, %v2825_v54  ;;  %v2748_v17 = vmul.u32 %v7456_v31, %v7481_v19 }
  0xa4   : > { %v7505_v12 = vadd.s32 %v2724_v3, %v2715_v41  ;;  %v2838_v22 = vor.u32 %v2837_v11, %v2836_v6  ;;  %vm2842_vm14 = vcmp.lt.s32.totalorder %v7488_v58, 1  ;;  %vm2844_vm0 = vcmp.lt.s32.totalorder %v7488_v58, 3 }
  0xa5   : > { %v2747_v16 = vadd.s32 %v2746_v8, %v2737_v51  ;;  %v2841_v24 = vor.u32 %v2840_v15, %v2839_v14  ;;  %v2859_v26 = vand.u32 65535, %v7483_v25  ;;  %vm2843_vm1 = vcmp.lt.s32.totalorder %v7488_v58, 2 }
  0xa6   : > { %vm2750_vm15 = vc.u32 %v7505_v12, %v7491_v61  ;;  %vm2845_vm2 = vcmp.lt.s32.totalorder %v7488_v58, 4  ;;  %v2850_v31 = vsel %vm2842_vm14, %v7500_v9, %v7502_v10  ;;  %v2854_v28 = vsel %vm2842_vm14, %v7502_v10, %v2835_v13 }
  0xa7   : > { %v2751_v27 = vadd.s32 1, %v2747_v16  ;;  %v2851_v19 = vsel %vm2845_vm2, %v2838_v22, 920167782  ;;  %v2855_v30 = vsel %vm2845_vm2, %v2841_v24, 1326507024  ;;  %v7530_v33 = vmul.f32 %v7444_v18, %v736_v23 }
  0xa8   : > { %v2852_v36 = vsel %vm2844_vm0, %v2835_v13, %v2851_v19  ;;  %v2856_v37 = vsel %vm2844_vm0, %v2838_v22, %v2855_v30  ;;  %v2860_v39 = vshrl.u32 %v7483_v25, 16  ;;  %v2826_v48 = vshrl.u32 %v7286_v38, %v2825_v54  ;;  %v2017_v30 = vpop.permute.xlu0 %2016 }
  0xa9   : > { %v2752_v35 = vsel %vm2750_vm15, %v2751_v27, %v2747_v16  ;;  %v2853_v43 = vsel %vm2843_vm1, %v2850_v31, %v2852_v36  ;;  %v2857_v45 = vsel %vm2843_vm1, %v2854_v28, %v2856_v37  ;;  %v10301_v52 = vand.u32 2147483647, %v7530_v33 }
  0xaa   : > { %v2753_v41 = vadd.s32 %v2752_v35, %v2748_v17  ;;  %v2861_v34 = vand.u32 65535, %v2857_v45  ;;  %v2862_v47 = vshrl.u32 %v2857_v45, 16  ;;  %v2883_v49 = vand.u32 65535, %v2853_v43 }
  0xab   : > { %v2884_v50 = vshrl.u32 %v2853_v43, 16  ;;  %v2847_v0 = vsel %vm2845_vm2, %v2835_v13, 2102212464  ;;  %v766_v23 = vand.u32 2139095040, %v7530_v33 }
  0xac   : > { %v2754_v51 = vadd.s32 536870912, %v2753_v41  ;;  %v2863_v53 = vmul.u32 %v2861_v34, %v2859_v26  ;;  %v2864_v56 = vmul.u32 %v2862_v47, %v2859_v26  ;;  %v2865_v57 = vmul.u32 %v2861_v34, %v2860_v39 }
  0xad   : > { %v2885_v60 = vmul.u32 %v2883_v49, %v2859_v26  ;;  %v2886_v62 = vmul.u32 %v2884_v50, %v2859_v26  ;;  %v2887_v63 = vmul.u32 %v2883_v49, %v2860_v39  ;;  %v2866_v1 = vmul.u32 %v2862_v47, %v2860_v39 }
  0xae   : > { %v7543_v59 = vshrl.u32 %v2754_v51, 30  ;;  %v2867_v2 = vshll.u32 %v2864_v56, 16  ;;  %v2869_v3 = vshll.u32 %v2865_v57, 16  ;;  %v2868_v5 = vshrl.u32 %v2864_v56, 16 }
  0xaf   : > { %v2888_v6 = vmul.u32 %v2884_v50, %v2860_v39  ;;  %v2889_v8 = vshll.u32 %v2886_v62, 16  ;;  %v2870_v54 = vshrl.u32 %v2865_v57, 16  ;;  %v2891_v14 = vshll.u32 %v2887_v63, 16 }
  0xb0   : > { %v2756_v4 = vshll.u32 %v7543_v59, 30  ;;  %vm2871_vm3 = vc.u32 %v2863_v53, %v2867_v2  ;;  %v2873_v11 = vadd.s32 %v2867_v2, %v2863_v53  ;;  %v2890_v19 = vshrl.u32 %v2886_v62, 16 }
  0xb1   : > { %v2872_v16 = vsel %vm2871_vm3, 1, %v7285_v7  ;;  %vm2893_vm4 = vc.u32 %v2885_v60, %v2889_v8  ;;  %v2895_v17 = vadd.s32 %v2889_v8, %v2885_v60  ;;  %v767_v28 = vshrl.u32 %v766_v23, 23 }
  0xb2   : > { %v7548_v15 = vsub.s32 %v2753_v41, %v2756_v4  ;;  %v2874_v22 = vadd.s32 %v2872_v16, %v2866_v1  ;;  %vm2875_vm5 = vc.u32 %v2873_v11, %v2869_v3  ;;  %v2894_v13 = vsel %vm2893_vm4, 1, %v7285_v7 }
  0xb3   : > { %v2876_v26 = vsel %vm2875_vm5, 1, %v7285_v7  ;;  %v2896_v27 = vadd.s32 %v2894_v13, %v2888_v6  ;;  %vm2897_vm7 = vc.u32 %v2895_v17, %v2891_v14  ;;  %v2892_v36 = vshrl.u32 %v2887_v63, 16 }
  0xb4   : > { %vm2758_vm6 = vcmp.lt.s32.totalorder %v7548_v15, 0  ;;  %v2759_v24 = vsub.s32 0, %v7548_v15  ;;  %v2878_v31 = vadd.s32 %v2876_v26, %v2874_v22  ;;  %v2898_v37 = vsel %vm2897_vm7, 1, %v7285_v7 }
  0xb5   : > { %v770_v39 = vand.u32 8388607, %v10301_v52  ;;  %v2900_v45 = vadd.s32 %v2898_v37, %v2896_v27  ;;  %v5770_v34 = vadd.s32 4294967169, %v767_v28  ;;  %v2846_v47 = vsel %vm2842_vm14, %v2826_v48, %v7500_v9 }
  0xb6   : > { %v2760_v35 = vsel %vm2758_vm6, %v2759_v24, %v7548_v15  ;;  %v2879_v43 = vadd.s32 %v2878_v31, %v2868_v5  ;;  %v2848_v49 = vsel %vm2844_vm0, %v7502_v10, %v2847_v0  ;;  %v2899_v50 = vadd.s32 %v2895_v17, %v2891_v14 }
  0xb7   : > { %v2761_v41 = vclz %v2760_v35  ;;  %v7567_v51 = vmul.f32 %v2017_v30, %v7444_v18  ;;  %v2901_v57 = vadd.s32 %v2900_v45, %v2890_v19  ;;  %v773_v60 = vadd.s32 1, %v5770_v34 }
  0xb8   : > { %v2880_v56 = vadd.s32 %v2879_v43, %v2870_v54  ;;  %v771_v62 = vor.u32 8388608, %v770_v39  ;;  %v2849_v63 = vsel %vm2843_vm1, %v2846_v47, %v2848_v49  ;;  %v2749_v8 = vadd.s32 %v7491_v61, %v7505_v12 }
  0xb9   : > { %v5807_v53 = vadd.s32 4294967294, %v2761_v41  ;;  %v2902_v1 = vadd.s32 %v2901_v57, %v2892_v36  ;;  %vm774_vm9 = vcmp.gt.s32.totalorder %v773_v60, 0  ;;  %v10300_v48 = vand.u32 2147483647, %v7567_v51 }
  0xba   : > { %vm2905_vm8 = vc.u32 %v2880_v56, %v2899_v50  ;;  %v2028_v10 = vand.u32 2139095040, %v7567_v51  ;;  %v2903_v0 = vmul.u32 %v7483_v25, %v2849_v63  ;;  %v775_v2 = vsel %vm774_vm9, %v773_v60, 0 }
  0xbb   : > { %vm5808_vm10 = vcmp.lt.s32.totalorder %v5807_v53, 0  ;;  %v2906_v9 = vadd.s32 1, %v2902_v1  ;;  %v7574_v3 = vshll.u32 %v771_v62, 8  ;;  %v777_v58 = vand.u32 31, %v775_v2 }
  0xbc   : > { %v7576_v5 = vsel %vm5808_vm10, 0, %v5807_v53  ;;  %v2029_v54 = vshrl.u32 %v2028_v10, 23  ;;  %v7582_v11 = vand.u32 8388607, %v10300_v48  ;;  %v7584_v14 = vadd.s32 %v2899_v50, %v2880_v56  ;;  %v741_v10 = vpop.permute.xlu1 %740 }
  0xbd   : > { %v2907_v4 = vsel %vm2905_vm8, %v2906_v9, %v2902_v1  ;;  %v778_v25 = vsub.s32 32, %v777_v58  ;;  %v7587_v17 = vand.u32 65535, %v7574_v3  ;;  %v2769_v22 = vsub.s32 4294967266, %v7576_v5 }
  0xbe   : > { %v2908_v6 = vadd.s32 %v2907_v4, %v2903_v0  ;;  %v7590_v13 = vshrl.u32 %v775_v2, 5  ;;  %v780_v23 = vshll.u32 %v7286_v38, %v777_v58  ;;  %v783_v61 = vshll.u32 %v7287_v40, %v777_v58 }
  0xbf   : > { %v781_v24 = vshrl.u32 %v7287_v40, %v778_v25  ;;  %v784_v26 = vshrl.u32 %v7288_v42, %v778_v25  ;;  %v786_v27 = vshll.u32 %v7288_v42, %v777_v58  ;;  %v787_v31 = vshrl.u32 %v7289_v44, %v778_v25 }
  0xc0   : > { %v2909_v16 = vadd.s32 536870912, %v2908_v6  ;;  %v789_v19 = vshll.u32 %v7289_v44, %v777_v58  ;;  %v790_v28 = vshrl.u32 %v7290_v46, %v778_v25  ;;  %v792_v30 = vshll.u32 %v7290_v46, %v777_v58 }
  0xc1   : > { %v782_v36 = vor.u32 %v781_v24, %v780_v23  ;;  %v785_v37 = vor.u32 %v784_v26, %v783_v61  ;;  %v793_v39 = vshrl.u32 %v10303_v55, %v778_v25  ;;  %v2765_v41 = vsub.s32 32, %v7576_v5 }
  0xc2   : > { %v7594_v12 = vshrl.u32 %v2909_v16, 30  ;;  %v2770_v43 = vadd.s32 127, %v2769_v22  ;;  %v788_v45 = vor.u32 %v787_v31, %v786_v27  ;;  %v791_v34 = vor.u32 %v790_v28, %v789_v19 }
  0xc3   : > { %v794_v49 = vor.u32 %v793_v39, %v792_v30  ;;  %vm795_vm11 = vcmp.lt.s32.totalorder %v7590_v13, 1  ;;  %vm798_vm12 = vcmp.lt.s32.totalorder %v7590_v13, 4  ;;  %vm797_vm13 = vcmp.lt.s32.totalorder %v7590_v13, 3 }
  0xc4   : > { %v2911_v35 = vshll.u32 %v7594_v12, 30  ;;  %v803_v50 = vsel %vm795_vm11, %v782_v36, %v785_v37  ;;  %v804_v53 = vsel %vm798_vm12, %v791_v34, 920167782  ;;  %v813_v56 = vshrl.u32 %v7574_v3, 16 }
  0xc5   : > { %vm796_vm15 = vcmp.lt.s32.totalorder %v7590_v13, 2  ;;  %v805_v60 = vsel %vm797_vm13, %v788_v45, %v804_v53  ;;  %v2766_v62 = vshll.u32 %v7548_v15, %v7576_v5  ;;  %v807_v1 = vsel %vm795_vm11, %v785_v37, %v788_v45 }
  0xc6   : > { %v7606_v47 = vsub.s32 %v2908_v6, %v2911_v35  ;;  %v806_v63 = vsel %vm796_vm15, %v803_v50, %v805_v60  ;;  %v5794_v9 = vadd.s32 4294967169, %v2029_v54  ;;  %v2767_v0 = vshrl.u32 %v2749_v8, %v2765_v41 }
  0xc7   : > { %v2771_v2 = vshll.u32 %v2770_v43, 23  ;;  %v808_v6 = vsel %vm798_vm12, %v794_v49, 1326507024  ;;  %v837_v15 = vshrl.u32 %v806_v63, 16  ;;  %v2033_v5 = vor.u32 8388608, %v7582_v11 }
  0xc8   : > { %vm2913_vm14 = vcmp.lt.s32.totalorder %v7606_v47, 0  ;;  %v2914_v57 = vsub.s32 0, %v7606_v47  ;;  %v809_v16 = vsel %vm797_vm13, %v791_v34, %v808_v6  ;;  %v779_v22 = vshrl.u32 %v7286_v38, %v778_v25 }
  0xc9   : > { %v810_v54 = vsel %vm796_vm15, %v807_v1, %v809_v16  ;;  %v836_v23 = vand.u32 65535, %v806_v63  ;;  %v7637_v8 = vmul.f32 %v7444_v18, %v741_v10  ;;  %v839_v27 = vmul.u32 %v837_v15, %v7587_v17 }
  0xca   : > { %v2915_v4 = vsel %vm2913_vm14, %v2914_v57, %v7606_v47  ;;  %v814_v24 = vand.u32 65535, %v810_v54  ;;  %v815_v26 = vshrl.u32 %v810_v54, 16  ;;  %v7640_v31 = vor.u32 %v2767_v0, %v2766_v62 }
  0xcb   : > { %v2916_v58 = vclz %v2915_v4  ;;  %v7642_v19 = vor.u32 4788187, %v2771_v2  ;;  %v800_v28 = vsel %vm798_vm12, %v788_v45, 2102212464  ;;  %v2035_v25 = vadd.s32 1, %v5794_v9 }
  0xcc   : > { %v799_v30 = vsel %vm795_vm11, %v779_v22, %v782_v36  ;;  %v817_v35 = vmul.u32 %v815_v26, %v7587_v17  ;;  %v818_v39 = vmul.u32 %v814_v24, %v813_v56  ;;  %v838_v43 = vmul.u32 %v836_v23, %v7587_v17 }
  0xcd   : > { %v5810_v61 = vadd.s32 4294967294, %v2916_v58  ;;  %v840_v34 = vmul.u32 %v836_v23, %v813_v56  ;;  %v842_v49 = vshll.u32 %v839_v27, 16  ;;  %v801_v53 = vsel %vm797_vm13, %v785_v37, %v800_v28 }
  0xce   : > { %v816_v57 = vmul.u32 %v814_v24, %v7587_v17  ;;  %v820_v45 = vshll.u32 %v817_v35, 16  ;;  %v841_v62 = vmul.u32 %v837_v15, %v813_v56  ;;  %vm2036_vm2 = vcmp.gt.s32.totalorder %v2035_v25, 0 }
  0xcf   : > { %vm5811_vm0 = vcmp.lt.s32.totalorder %v5810_v61, 0  ;;  %vm846_vm1 = vc.u32 %v838_v43, %v842_v49  ;;  %v819_v36 = vmul.u32 %v815_v26, %v813_v56  ;;  %v822_v63 = vshll.u32 %v818_v39, 16 }
  0xd0   : > { %v2919_v41 = vsel %vm5811_vm0, 0, %v5810_v61  ;;  %vm824_vm3 = vc.u32 %v816_v57, %v820_v45  ;;  %v826_v1 = vadd.s32 %v820_v45, %v816_v57  ;;  %v844_v10 = vshll.u32 %v840_v34, 16 }
  0xd1   : > { %v2920_v50 = vsub.s32 32, %v2919_v41  ;;  %v2924_v60 = vsub.s32 4294967266, %v2919_v41  ;;  %v825_v9 = vsel %vm824_vm3, 1, %v7285_v7  ;;  %v847_v0 = vsel %vm846_vm1, 1, %v7285_v7 }
  0xd2   : > { %v848_v2 = vadd.s32 %v842_v49, %v838_v43  ;;  %v827_v37 = vadd.s32 %v825_v9, %v819_v36  ;;  %vm828_vm4 = vc.u32 %v826_v1, %v822_v63  ;;  %v2037_v17 = vsel %vm2036_vm2, %v2035_v25, 0 }
  0xd3   : > { %v2922_v4 = vshrl.u32 %v7584_v14, %v2920_v50  ;;  %v2925_v6 = vadd.s32 127, %v2924_v60  ;;  %v829_v58 = vsel %vm828_vm4, 1, %v7285_v7  ;;  %v849_v16 = vadd.s32 %v847_v0, %v841_v62 }
  0xd4   : > { %vm850_vm5 = vc.u32 %v848_v2, %v844_v10  ;;  %v2773_v56 = vand.u32 2147483647, %v7642_v19  ;;  %v821_v15 = vshrl.u32 %v817_v35, 16  ;;  %v831_v22 = vadd.s32 %v829_v58, %v827_v37 }
  0xd5   : > { %v851_v54 = vsel %vm850_vm5, 1, %v7285_v7  ;;  %v2921_v23 = vshll.u32 %v7606_v47, %v2919_v41  ;;  %v843_v61 = vshrl.u32 %v839_v27, 16  ;;  %v2039_v26 = vand.u32 31, %v2037_v17 }
  0xd6   : > { %v853_v24 = vadd.s32 %v851_v54, %v849_v16  ;;  %v802_v14 = vsel %vm796_vm15, %v799_v30, %v801_v53  ;;  %v823_v28 = vshrl.u32 %v818_v39, 16  ;;  %v832_v25 = vadd.s32 %v831_v22, %v821_v15 }
  0xd7   : > { %v845_v43 = vshrl.u32 %v840_v34, 16  ;;  %v2923_v49 = vor.u32 %v2922_v4, %v2921_v23  ;;  %v2926_v50 = vshll.u32 %v2925_v6, 23  ;;  %v2040_v45 = vsub.s32 32, %v2039_v26 }
  0xd8   : > { %v854_v57 = vadd.s32 %v853_v24, %v843_v61  ;;  %v7662_v19 = vadd.s32 %v832_v25, %v823_v28  ;;  %v7664_v35 = vadd.s32 %v848_v2, %v844_v10  ;;  %v7666_v60 = vshrl.u32 %v2037_v17, 5 }
  0xd9   : > { %v2042_v47 = vshll.u32 %v7286_v38, %v2039_v26  ;;  %v2043_v41 = vshrl.u32 %v7287_v40, %v2040_v45  ;;  %v2045_v13 = vshll.u32 %v7287_v40, %v2039_v26  ;;  %v2046_v30 = vshrl.u32 %v7288_v42, %v2040_v45 }
  0xda   : > { %v855_v27 = vadd.s32 %v854_v57, %v845_v43  ;;  %vm858_vm6 = vc.u32 %v7662_v19, %v7664_v35  ;;  %v2048_v39 = vshll.u32 %v7288_v42, %v2039_v26  ;;  %v2049_v34 = vshrl.u32 %v7289_v44, %v2040_v45 }
  0xdb   : > { %v2051_v53 = vshll.u32 %v7289_v44, %v2039_v26  ;;  %v7677_v36 = vor.u32 %v2043_v41, %v2042_v47  ;;  %v7679_v63 = vor.u32 %v2046_v30, %v2045_v13  ;;  %v2052_v1 = vshrl.u32 %v7290_v46, %v2040_v45 }
  0xdc   : > { %v859_v62 = vadd.s32 1, %v855_v27  ;;  %v856_v9 = vmul.u32 %v7574_v3, %v802_v14  ;;  %v2050_v10 = vor.u32 %v2049_v34, %v2048_v39  ;;  %v2054_v0 = vshll.u32 %v7290_v46, %v2039_v26 }
  0xdd   : > { %v2055_v2 = vshrl.u32 %v10303_v55, %v2040_v45  ;;  %v2775_v4 = vcvt.s32.f32 %v7640_v31  ;;  %v2927_v37 = vor.u32 4788187, %v2926_v50  ;;  %v2053_v6 = vor.u32 %v2052_v1, %v2051_v53 }
  0xde   : > { %v860_v17 = vsel %vm858_vm6, %v859_v62, %v855_v27  ;;  %vm2057_vm7 = vcmp.lt.s32.totalorder %v7666_v60, 1  ;;  %v7689_v15 = vshll.u32 %v2033_v5, 8  ;;  %v2930_v3 = vcvt.s32.f32 %v2923_v49 }
  0xdf   : > { %v861_v58 = vadd.s32 %v860_v17, %v856_v9  ;;  %v2056_v16 = vor.u32 %v2055_v2, %v2054_v0  ;;  %v7691_v22 = vmul.f32 %v2775_v4, %v2773_v56  ;;  %vm2060_vm8 = vcmp.lt.s32.totalorder %v7666_v60, 4 }
  0xe0   : > { %v2065_v31 = vsel %vm2057_vm7, %v7677_v36, %v7679_v63  ;;  %vm2059_vm9 = vcmp.lt.s32.totalorder %v7666_v60, 3  ;;  %v2066_v23 = vsel %vm2060_vm8, %v2053_v6, 920167782  ;;  %v2069_v11 = vsel %vm2057_vm7, %v7679_v63, %v2050_v10 }
  0xe1   : > { %v862_v54 = vadd.s32 536870912, %v861_v58  ;;  %v2928_v5 = vand.u32 2147483647, %v2927_v37  ;;  %vm2058_vm10 = vcmp.lt.s32.totalorder %v7666_v60, 2  ;;  %v2067_v56 = vsel %vm2059_vm9, %v2050_v10, %v2066_v23 }
  0xe2   : > { %v2070_v61 = vsel %vm2060_vm8, %v2056_v16, 1326507024  ;;  %v2068_v26 = vsel %vm2058_vm10, %v2065_v31, %v2067_v56  ;;  %v2074_v28 = vand.u32 65535, %v7689_v15  ;;  %v2075_v43 = vshrl.u32 %v7689_v15, 16 }
  0xe3   : > { %v7709_v24 = vshrl.u32 %v862_v54, 30  ;;  %v2071_v14 = vsel %vm2059_vm9, %v2053_v6, %v2070_v61  ;;  %v2098_v49 = vand.u32 65535, %v2068_v26  ;;  %v2099_v50 = vshrl.u32 %v2068_v26, 16 }
  0xe4   : > { %v2072_v25 = vsel %vm2058_vm10, %v2069_v11, %v2071_v14  ;;  %v2777_v57 = vxor.u32 2147483648, %v7691_v22  ;;  %v7721_v13 = vmul.f32 %v2930_v3, %v2928_v5  ;;  %v10298_v34 = vand.u32 2147483647, %v7637_v8 }
  0xe5   : > { %v864_v47 = vshll.u32 %v7709_v24, 30  ;;  %v2076_v27 = vand.u32 65535, %v2072_v25  ;;  %v2077_v41 = vshrl.u32 %v2072_v25, 16  ;;  %v2101_v30 = vmul.u32 %v2099_v50, %v2074_v28 }
  0xe6   : > { %v2102_v39 = vmul.u32 %v2098_v49, %v2075_v43  ;;  %v2041_v62 = vshrl.u32 %v7286_v38, %v2040_v45  ;;  %v2062_v0 = vsel %vm2060_vm8, %v2050_v10, 2102212464  ;;  %v2100_v2 = vmul.u32 %v2098_v49, %v2074_v28 }
  0xe7   : > { %v7724_v53 = vsub.s32 %v861_v58, %v864_v47  ;;  %v2079_v1 = vmul.u32 %v2077_v41, %v2074_v28  ;;  %v2080_v9 = vmul.u32 %v2076_v27, %v2075_v43  ;;  %v2103_v4 = vmul.u32 %v2099_v50, %v2075_v43 }
  0xe8   : > { %v2104_v37 = vshll.u32 %v2101_v30, 16  ;;  %v2078_v6 = vmul.u32 %v2076_v27, %v2074_v28  ;;  %v2081_v3 = vmul.u32 %v2077_v41, %v2075_v43  ;;  %v2106_v58 = vshll.u32 %v2102_v39, 16 }
  0xe9   : > { %vm866_vm11 = vcmp.lt.s32.totalorder %v7724_v53, 0  ;;  %v867_v17 = vsub.s32 0, %v7724_v53  ;;  %v2082_v16 = vshll.u32 %v2079_v1, 16  ;;  %v2084_v31 = vshll.u32 %v2080_v9, 16 }
  0xea   : > { %vm2108_vm12 = vc.u32 %v2100_v2, %v2104_v37  ;;  %v2110_v5 = vadd.s32 %v2104_v37, %v2100_v2  ;;  %v921_v26 = vand.u32 2139095040, %v7637_v8  ;;  %v925_v14 = vand.u32 8388607, %v10298_v34 }
  0xeb   : > { %v868_v45 = vsel %vm866_vm11, %v867_v17, %v7724_v53  ;;  %vm2086_vm13 = vc.u32 %v2078_v6, %v2082_v16  ;;  %v2088_v54 = vadd.s32 %v2082_v16, %v2078_v6  ;;  %v2109_v23 = vsel %vm2108_vm12, 1, %v7285_v7 }
  0xec   : > { %v869_v10 = vclz %v868_v45  ;;  %v2087_v11 = vsel %vm2086_vm13, 1, %v7285_v7  ;;  %v2111_v56 = vadd.s32 %v2109_v23, %v2103_v4  ;;  %v2061_v25 = vsel %vm2057_vm7, %v2041_v62, %v7677_v36  ;;  %v2021_v23 = vpop.permute.xlu0 %2020 }
  0xed   : > { %v2089_v61 = vadd.s32 %v2087_v11, %v2081_v3  ;;  %vm2090_vm14 = vc.u32 %v2088_v54, %v2084_v31  ;;  %vm2112_vm15 = vc.u32 %v2110_v5, %v2106_v58  ;;  %v2083_v49 = vshrl.u32 %v2079_v1, 16 }
  0xee   : > { %v5771_v28 = vadd.s32 4294967294, %v869_v10  ;;  %v2091_v43 = vsel %vm2090_vm14, 1, %v7285_v7  ;;  %v2113_v47 = vsel %vm2112_vm15, 1, %v7285_v7  ;;  %v922_v27 = vshrl.u32 %v921_v26, 23 }
  0xef   : > { %v2093_v50 = vadd.s32 %v2091_v43, %v2089_v61  ;;  %v2063_v41 = vsel %vm2059_vm9, %v7679_v63, %v2062_v0  ;;  %v2105_v2 = vshrl.u32 %v2101_v30, 16  ;;  %v2115_v4 = vadd.s32 %v2113_v47, %v2111_v56 }
  0xf0   : > { %vm5772_vm0 = vcmp.lt.s32.totalorder %v5771_v28, 0  ;;  %v2085_v37 = vshrl.u32 %v2080_v9, 16  ;;  %v5773_v6 = vadd.s32 4294967169, %v922_v27  ;;  %v926_v16 = vor.u32 8388608, %v925_v14 }
  0xf1   : > { %v2094_v17 = vadd.s32 %v2093_v50, %v2083_v49  ;;  %vm2657_vm1 = vcmp.lt.s32.totalorder %v7447_v20, 0  ;;  %v872_v36 = vsel %vm5772_vm0, 0, %v5771_v28  ;;  %v2107_v62 = vshrl.u32 %v2102_v39, 16 }
  0xf2   : > { %v2116_v1 = vadd.s32 %v2115_v4, %v2105_v2  ;;  %vm7748_vm2 = vcmp.le.f32.partialorder %v2655_v21, 0.7853982  ;;  %v2114_v45 = vadd.s32 %v2110_v5, %v2106_v58  ;;  %v928_v63 = vadd.s32 1, %v5773_v6 }
  0xf3   : > { %v2095_v31 = vadd.s32 %v2094_v17, %v2085_v37  ;;  %v2778_v30 = vsel %vm2657_vm1, %v2777_v57, %v7691_v22  ;;  %v2932_v9 = vxor.u32 2147483648, %v7721_v13  ;;  %v2064_v0 = vsel %vm2058_vm10, %v2061_v25, %v2063_v41 }
  0xf4   : > { %v2117_v39 = vadd.s32 %v2116_v1, %v2107_v62  ;;  %v873_v54 = vsub.s32 32, %v872_v36  ;;  %vm929_vm4 = vcmp.gt.s32.totalorder %v928_v63, 0  ;;  %v7758_v21 = vshll.u32 %v926_v16, 8 }
  0xf5   : > { %vm2120_vm3 = vc.u32 %v2095_v31, %v2114_v45  ;;  %vm2812_vm5 = vcmp.lt.s32.totalorder %v7454_v29, 0  ;;  %v877_v58 = vsub.s32 4294967266, %v872_v36  ;;  %v930_v11 = vsel %vm929_vm4, %v928_v63, 0 }
  0xf6   : > { %v2121_v10 = vadd.s32 1, %v2117_v39  ;;  %v7764_v22 = vsel %vm7748_vm2, %v7447_v20, %v2778_v30  ;;  %v857_v60 = vadd.s32 %v7664_v35, %v7662_v19  ;;  %v2118_v57 = vmul.u32 %v7689_v15, %v2064_v0 }
  0xf7   : > { %v932_v5 = vand.u32 31, %v930_v11  ;;  %v7772_v56 = vsel %vm2812_vm5, %v2932_v9, %v7721_v13  ;;  %v874_v61 = vshll.u32 %v7724_v53, %v872_v36  ;;  %v7776_v14 = vmul.f32 %v2021_v23, %v7444_v18 }
  0xf8   : > { %v2122_v26 = vsel %vm2120_vm3, %v2121_v10, %v2117_v39  ;;  %v875_v28 = vshrl.u32 %v857_v60, %v873_v54  ;;  %v7779_v49 = vand.u32 65535, %v7758_v21  ;;  %v878_v19 = vadd.s32 127, %v877_v58 }
  0xf9   : > { %v2123_v25 = vadd.s32 %v2122_v26, %v2118_v57  ;;  %v933_v43 = vsub.s32 32, %v932_v5  ;;  %v7781_v35 = vshrl.u32 %v930_v11, 5  ;;  %v935_v15 = vshll.u32 %v7286_v38, %v932_v5 }
  0xfa   : > { %v938_v13 = vshll.u32 %v7287_v40, %v932_v5  ;;  %v941_v27 = vshll.u32 %v7288_v42, %v932_v5  ;;  %v944_v2 = vshll.u32 %v7289_v44, %v932_v5  ;;  %v947_v36 = vshll.u32 %v7290_v46, %v932_v5 }
  0xfb   : > { %v2124_v50 = vadd.s32 536870912, %v2123_v25  ;;  %v936_v53 = vshrl.u32 %v7287_v40, %v933_v43  ;;  %v939_v47 = vshrl.u32 %v7288_v42, %v933_v43  ;;  %v942_v41 = vshrl.u32 %v7289_v44, %v933_v43 }
  0xfc   : > { %v945_v4 = vshrl.u32 %v7290_v46, %v933_v43  ;;  %v948_v37 = vshrl.u32 %v10303_v55, %v933_v43  ;;  %v879_v62 = vshll.u32 %v878_v19, 23  ;;  %v968_v30 = vshrl.u32 %v7758_v21, 16 }
  0xfd   : > { %v7792_v17 = vshrl.u32 %v2124_v50, 30  ;;  %v937_v6 = vor.u32 %v936_v53, %v935_v15  ;;  %v940_v16 = vor.u32 %v939_v47, %v938_v13  ;;  %v943_v1 = vor.u32 %v942_v41, %v941_v27 }
  0xfe   : > { %v946_v63 = vor.u32 %v945_v4, %v944_v2  ;;  %v949_v0 = vor.u32 %v948_v37, %v947_v36  ;;  %vm950_vm6 = vcmp.lt.s32.totalorder %v7781_v35, 1  ;;  %v10297_v39 = vand.u32 2147483647, %v7776_v14 }
  0xff   : > { %v2126_v9 = vshll.u32 %v7792_v17, 30  ;;  %v7799_v54 = vor.u32 %v875_v28, %v874_v61  ;;  %v7801_v23 = vadd.s32 %v2114_v45, %v2095_v31  ;;  %vm953_vm7 = vcmp.lt.s32.totalorder %v7781_v35, 4 }
 0x100   : > { %v958_v58 = vsel %vm950_vm6, %v937_v6, %v940_v16  ;;  %vm952_vm8 = vcmp.lt.s32.totalorder %v7781_v35, 3  ;;  %v959_v11 = vsel %vm953_vm7, %v946_v63, 920167782  ;;  %v2183_v60 = vand.u32 2139095040, %v7776_v14 }
 0x101   : > { %v7806_v10 = vsub.s32 %v2123_v25, %v2126_v9  ;;  %v7812_v57 = vor.u32 4788187, %v879_v62  ;;  %vm951_vm9 = vcmp.lt.s32.totalorder %v7781_v35, 2  ;;  %v960_v31 = vsel %vm952_vm8, %v943_v1, %v959_v11 }
 0x102   : > { %v962_v45 = vsel %vm950_vm6, %v940_v16, %v943_v1  ;;  %v961_v61 = vsel %vm951_vm9, %v958_v58, %v960_v31  ;;  %v963_v26 = vsel %vm953_vm7, %v949_v0, 1326507024  ;;  %v883_v28 = vcvt.s32.f32 %v7799_v54 }
 0x103   : > { %vm2128_vm10 = vcmp.lt.s32.totalorder %v7806_v10, 0  ;;  %v2129_v5 = vsub.s32 0, %v7806_v10  ;;  %v964_v25 = vsel %vm952_vm8, %v946_v63, %v963_v26  ;;  %v991_v19 = vand.u32 65535, %v961_v61 }
 0x104   : > { %v992_v15 = vshrl.u32 %v961_v61, 16  ;;  %v934_v50 = vshrl.u32 %v7286_v38, %v933_v43  ;;  %v955_v53 = vsel %vm953_vm7, %v943_v1, 2102212464  ;;  %v965_v47 = vsel %vm951_vm9, %v962_v45, %v964_v25 }
 0x105   : > { %v2130_v13 = vsel %vm2128_vm10, %v2129_v5, %v7806_v10  ;;  %v969_v41 = vand.u32 65535, %v965_v47  ;;  %v970_v2 = vshrl.u32 %v965_v47, 16  ;;  %v2184_v4 = vshrl.u32 %v2183_v60, 23 }
 0x106   : > { %v2131_v27 = vclz %v2130_v13  ;;  %v881_v37 = vand.u32 2147483647, %v7812_v57  ;;  %v994_v36 = vmul.u32 %v992_v15, %v7779_v49  ;;  %v995_v62 = vmul.u32 %v991_v19, %v968_v30 }
 0x107   : > { %v2187_v63 = vand.u32 8388607, %v10297_v39  ;;  %v954_v43 = vsel %vm950_vm6, %v934_v50, %v937_v6  ;;  %v972_v1 = vmul.u32 %v970_v2, %v7779_v49  ;;  %v973_v0 = vmul.u32 %v969_v41, %v968_v30 }
 0x108   : > { %v5795_v9 = vadd.s32 4294967294, %v2131_v27  ;;  %v956_v58 = vsel %vm952_vm8, %v940_v16, %v955_v53  ;;  %v993_v11 = vmul.u32 %v991_v19, %v7779_v49  ;;  %v996_v60 = vmul.u32 %v992_v15, %v968_v30 }
 0x109   : > { %v997_v57 = vshll.u32 %v994_v36, 16  ;;  %v971_v31 = vmul.u32 %v969_v41, %v7779_v49  ;;  %v975_v45 = vshll.u32 %v972_v1, 16  ;;  %v5797_v5 = vadd.s32 4294967169, %v2184_v4 }
 0x10a   : > { %vm5796_vm11 = vcmp.lt.s32.totalorder %v5795_v9, 0  ;;  %vm7847_vm12 = vcmp.le.f32.partialorder %v2810_v32, 0.7853982  ;;  %v974_v26 = vmul.u32 %v970_v2, %v968_v30  ;;  %v999_v25 = vshll.u32 %v995_v62, 16 }
 0x10b   : > { %v2134_v6 = vsel %vm5796_vm11, 0, %v5795_v9  ;;  %vm1001_vm13 = vc.u32 %v993_v11, %v997_v57  ;;  %v977_v19 = vshll.u32 %v973_v0, 16  ;;  %vm979_vm14 = vc.u32 %v971_v31, %v975_v45 }
 0x10c   : > { %v2135_v16 = vsub.s32 32, %v2134_v6  ;;  %v2139_v13 = vsub.s32 4294967266, %v2134_v6  ;;  %v980_v15 = vsel %vm979_vm14, 1, %v7285_v7  ;;  %v981_v50 = vadd.s32 %v975_v45, %v971_v31 }
 0x10d   : > { %v1002_v49 = vsel %vm1001_vm13, 1, %v7285_v7  ;;  %v1003_v53 = vadd.s32 %v997_v57, %v993_v11  ;;  %v957_v32 = vsel %vm951_vm9, %v954_v43, %v956_v58  ;;  %v982_v27 = vadd.s32 %v980_v15, %v974_v26 }
 0x10e   : > { %v2140_v47 = vadd.s32 127, %v2139_v13  ;;  %v1004_v41 = vadd.s32 %v1002_v49, %v996_v60  ;;  %vm983_vm15 = vc.u32 %v981_v50, %v977_v19  ;;  %v2188_v30 = vor.u32 8388608, %v2187_v63  ;;  %v1391_v50 = vpop.permute.xlu1 %1390 }
 0x10f   : > { %vm1005_vm0 = vc.u32 %v1003_v53, %v999_v25  ;;  %v2190_v2 = vadd.s32 1, %v5797_v5  ;;  %v976_v4 = vshrl.u32 %v972_v1, 16  ;;  %v984_v9 = vsel %vm983_vm15, 1, %v7285_v7 }
 0x110   : > { %v998_v39 = vshrl.u32 %v994_v36, 16  ;;  %v1006_v34 = vsel %vm1005_vm0, 1, %v7285_v7  ;;  %v2137_v31 = vshrl.u32 %v7801_v23, %v2135_v16  ;;  %v986_v45 = vadd.s32 %v984_v9, %v982_v27 }
 0x111   : > { %v1008_v11 = vadd.s32 %v1006_v34, %v1004_v41  ;;  %vm2191_vm3 = vcmp.gt.s32.totalorder %v2190_v2, 0  ;;  %v2141_v57 = vshll.u32 %v2140_v47, 23  ;;  %v978_v35 = vshrl.u32 %v973_v0, 16 }
 0x112   : > { %v1000_v43 = vshrl.u32 %v995_v62, 16  ;;  %v2192_v58 = vsel %vm2191_vm3, %v2190_v2, 0  ;;  %v2136_v60 = vshll.u32 %v7806_v10, %v2134_v6  ;;  %v987_v26 = vadd.s32 %v986_v45, %v976_v4 }
 0x113   : > { %v1009_v63 = vadd.s32 %v1008_v11, %v998_v39  ;;  %v2194_v5 = vand.u32 31, %v2192_v58  ;;  %v7863_v36 = vsel %vm7847_vm12, %v7454_v29, %v7772_v56  ;;  %v7867_v23 = vmul.f32 %v883_v28, %v881_v37 }
 0x114   : > { %v1007_v34 = vadd.s32 %v1003_v53, %v999_v25  ;;  %v1011_v1 = vmul.u32 %v7758_v21, %v957_v32  ;;  %v2138_v62 = vor.u32 %v2137_v31, %v2136_v60  ;;  %v988_v0 = vadd.s32 %v987_v26, %v978_v35 }
 0x115   : > { %v1010_v16 = vadd.s32 %v1009_v63, %v1000_v43  ;;  %v2195_v10 = vsub.s32 32, %v2194_v5  ;;  %v2142_v6 = vor.u32 4788187, %v2141_v57  ;;  %v7870_v39 = vshrl.u32 %v2192_v58, 5 }
 0x116   : > { %v2197_v13 = vshll.u32 %v7286_v38, %v2194_v5  ;;  %v7873_v19 = vshll.u32 %v2188_v30, 8  ;;  %vm1013_vm4 = vc.u32 %v988_v0, %v1007_v34  ;;  %v2200_v54 = vshll.u32 %v7287_v40, %v2194_v5 }
 0x117   : > { %v1014_v56 = vadd.s32 1, %v1010_v16  ;;  %v2203_v28 = vshll.u32 %v7288_v42, %v2194_v5  ;;  %v2198_v37 = vshrl.u32 %v7287_v40, %v2195_v10  ;;  %v2201_v21 = vshrl.u32 %v7288_v42, %v2195_v10 }
 0x118   : > { %v2204_v25 = vshrl.u32 %v7289_v44, %v2195_v10  ;;  %v2206_v15 = vshll.u32 %v7289_v44, %v2194_v5  ;;  %v2207_v53 = vshrl.u32 %v7290_v46, %v2195_v10  ;;  %v2209_v47 = vshll.u32 %v7290_v46, %v2194_v5 }
 0x119   : > { %v1015_v49 = vsel %vm1013_vm4, %v1014_v56, %v1010_v16  ;;  %v2210_v32 = vshrl.u32 %v10303_v55, %v2195_v10  ;;  %v885_v27 = vxor.u32 2147483648, %v7867_v23  ;;  %v2199_v30 = vor.u32 %v2198_v37, %v2197_v13 }
 0x11a   : > { %v1016_v41 = vadd.s32 %v1015_v49, %v1011_v1  ;;  %v2202_v2 = vor.u32 %v2201_v21, %v2200_v54  ;;  %v2205_v4 = vor.u32 %v2204_v25, %v2203_v28  ;;  %v2208_v9 = vor.u32 %v2207_v53, %v2206_v15 }
 0x11b   : > { %v2211_v31 = vor.u32 %v2210_v32, %v2209_v47  ;;  %v7886_v45 = vmul.f32 %v1391_v50, %v7444_v18  ;;  %v2143_v11 = vand.u32 2147483647, %v2142_v6  ;;  %v2145_v57 = vcvt.s32.f32 %v2138_v62 }
 0x11c   : > { %v1017_v35 = vadd.s32 536870912, %v1016_v41  ;;  %vm2212_vm6 = vcmp.lt.s32.totalorder %v7870_v39, 1  ;;  %vm2215_vm7 = vcmp.lt.s32.totalorder %v7870_v39, 4  ;;  %v2229_v58 = vand.u32 65535, %v7873_v19 }
 0x11d   : > { %v2220_v43 = vsel %vm2212_vm6, %v2199_v30, %v2202_v2  ;;  %v2230_v60 = vshrl.u32 %v7873_v19, 16  ;;  %vm2214_vm8 = vcmp.lt.s32.totalorder %v7870_v39, 3  ;;  %v2221_v63 = vsel %vm2215_vm7, %v2208_v9, 920167782 }
 0x11e   : > { %v7894_v26 = vshrl.u32 %v1017_v35, 30  ;;  %v2224_v5 = vsel %vm2212_vm6, %v2202_v2, %v2205_v4  ;;  %vm2213_vm9 = vcmp.lt.s32.totalorder %v7870_v39, 2  ;;  %v2222_v1 = vsel %vm2214_vm8, %v2205_v4, %v2221_v63 }
 0x11f   : > { %v2225_v62 = vsel %vm2215_vm7, %v2211_v31, 1326507024  ;;  %v10299_v16 = vand.u32 2147483647, %v7886_v45  ;;  %v2196_v13 = vshrl.u32 %v7286_v38, %v2195_v10  ;;  %v2223_v56 = vsel %vm2213_vm9, %v2220_v43, %v2222_v1 }
 0x120   : > { %v1019_v6 = vshll.u32 %v7894_v26, 30  ;;  %v2226_v54 = vsel %vm2214_vm8, %v2208_v9, %v2225_v62  ;;  %v2217_v28 = vsel %vm2215_vm7, %v2205_v4, 2102212464  ;;  %v2253_v21 = vand.u32 65535, %v2223_v56 }
 0x121   : > { %v2227_v37 = vsel %vm2213_vm9, %v2224_v5, %v2226_v54  ;;  %v2254_v25 = vshrl.u32 %v2223_v56, 16  ;;  %v7917_v15 = vmul.f32 %v2145_v57, %v2143_v11  ;;  %v1012_v53 = vadd.s32 %v1007_v34, %v988_v0 }
 0x122   : > { %v7919_v50 = vsub.s32 %v1016_v41, %v1019_v6  ;;  %v2231_v49 = vand.u32 65535, %v2227_v37  ;;  %v2232_v10 = vshrl.u32 %v2227_v37, 16  ;;  %v2216_v47 = vsel %vm2212_vm6, %v2196_v13, %v2199_v30 }
 0x123   : > { %v2256_v32 = vmul.u32 %v2254_v25, %v2229_v58  ;;  %v2257_v9 = vmul.u32 %v2253_v21, %v2230_v60  ;;  %v2218_v31 = vsel %vm2214_vm8, %v2202_v2, %v2217_v28  ;;  %v2255_v57 = vmul.u32 %v2253_v21, %v2229_v58 }
 0x124   : > { %vm1021_vm10 = vcmp.lt.s32.totalorder %v7919_v50, 0  ;;  %v1022_v4 = vsub.s32 0, %v7919_v50  ;;  %v2234_v35 = vmul.u32 %v2232_v10, %v2229_v58  ;;  %v2235_v11 = vmul.u32 %v2231_v49, %v2230_v60 }
 0x125   : > { %v2258_v41 = vmul.u32 %v2254_v25, %v2230_v60  ;;  %v2259_v43 = vshll.u32 %v2256_v32, 16  ;;  %v2233_v34 = vmul.u32 %v2231_v49, %v2229_v58  ;;  %v2236_v0 = vmul.u32 %v2232_v10, %v2230_v60 }
 0x126   : > { %v1023_v63 = vsel %vm1021_vm10, %v1022_v4, %v7919_v50  ;;  %v2237_v5 = vshll.u32 %v2234_v35, 16  ;;  %v2239_v1 = vshll.u32 %v2235_v11, 16  ;;  %v2260_v62 = vshrl.u32 %v2256_v32, 16 }
 0x127   : > { %v1024_v30 = vclz %v1023_v63  ;;  %v2261_v6 = vshll.u32 %v2257_v9, 16  ;;  %vm2263_vm13 = vc.u32 %v2255_v57, %v2259_v43  ;;  %v2265_v56 = vadd.s32 %v2259_v43, %v2255_v57 }
 0x128   : > { %vm2241_vm11 = vc.u32 %v2233_v34, %v2237_v5  ;;  %v2243_v13 = vadd.s32 %v2237_v5, %v2233_v34  ;;  %v2264_v28 = vsel %vm2263_vm13, 1, %v7285_v7  ;;  %v1553_v37 = vand.u32 2139095040, %v7886_v45 }
 0x129   : > { %v5774_v54 = vadd.s32 4294967294, %v1024_v30  ;;  %v2242_v2 = vsel %vm2241_vm11, 1, %v7285_v7  ;;  %v2266_v58 = vadd.s32 %v2264_v28, %v2258_v41  ;;  %vm2267_vm15 = vc.u32 %v2265_v56, %v2261_v6 }
 0x12a   : > { %v2244_v21 = vadd.s32 %v2242_v2, %v2236_v0  ;;  %vm2245_vm14 = vc.u32 %v2243_v13, %v2239_v1  ;;  %v2238_v60 = vshrl.u32 %v2234_v35, 16  ;;  %v2268_v49 = vsel %vm2267_vm15, 1, %v7285_v7  ;;  %v1387_v1 = vpop.permute.xlu0 %1386 }
 0x12b   : > { %vm5775_vm0 = vcmp.lt.s32.totalorder %v5774_v54, 0  ;;  %v2246_v25 = vsel %vm2245_vm14, 1, %v7285_v7  ;;  %vm10310_vm3 = vcmp.lt.s32.totalorder %v7530_v33, 0  ;;  %v2270_v4 = vadd.s32 %v2268_v49, %v2266_v58 }
 0x12c   : > { %v1027_v10 = vsel %vm5775_vm0, 0, %v5774_v54  ;;  %v2248_v32 = vadd.s32 %v2246_v25, %v2244_v21  ;;  %v1554_v57 = vshrl.u32 %v1553_v37, 23  ;;  %v2240_v34 = vshrl.u32 %v2235_v11, 16 }
 0x12d   : > { %v1028_v43 = vsub.s32 32, %v1027_v10  ;;  %v1032_v63 = vsub.s32 4294967266, %v1027_v10  ;;  %v1557_v0 = vand.u32 8388607, %v10299_v16  ;;  %v2262_v5 = vshrl.u32 %v2257_v9, 16 }
 0x12e   : > { %v2249_v41 = vadd.s32 %v2248_v32, %v2238_v60  ;;  %v2271_v30 = vadd.s32 %v2270_v4, %v2260_v62  ;;  %v5785_v35 = vadd.s32 4294967169, %v1554_v57  ;;  %v2219_v28 = vsel %vm2213_vm9, %v2216_v47, %v2218_v31 }
 0x12f   : > { %v1030_v13 = vshrl.u32 %v1012_v53, %v1028_v43  ;;  %v1033_v2 = vadd.s32 127, %v1032_v63  ;;  %v7938_v54 = vadd.s32 %v2265_v56, %v2261_v6  ;;  %v1029_v37 = vshll.u32 %v7919_v50, %v1027_v10 }
 0x130   : > { %v7941_v21 = vadd.s32 %v2249_v41, %v2240_v34  ;;  %v2272_v11 = vadd.s32 %v2271_v30, %v2262_v5  ;;  %v1560_v58 = vadd.s32 1, %v5785_v35  ;;  %v2147_v25 = vxor.u32 2147483648, %v7917_v15 }
 0x131   : > { %v1034_v60 = vshll.u32 %v1033_v2, 23  ;;  %v1558_v9 = vor.u32 8388608, %v1557_v0  ;;  %v7945_v62 = vmul.f32 %v1387_v1, %v7444_v18  ;;  %v1031_v53 = vor.u32 %v1030_v13, %v1029_v37 }
 0x132   : > { %vm2275_vm4 = vc.u32 %v7941_v21, %v7938_v54  ;;  %v2276_v39 = vadd.s32 1, %v2272_v11  ;;  %vm1561_vm6 = vcmp.gt.s32.totalorder %v1560_v58, 0  ;;  %vm10308_vm7 = vcmp.lt.s32.totalorder %v7567_v51, 0 }
 0x133   : > { %v1035_v50 = vor.u32 4788187, %v1034_v60  ;;  %v2273_v47 = vmul.u32 %v7873_v19, %v2219_v28  ;;  %v1562_v31 = vsel %vm1561_vm6, %v1560_v58, 0  ;;  %v7953_v6 = vmul.f32 %v7764_v22, %v7764_v22 }
 0x134   : > { %v7957_v18 = vmul.f32 %v7863_v36, %v7863_v36  ;;  %v2277_v56 = vsel %vm2275_vm4, %v2276_v39, %v2272_v11  ;;  %v1564_v49 = vand.u32 31, %v1562_v31  ;;  %v7964_v10 = vsel %vm10310_vm3, %v885_v27, %v7867_v23 }
 0x135   : > { %v7969_v19 = vsel %vm10308_vm7, %v2147_v25, %v7917_v15  ;;  %v2278_v32 = vadd.s32 %v2277_v56, %v2273_v47  ;;  %v10302_v4 = vand.u32 2147483647, %v7945_v62  ;;  %v1038_v57 = vcvt.s32.f32 %v1031_v53 }
 0x136   : > { %v1563_v43 = vshrl.u32 %v1562_v31, 5  ;;  %v1565_v63 = vsub.s32 32, %v1564_v49  ;;  %v7972_v34 = vshll.u32 %v1558_v9, 8  ;;  %v1036_v0 = vand.u32 2147483647, %v1035_v50 }
 0x137   : > { %v2279_v41 = vadd.s32 536870912, %v2278_v32  ;;  %v1567_v5 = vshll.u32 %v7286_v38, %v1564_v49  ;;  %v1570_v23 = vshll.u32 %v7287_v40, %v1564_v49  ;;  %v1573_v15 = vshll.u32 %v7288_v42, %v1564_v49 }
 0x138   : > { %v1568_v27 = vshrl.u32 %v7287_v40, %v1565_v63  ;;  %v1571_v30 = vshrl.u32 %v7288_v42, %v1565_v63  ;;  %v1574_v35 = vshrl.u32 %v7289_v44, %v1565_v63  ;;  %v1576_v13 = vshll.u32 %v7289_v44, %v1564_v49 }
 0x139   : > { %v7980_v1 = vshrl.u32 %v2279_v41, 30  ;;  %v1577_v2 = vshrl.u32 %v7290_v46, %v1565_v63  ;;  %v1580_v28 = vshrl.u32 %v10303_v55, %v1565_v63  ;;  %v1579_v25 = vshll.u32 %v7290_v46, %v1564_v49 }
 0x13a   : > { %v1569_v37 = vor.u32 %v1568_v27, %v1567_v5  ;;  %v1572_v11 = vor.u32 %v1571_v30, %v1570_v23  ;;  %v1575_v58 = vor.u32 %v1574_v35, %v1573_v15  ;;  %vm10309_vm8 = vcmp.lt.s32.totalorder %v7637_v8, 0 }
 0x13b   : > { %v2281_v60 = vshll.u32 %v7980_v1, 30  ;;  %v1578_v9 = vor.u32 %v1577_v2, %v1576_v13  ;;  %v1599_v53 = vand.u32 65535, %v7972_v34  ;;  %v1600_v39 = vshrl.u32 %v7972_v34, 16 }
 0x13c   : > { %v1039_v50 = vmul.f32 %v1038_v57, %v1036_v0  ;;  %v1566_v47 = vshrl.u32 %v7286_v38, %v1565_v63  ;;  %v1581_v31 = vor.u32 %v1580_v28, %v1579_v25  ;;  %v1398_v56 = vand.u32 2139095040, %v7945_v62 }
 0x13d   : > { %v7992_v41 = vsub.s32 %v2278_v32, %v2281_v60  ;;  %vm1582_vm9 = vcmp.lt.s32.totalorder %v1563_v43, 1  ;;  %vm1583_vm10 = vcmp.lt.s32.totalorder %v1563_v43, 2  ;;  %vm1585_vm11 = vcmp.lt.s32.totalorder %v1563_v43, 4 }
 0x13e   : > { %vm1584_vm13 = vcmp.lt.s32.totalorder %v1563_v43, 3  ;;  %v1587_v49 = vsel %vm1585_vm11, %v1575_v58, 2102212464  ;;  %v1590_v5 = vsel %vm1582_vm9, %v1569_v37, %v1572_v11  ;;  %v1591_v23 = vsel %vm1585_vm11, %v1578_v9, 920167782 }
 0x13f   : > { %vm2283_vm14 = vcmp.lt.s32.totalorder %v7992_v41, 0  ;;  %v2284_v27 = vsub.s32 0, %v7992_v41  ;;  %v1592_v57 = vsel %vm1584_vm13, %v1575_v58, %v1591_v23  ;;  %v1594_v63 = vsel %vm1582_vm9, %v1572_v11, %v1575_v58 }
 0x140   : > { %v1040_v0 = vxor.u32 2147483648, %v1039_v50  ;;  %v1593_v32 = vsel %vm1583_vm10, %v1590_v5, %v1592_v57  ;;  %v1595_v30 = vsel %vm1585_vm11, %v1581_v31, 1326507024  ;;  %v1399_v15 = vshrl.u32 %v1398_v56, 23 }
 0x141   : > { %v2285_v35 = vsel %vm2283_vm14, %v2284_v27, %v7992_v41  ;;  %v1596_v13 = vsel %vm1584_vm13, %v1578_v9, %v1595_v30  ;;  %v1623_v2 = vand.u32 65535, %v1593_v32  ;;  %v1624_v28 = vshrl.u32 %v1593_v32, 16 }
 0x142   : > { %v2286_v25 = vclz %v2285_v35  ;;  %v1586_v60 = vsel %vm1582_vm9, %v1566_v47, %v1569_v37  ;;  %v1588_v16 = vsel %vm1584_vm13, %v1572_v11, %v1587_v49  ;;  %v1597_v23 = vsel %vm1583_vm10, %v1594_v63, %v1596_v13 }
 0x143   : > { %v1601_v48 = vand.u32 65535, %v1597_v23  ;;  %v1602_v58 = vshrl.u32 %v1597_v23, 16  ;;  %v1626_v52 = vmul.u32 %v1624_v28, %v1599_v53  ;;  %v1402_v31 = vand.u32 8388607, %v10302_v4 }
 0x144   : > { %v8009_v56 = vsel %vm10309_vm8, %v1040_v0, %v1039_v50  ;;  %v2274_v9 = vadd.s32 %v7938_v54, %v7941_v21  ;;  %v5798_v5 = vadd.s32 4294967294, %v2286_v25  ;;  %v1627_v27 = vmul.u32 %v1623_v2, %v1600_v39 }
 0x145   : > { %v8014_v37 = vsel %vm1583_vm10, %v1586_v60, %v1588_v16  ;;  %v1604_v11 = vmul.u32 %v1602_v58, %v1599_v53  ;;  %v1605_v47 = vmul.u32 %v1601_v48, %v1600_v39  ;;  %v5782_v49 = vadd.s32 4294967169, %v1399_v15 }
 0x146   : > { %vm5799_vm15 = vcmp.lt.s32.totalorder %v5798_v5, 0  ;;  %v1625_v57 = vmul.u32 %v1623_v2, %v1599_v53  ;;  %v1628_v63 = vmul.u32 %v1624_v28, %v1600_v39  ;;  %v1629_v32 = vshll.u32 %v1626_v52, 16 }
 0x147   : > { %v2289_v30 = vsel %vm5799_vm15, 0, %v5798_v5  ;;  %v1603_v35 = vmul.u32 %v1601_v48, %v1599_v53  ;;  %v1607_v13 = vshll.u32 %v1604_v11, 16  ;;  %v1403_v50 = vor.u32 8388608, %v1402_v31 }
 0x148   : > { %v2290_v0 = vsub.s32 32, %v2289_v30  ;;  %v2294_v23 = vsub.s32 4294967266, %v2289_v30  ;;  %v1606_v4 = vmul.u32 %v1602_v58, %v1600_v39  ;;  %v1631_v54 = vshll.u32 %v1627_v27, 16 }
 0x149   : > { %v1609_v21 = vshll.u32 %v1605_v47, 16  ;;  %vm1611_vm0 = vc.u32 %v1603_v35, %v1607_v13  ;;  %v1613_v43 = vadd.s32 %v1607_v13, %v1603_v35  ;;  %vm1633_vm4 = vc.u32 %v1625_v57, %v1629_v32 }
 0x14a   : > { %v2292_v16 = vshrl.u32 %v2274_v9, %v2290_v0  ;;  %v2295_v25 = vadd.s32 127, %v2294_v23  ;;  %v1612_v15 = vsel %vm1611_vm0, 1, %v7285_v7  ;;  %v1634_v2 = vsel %vm1633_vm4, 1, %v7285_v7  ;;  %v6068_v9 = vld [vmem:[%s10332_s8 + $0x1f0] sm:$0xf] }
 0x14b   : > { %v1614_v28 = vadd.s32 %v1612_v15, %v1606_v4  ;;  %vm1615_vm6 = vc.u32 %v1613_v43, %v1609_v21  ;;  %v1635_v60 = vadd.s32 %v1629_v32, %v1625_v57  ;;  %v1636_v48 = vadd.s32 %v1634_v2, %v1628_v63  ;;  %v6060_v21 = vld [vmem:[%s10332_s8 + $0x1e0] sm:$0xf]  ;;  %v6981_v43 = vld [vmem:[%s10332_s8 + $0x1e4] sm:$0xf0] }
 0x14c   : > { %v2291_v53 = vshll.u32 %v7992_v41, %v2289_v30  ;;  %v2296_v31 = vshll.u32 %v2295_v25, 23  ;;  %v1616_v39 = vsel %vm1615_vm6, 1, %v7285_v7  ;;  %v1405_v58 = vadd.s32 1, %v5782_v49  ;;  %v6983_v41 = vld [vmem:[%s10332_s8 + $0x1f4] sm:$0xf0] }
 0x14d   : > { %v1608_v5 = vshrl.u32 %v1604_v11, 16  ;;  %v1618_v55 = vadd.s32 %v1616_v39, %v1614_v28  ;;  %v1630_v35 = vshrl.u32 %v1626_v52, 16  ;;  %vm1637_vm9 = vc.u32 %v1635_v60, %v1631_v54 }
 0x14e   : > { %v2293_v13 = vor.u32 %v2292_v16, %v2291_v53  ;;  %v2297_v0 = vor.u32 4788187, %v2296_v31  ;;  %v1638_v4 = vsel %vm1637_vm9, 1, %v7285_v7  ;;  %vm1406_vm10 = vcmp.gt.s32.totalorder %v1405_v58, 0 }
 0x14f   : > { %v1610_v57 = vshrl.u32 %v1605_v47, 16  ;;  %v1619_v63 = vadd.s32 %v1618_v55, %v1608_v5  ;;  %v1640_v49 = vadd.s32 %v1638_v4, %v1636_v48  ;;  %v1407_v11 = vsel %vm1406_vm10, %v1405_v58, 0 }
 0x150   : > { %v1632_v32 = vshrl.u32 %v1627_v27, 16  ;;  %v1639_v52 = vadd.s32 %v1635_v60, %v1631_v54  ;;  %v1643_v30 = vmul.u32 %v7972_v34, %v8014_v37  ;;  %v1409_v23 = vand.u32 31, %v1407_v11 }
 0x151   : > { %v1620_v16 = vadd.s32 %v1619_v63, %v1610_v57  ;;  %v1641_v25 = vadd.s32 %v1640_v49, %v1630_v35  ;;  %v8035_v47 = vshll.u32 %v1403_v50, 8  ;;  %v6069_v55 = vor.u32 %v6983_v41, %v6068_v9 }
 0x152   : > { %v2298_v15 = vand.u32 2147483647, %v2297_v0  ;;  %v2300_v27 = vcvt.s32.f32 %v2293_v13  ;;  %v8037_v54 = vshrl.u32 %v1407_v11, 5  ;;  %v1410_v2 = vsub.s32 32, %v1409_v23 }
 0x153   : > { %v1642_v34 = vadd.s32 %v1641_v25, %v1632_v32  ;;  %v1412_v37 = vshll.u32 %v7286_v38, %v1409_v23  ;;  %v1415_v28 = vshll.u32 %v7287_v40, %v1409_v23  ;;  %3711 = vmatpush.bf16.msra.mxu3 %v6069_v55  ;;  %v6061_v60 = vor.u32 %v6981_v43, %v6060_v21  ;;  %v6052_v32 = vld [vmem:[%s10332_s8 + $0x1d0] sm:$0xf]  ;;  %v6979_v21 = vld [vmem:[%s10332_s8 + $0x1d4] sm:$0xf0]  ;;  %v6977_v25 = vld [vmem:[%s10332_s8 + $0x1c4] sm:$0xf0] }
 0x154   : > { %vm1645_vm11 = vc.u32 %v1620_v16, %v1639_v52  ;;  %v1413_v48 = vshrl.u32 %v7287_v40, %v1410_v2  ;;  %v1416_v53 = vshrl.u32 %v7288_v42, %v1410_v2  ;;  %v1418_v50 = vshll.u32 %v7288_v42, %v1409_v23 }
 0x155   : > { %v1646_v31 = vadd.s32 1, %v1642_v34  ;;  %v1419_v39 = vshrl.u32 %v7289_v44, %v1410_v2  ;;  %v1421_v58 = vshll.u32 %v7289_v44, %v1409_v23  ;;  %v1422_v5 = vshrl.u32 %v7290_v46, %v1410_v2 }
 0x156   : > { %v1414_v35 = vor.u32 %v1413_v48, %v1412_v37  ;;  %v1417_v9 = vor.u32 %v1416_v53, %v1415_v28  ;;  %v1444_v13 = vand.u32 65535, %v8035_v47  ;;  %v8049_v0 = vshrl.u32 %v8035_v47, 16 }
 0x157   : > { %v8051_v4 = vmul.f32 %v2300_v27, %v2298_v15  ;;  %v1647_v40 = vsel %vm1645_vm11, %v1646_v31, %v1642_v34  ;;  %v1420_v41 = vor.u32 %v1419_v39, %v1418_v50  ;;  %v1423_v57 = vor.u32 %v1422_v5, %v1421_v58  ;;  %3712 = vmatpush.bf16.msra.mxu3 %v6061_v60  ;;  %v6036_v39 = vld [vmem:[%s10332_s8 + $0x1b0] sm:$0xf]  ;;  %v6975_v58 = vld [vmem:[%s10332_s8 + $0x1b4] sm:$0xf0] }
 0x158   : > { %v1648_v42 = vadd.s32 %v1647_v40, %v1643_v30  ;;  %v1411_v63 = vshrl.u32 %v7286_v38, %v1410_v2  ;;  %v1424_v44 = vshll.u32 %v7290_v46, %v1409_v23  ;;  %v10333_v49 = vmov 1326507024   ;;  %v6044_v38 = vld [vmem:[%s10332_s8 + $0x1c0] sm:$0xf]  ;;  %v8101_v40 = vld [vmem:[%s10332_s8 + $0x1a4] sm:$0xf0] }
 0x159   : > { %v1425_v11 = vshrl.u32 %v10333_v49, %v1410_v2  ;;  %vm1427_vm13 = vcmp.lt.s32.totalorder %v8037_v54, 1  ;;  %vm1428_vm14 = vcmp.lt.s32.totalorder %v8037_v54, 2  ;;  %vm1429_vm15 = vcmp.lt.s32.totalorder %v8037_v54, 3 }
 0x15a   : > { %vm1430_vm0 = vcmp.lt.s32.totalorder %v8037_v54, 4  ;;  %v1649_v46 = vadd.s32 536870912, %v1648_v42  ;;  %v1435_v43 = vsel %vm1427_vm13, %v1414_v35, %v1417_v9  ;;  %v1431_v55 = vsel %vm1427_vm13, %v1411_v63, %v1414_v35 }
 0x15b   : > { %v1426_v30 = vor.u32 %v1425_v11, %v1424_v44  ;;  %v1432_v23 = vsel %vm1430_vm0, %v1420_v41, 2102212464  ;;  %v1436_v15 = vsel %vm1430_vm0, %v1423_v57, 920167782  ;;  %v1439_v27 = vsel %vm1427_vm13, %v1417_v9, %v1420_v41 }
 0x15c   : > { %v6053_v2 = vor.u32 %v6979_v21, %v6052_v32  ;;  %v8072_v34 = vshrl.u32 %v1649_v46, 30  ;;  %v1433_v37 = vsel %vm1429_vm15, %v1417_v9, %v1432_v23  ;;  %v1437_v28 = vsel %vm1429_vm15, %v1420_v41, %v1436_v15 }
 0x15d   : > { %v1440_v60 = vsel %vm1430_vm0, %v1426_v30, 1326507024  ;;  %v8078_v48 = vadd.s32 %v1639_v52, %v1620_v16  ;;  %v1438_v53 = vsel %vm1428_vm14, %v1435_v43, %v1437_v28  ;;  %v6045_v31 = vor.u32 %v6977_v25, %v6044_v38  ;;  %v8093_v52 = vld [vmem:[%s10332_s8 + $0x1a0] sm:$0xf] }
 0x15e   : > { %10334 = vst [vmem:[#allocation6_spill] sm:$0xff] %v8072_v34  ;;  %v1441_v50 = vsel %vm1429_vm15, %v1423_v57, %v1440_v60  ;;  %3713 = vmatpush.bf16.msra.mxu3 %v6053_v2  ;;  %v1651_v16 = vshll.u32 %v8072_v34, 30  ;;  %v1468_v35 = vand.u32 65535, %v1438_v53  ;;  %v1469_v9 = vshrl.u32 %v1438_v53, 16  ;;  %v5876_v2 = vld [vmem:[%s10332_s8 + $0x70] sm:$0xf] }
 0x15f   : > { %v1442_v5 = vsel %vm1428_vm14, %v1439_v27, %v1441_v50  ;;  %v8106_v57 = vsel %vm1428_vm14, %v1431_v55, %v1433_v37  ;;  %v6037_v21 = vor.u32 %v6975_v58, %v6036_v39  ;;  %v6029_v54 = vor.u32 %v8101_v40, %v8093_v52  ;;  %v6935_v37 = vld [vmem:[%s10332_s8 + $0x74] sm:$0xf0]  ;;  %v6020_v58 = vld [vmem:[%s10332_s8 + $0x190] sm:$0xf] }
 0x160   : > { %v1446_v63 = vand.u32 65535, %v1442_v5  ;;  %v1447_v44 = vshrl.u32 %v1442_v5, 16  ;;  %v8108_v49 = vsub.s32 %v1648_v42, %v1651_v16  ;;  %v8110_v11 = vmul.u32 %v1469_v9, %v1444_v13  ;;  %v6967_v39 = vld [vmem:[%s10332_s8 + $0x174] sm:$0xf0]  ;;  %v6948_v5 = vld [vmem:[%s10332_s8 + $0xe4] sm:$0xf] }
 0x161   : > { %v8113_v32 = vmul.u32 %v1468_v35, %v8049_v0  ;;  %v1470_v30 = vmul.u32 %v1468_v35, %v1444_v13  ;;  %v1473_v27 = vmul.u32 %v1469_v9, %v8049_v0  ;;  %v6971_v52 = vld [vmem:[%s10332_s8 + $0x194] sm:$0xf0]  ;;  %v10335_v16 = vand.u32 2147483647, %v7530_v33 }
 0x162   : > { %v8115_v38 = vmul.u32 %v1447_v44, %v1444_v13  ;;  %v8118_v46 = vmul.u32 %v1446_v63, %v8049_v0  ;;  %3714 = vmatpush.bf16.msra.mxu3 %v6045_v31  ;;  %vm1653_vm4 = vcmp.lt.s32.totalorder %v8108_v49, 0  ;;  %v1654_v42 = vsub.s32 0, %v8108_v49 }
 0x163   : > { %v1448_v23 = vmul.u32 %v1446_v63, %v1444_v13  ;;  %v1474_v43 = vshll.u32 %v8110_v11, 16  ;;  %v1451_v25 = vmul.u32 %v1447_v44, %v8049_v0  ;;  %v1476_v53 = vshll.u32 %v8113_v32, 16  ;;  %v6004_v0 = vld [vmem:[%s10332_s8 + $0x170] sm:$0xf]  ;;  %v5868_v44 = vld [vmem:[%s10332_s8 + $0x60] sm:$0xf] }
 0x164   : > { %v1452_v55 = vshll.u32 %v8115_v38, 16  ;;  %v1453_v15 = vshrl.u32 %v8115_v38, 16  ;;  %v1655_v13 = vsel %vm1653_vm4, %v1654_v42, %v8108_v49  ;;  %v1454_v28 = vshll.u32 %v8118_v46, 16 }
 0x165   : > { %v1656_v50 = vclz %v1655_v13  ;;  %vm1478_vm9 = vc.u32 %v1470_v30, %v1474_v43  ;;  %vm8153_vm10 = vcmp.le.f32.partialorder %v10335_v16, 0.7853982  ;;  %v1480_v40 = vadd.s32 %v1474_v43, %v1470_v30  ;;  %v5996_v30 = vld [vmem:[%s10332_s8 + $0x160] sm:$0xf]  ;;  %v6965_v43 = vld [vmem:[%s10332_s8 + $0x164] sm:$0xf0] }
 0x166   : > { %vm1456_vm6 = vc.u32 %v1448_v23, %v1452_v55  ;;  %v1458_v31 = vadd.s32 %v1452_v55, %v1448_v23  ;;  %3715 = vmatpush.bf16.msra.mxu3 %v6037_v21  ;;  %v1479_v9 = vsel %vm1478_vm9, 1, %v7285_v7  ;;  %v5877_v63 = vor.u32 %v6935_v37, %v5876_v2  ;;  %v6933_v21 = vld [vmem:[%s10332_s8 + $0x64] sm:$0xf0]  ;;  %v5860_v16 = vld [vmem:[%s10332_s8 + $0x50] sm:$0xf] }
 0x167   : > { %v1457_v35 = vsel %vm1456_vm6, 1, %v7285_v7  ;;  %v10338_v38 = vand.u32 2147483647, %v7567_v51  ;;  %v5786_v23 = vadd.s32 4294967294, %v1656_v50  ;;  %v1481_v13 = vadd.s32 %v1479_v9, %v1473_v27  ;;  %v8189_v50 = vld [vmem:[%s10332_s8 + $0x180] sm:$0xf] }
 0x168   : > { %v1459_v55 = vadd.s32 %v1457_v35, %v1451_v25  ;;  %vm1460_vm13 = vc.u32 %v1458_v31, %v1454_v28  ;;  %v10341_v2 = vand.u32 2147483647, %v7637_v8  ;;  %vm10307_vm15 = vcmp.lt.s32.totalorder %v7776_v14, 0  ;;  %3669 = vmatpush.bf16.msra.mxu0 %v5877_v63  ;;  %v8194_v31 = vld [vmem:[%s10332_s8 + $0x184] sm:$0xf0] }
 0x169   : > { %vm8167_vm11 = vcmp.le.f32.partialorder %v10338_v38, 0.7853982  ;;  %v1461_v25 = vsel %vm1460_vm13, 1, %v7285_v7  ;;  %v1475_v27 = vshrl.u32 %v8110_v11, 16  ;;  %vm1482_vm0 = vc.u32 %v1480_v40, %v1476_v53  ;;  %v6070_v9 = vld [vmem:[%s10332_s8 + $0x1f8] sm:$0xf0] }
 0x16a   : > { %vm8179_vm14 = vcmp.le.f32.partialorder %v10341_v2, 0.7853982  ;;  %v6005_v28 = vor.u32 %v6967_v39, %v6004_v0  ;;  %vm5787_vm4 = vcmp.lt.s32.totalorder %v5786_v23, 0  ;;  %v1463_v35 = vadd.s32 %v1461_v25, %v1459_v55  ;;  %3716 = vmatpush.bf16.msra.mxu3 %v6029_v54  ;;  %v8203_v39 = vld [vmem:[%s10332_s8 + $0x1f4] sm:$0xf] }
 0x16b   : > { %v1483_v11 = vsel %vm1482_vm0, 1, %v7285_v7  ;;  %v6021_v0 = vor.u32 %v6971_v52, %v6020_v58  ;;  %v6931_v63 = vld [vmem:[%s10332_s8 + $0x54] sm:$0xf0]  ;;  %v5988_v38 = vld [vmem:[%s10332_s8 + $0x150] sm:$0xf]  ;;  %v1659_v7 = vsel %vm5787_vm4, 0, %v5786_v23  ;;  %v5869_v58 = vor.u32 %v6933_v21, %v5868_v44 }
 0x16c   : > { %v1485_v54 = vadd.s32 %v1483_v11, %v1481_v13  ;;  %3697 = vmatpush.bf16.msra.mxu2 %v6005_v28  ;;  %v5997_v52 = vor.u32 %v6965_v43, %v5996_v30  ;;  %v6963_v55 = vld [vmem:[%s10332_s8 + $0x154] sm:$0xf0]  ;;  %v5940_v2 = vld [vmem:[%s10332_s8 + $0xf0] sm:$0xf]  ;;  %v1660_v25 = vsub.s32 32, %v1659_v7  ;;  %v1664_v41 = vsub.s32 4294967266, %v1659_v7 }
 0x16d   : > { %v1464_v60 = vadd.s32 %v1463_v35, %v1453_v15  ;;  %v1477_v34 = vshrl.u32 %v8113_v32, 16  ;;  %v6951_v23 = vld [vmem:[%s10332_s8 + $0xf4] sm:$0xf0]  ;;  %v1661_v44 = vshll.u32 %v8108_v49, %v1659_v7  ;;  %v8225_v21 = vadd.s32 %v1480_v40, %v1476_v53  ;;  %3670 = vmatpush.bf16.msra.mxu0 %v5869_v58  ;;  %v5852_v43 = vld [vmem:[%s10332_s8 + $0x40] sm:$0xf] }
 0x16e   : > { %v1486_v13 = vadd.s32 %v1485_v54, %v1475_v27  ;;  %v5861_v30 = vor.u32 %v6931_v63, %v5860_v16  ;;  %v6929_v15 = vld [vmem:[%s10332_s8 + $0x44] sm:$0xf0]  ;;  %v1662_v32 = vshrl.u32 %v8078_v48, %v1660_v25  ;;  %v1665_v28 = vadd.s32 127, %v1664_v41  ;;  %3717 = vmatpush.bf16.msra.mxu3 %v6021_v0  ;;  %v5932_v53 = vld [vmem:[%s10332_s8 + $0xe0] sm:$0xf] }
 0x16f   : > { %v10344_v35 = vshrl.u32 %v8118_v46, 16  ;;  %v6013_v49 = vor.u32 %v8194_v31, %v8189_v50  ;;  %v6949_v40 = vld [vmem:[%s10332_s8 + $0xe4] sm:$0xf0]  ;;  %v6073_v48 = vor.u32 %v8203_v39, %v6070_v9  ;;  %v5989_v41 = vor.u32 %v6963_v55, %v5988_v38  ;;  %v6062_v50 = vld [vmem:[%s10332_s8 + $0x1e8] sm:$0xf0] }
 0x170   : > { %v1487_v27 = vadd.s32 %v1486_v13, %v1477_v34  ;;  %3698 = vmatpush.bf16.msra.mxu2 %v5997_v52  ;;  %v5941_v46 = vor.u32 %v6951_v23, %v5940_v2  ;;  %v8257_v31 = vsel %vm8153_vm10, %v7530_v33, %v7964_v10  ;;  %v1663_v34 = vor.u32 %v1662_v32, %v1661_v44  ;;  %v5980_v0 = vld [vmem:[%s10332_s8 + $0x140] sm:$0xf]  ;;  %v6961_v39 = vld [vmem:[%s10332_s8 + $0x144] sm:$0xf0]  ;;  %v8276_v7 = vld [vmem:[%s10332_s8 + $0x1d4] sm:$0xf] }
 0x171   : > { %v8236_v11 = vadd.s32 %v1464_v60, %v10344_v35  ;;  %v6980_v60 = vld [vmem:[%s10332_s8 + $0x1e4] sm:$0xf]  ;;  %v1666_v16 = vshll.u32 %v1665_v28, 23  ;;  %v8271_v9 = vsel %vm8167_vm11, %v7567_v51, %v7969_v19  ;;  %3671 = vmatpush.bf16.msra.mxu0 %v5861_v30  ;;  %v5853_v63 = vor.u32 %v6929_v15, %v5852_v43  ;;  %v8281_v54 = vld [vmem:[%s10332_s8 + $0x1d8] sm:$0xf0] }
 0x172   : > { %v1491_v10 = vadd.s32 1, %v1487_v27  ;;  %3683 = vmatpush.bf16.msra.mxu1 %v5941_v46  ;;  %v5933_v38 = vor.u32 %v6949_v40, %v5932_v53  ;;  %v5844_v19 = vld [vmem:[%s10332_s8 + $0x30] sm:$0xf]  ;;  %v6927_v58 = vld [vmem:[%s10332_s8 + $0x34] sm:$0xf0]  ;;  %v8293_v52 = vsel %vm8179_vm14, %v7637_v8, %v8009_v56  ;;  %v10345_v55 = vxor.u32 2147483648, %v8051_v4  ;;  %3718 = vmatpush.bf16.msra.mxu3 %v6013_v49 }
 0x173   : > { %vm1490_vm6 = vc.u32 %v8236_v11, %v8225_v21  ;;  %v1667_v25 = vor.u32 4788187, %v1666_v16  ;;  %v1488_v23 = vmul.u32 %v8035_v47, %v8106_v57  ;;  %v5972_v44 = vld [vmem:[%s10332_s8 + $0x130] sm:$0xf]  ;;  %v6947_v13 = vld [vmem:[%s10332_s8 + $0xd4] sm:$0xf0]  ;;  %v6065_v47 = vor.u32 %v6980_v60, %v6062_v50 }
 0x174   : > { %v8300_v2 = vsel %vm10307_vm15, %v10345_v55, %v8051_v4  ;;  %v5924_v56 = vld [vmem:[%s10332_s8 + $0xd0] sm:$0xf]  ;;  %v1492_v4 = vsel %vm1490_vm6, %v1491_v10, %v1487_v27  ;;  %3699 = vmatpush.bf16.msra.mxu2 %v5989_v41  ;;  %v5981_v57 = vor.u32 %v6961_v39, %v5980_v0  ;;  %v6959_v30 = vld [vmem:[%s10332_s8 + $0x134] sm:$0xf0]  ;;  %v8322_v43 = vld [vmem:[%s10332_s8 + $0x1c4] sm:$0xf]  ;;  %v717_v32 = vlaneseq }
 0x175   : > { %v8327_v15 = vld [vmem:[%s10332_s8 + $0x1c8] sm:$0xf0]  ;;  %v10346_v28 = vand.u32 2147483647, %v7776_v14  ;;  %v1668_v49 = vand.u32 2147483647, %v1667_v25  ;;  %v1670_v53 = vcvt.s32.f32 %v1663_v34  ;;  %v1493_v40 = vadd.s32 %v1492_v4, %v1488_v23  ;;  %3672 = vmatpush.bf16.msra.mxu0 %v5853_v63 }
 0x176   : > { %3767 = vmatpush.bf16.msrb.mxu3 %v6073_v48  ;;  %v5845_v27 = vor.u32 %v6927_v58, %v5844_v19  ;;  %v5836_v48 = vld [vmem:[%s10332_s8 + $0x20] sm:$0xf]  ;;  %v6925_v41 = vld [vmem:[%s10332_s8 + $0x24] sm:$0xf0]  ;;  %vm10306_vm13 = vcmp.lt.s32.totalorder %v7886_v45, 0  ;;  %3684 = vmatpush.bf16.msra.mxu1 %v5933_v38  ;;  %v5925_v46 = vor.u32 %v6947_v13, %v5924_v56  ;;  %v2779_v60 = vsub.s32 4, %v7543_v59 }
 0x177   : > { %vm8331_vm9 = vcmp.le.f32.partialorder %v10346_v28, 0.7853982  ;;  %v2784_v50 = vmul.f32 -0.001358992, %v7953_v6  ;;  %v2791_v34 = vmul.f32 -0.00019511016, %v7953_v6  ;;  %v1671_v16 = vmul.f32 %v1670_v53, %v1668_v49 }
 0x178   : > { %v1494_v0 = vadd.s32 536870912, %v1493_v40  ;;  %v6057_v39 = vor.u32 %v8276_v7, %v8281_v54  ;;  %v5964_v10 = vld [vmem:[%s10332_s8 + $0x120] sm:$0xf]  ;;  %v6957_v63 = vld [vmem:[%s10332_s8 + $0x124] sm:$0xf0]  ;;  %v2934_v38 = vsub.s32 4, %v7594_v12  ;;  %3700 = vmatpush.bf16.msra.mxu2 %v5981_v57  ;;  %v5973_v54 = vor.u32 %v6959_v30, %v5972_v44 }
 0x179   : > { %v706_v19 = vld [vmem:[%s10349_s3] sm:$0xff]  ;;  %v707_v58 = vld [vmem:[%s10349_s3 + $0x8] sm:$0xff]  ;;  %v708_v7 = vld [vmem:[%s10349_s3 + $0x10] sm:$0xff]  ;;  %v718_v55 = vand.u32 127, %v717_v32  ;;  %v2780_v25 = vsel %vm2657_vm1, %v2779_v60, %v7543_v59  ;;  %v2785_v23 = vadd.f32 0.041655596, %v2784_v50  ;;  %v6049_v4 = vor.u32 %v8322_v43, %v8327_v15  ;;  %3673 = vmatpush.bf16.msra.mxu0 %v5845_v27 }
 0x17a   : > { %3768 = vmatpush.bf16.msrb.mxu3 %v6065_v47  ;;  %v8366_v56 = vshrl.u32 %v1494_v0, 30  ;;  %v709_v13 = vld [vmem:[%s10349_s3 + $0x18] sm:$0xff]  ;;  %710 = vst [vmem:[#allocation3] sm:$0xff] %v706_v19  ;;  %v5837_v28 = vor.u32 %v6925_v41, %v5836_v48  ;;  %v2782_v44 = vsel %vm7748_vm2, 0, %v2780_v25  ;;  %3685 = vmatpush.bf16.msra.mxu1 %v5925_v46  ;;  %v2792_v47 = vadd.f32 0.008332121, %v2791_v34 }
 0x17b   : > { %711 = vst [vmem:[#allocation3 + $0x8] sm:$0xff] %v707_v58  ;;  %v2786_v59 = vmul.f32 %v2785_v23, %v7953_v6  ;;  %v2799_v57 = vadd.s32 3, %v2782_v44  ;;  %v2935_v30 = vsel %vm2812_vm5, %v2934_v38, %v7594_v12  ;;  %v1672_v32 = vxor.u32 2147483648, %v1671_v16 }
 0x17c   : > { %v1496_v49 = vshll.u32 %v8366_v56, 30  ;;  %712 = vst [vmem:[#allocation3 + $0x10] sm:$0xff] %v708_v7  ;;  %v5965_v43 = vor.u32 %v6957_v63, %v5964_v10  ;;  %v2939_v15 = vmul.f32 -0.001358992, %v7957_v18  ;;  %3701 = vmatpush.bf16.msra.mxu2 %v5973_v54  ;;  %v723_v3 = vand.u32 1, %v718_v55 }
 0x17d   : > { %713 = vst [vmem:[#allocation3 + $0x18] sm:$0xff] %v709_v13  ;;  %v2787_v53 = vadd.f32 -0.4999988, %v2786_v59  ;;  %v2793_v27 = vmul.f32 %v2792_v47, %v7953_v6  ;;  %v8382_v48 = vand.u32 3, %v2799_v57  ;;  %v2937_v12 = vsel %vm7847_vm12, 0, %v2935_v30  ;;  %3674 = vmatpush.bf16.msra.mxu0 %v5837_v28 }
 0x17e   : > { %3769 = vmatpush.bf16.msrb.mxu3 %v6057_v39  ;;  %v8384_v41 = vsub.s32 %v1493_v40, %v1496_v49  ;;  %v2940_v46 = vadd.f32 0.041655596, %v2939_v15  ;;  %v2946_v60 = vmul.f32 -0.00019511016, %v7957_v18  ;;  %v8393_v50 = vsel %vm8331_vm9, %v7776_v14, %v8300_v2 }
 0x17f   : > { %v8397_v34 = vadd.s32 %v8225_v21, %v8236_v11  ;;  %v2788_v40 = vmul.f32 %v2787_v53, %v7953_v6  ;;  %v2794_v0 = vadd.f32 -0.16666654, %v2793_v27  ;;  %v8402_v61 = vsel %vm10306_vm13, %v1672_v32, %v1671_v16  ;;  %v5916_v32 = vld [vmem:[%s10332_s8 + $0xc0] sm:$0xf] }
 0x180   : > { %vm1498_vm1 = vcmp.lt.s32.totalorder %v8384_v41, 0  ;;  %v1499_v39 = vsub.s32 0, %v8384_v41  ;;  %v2941_v10 = vmul.f32 %v2940_v46, %v7957_v18  ;;  %3702 = vmatpush.bf16.msra.mxu2 %v5965_v43  ;;  %vm2801_vm2 = vcmp.lt.s32.totalorder %v8382_v48, 2 }
 0x181   : > { %v2789_v2 = vadd.f32 1.0, %v2788_v40  ;;  %v2795_v21 = vmul.f32 %v2794_v0, %v7953_v6  ;;  %v2947_v11 = vadd.f32 0.008332121, %v2946_v60  ;;  %v2954_v63 = vadd.s32 3, %v2937_v12  ;;  %v5828_v60 = vld [vmem:[%s10332_s8 + $0x10] sm:$0xf] }
 0x182   : > { %3770 = vmatpush.bf16.msrb.mxu3 %v6049_v4  ;;  %v1500_v38 = vsel %vm1498_vm1, %v1499_v39, %v8384_v41  ;;  %vm8410_vm5 = vcmp.eq.s32.totalorder %v723_v3, 0  ;;  %vm2798_vm12 = vweird.f32 %v7447_v20  ;;  %vm2802_vm0 = vcmp.eq.s32.totalorder %v8382_v48, 0  ;;  %v6038_v3 = vld [vmem:[%s10332_s8 + $0x1b8] sm:$0xf0]  ;;  %v6923_v40 = vld [vmem:[%s10332_s8 + $0x14] sm:$0xf0] }
 0x183   : > { %v2942_v19 = vadd.f32 -0.4999988, %v2941_v10  ;;  %v3109_v58 = vand.u32 3, %v2782_v44  ;;  %v1501_v7 = vclz %v1500_v38  ;;  %v2796_v54 = vadd.f32 1.0, %v2795_v21  ;;  %v5956_v10 = vld [vmem:[%s10332_s8 + $0x110] sm:$0xf] }
 0x184   : > { %v2806_v55 = vxor.u32 2147483648, %v2789_v2  ;;  %v2948_v6 = vmul.f32 %v2947_v11, %v7957_v18  ;;  %vm2805_vm4 = vcmp.eq.s32.totalorder %v8382_v48, 2  ;;  %v8419_v23 = vand.u32 3, %v2954_v63  ;;  %v6955_v21 = vld [vmem:[%s10332_s8 + $0x114] sm:$0xf0] }
 0x185   : > { %v2943_v25 = vmul.f32 %v2942_v19, %v7957_v18  ;;  %v8421_v13 = vand.u32 3, %v2937_v12  ;;  %v5783_v4 = vadd.s32 4294967294, %v1501_v7  ;;  %v2797_v28 = vmul.f32 %v2796_v54, %v7764_v22  ;;  %v6945_v22 = vld [vmem:[%s10332_s8 + $0xc4] sm:$0xf0]  ;;  %v5908_v11 = vld [vmem:[%s10332_s8 + $0xb0] sm:$0xf] }
 0x186   : > { %v2949_v59 = vadd.f32 -0.16666654, %v2948_v6  ;;  %vm3110_vm6 = vcmp.lt.s32.totalorder %v3109_v58, 2  ;;  %vm2960_vm1 = vcmp.eq.s32.totalorder %v8419_v23, 2  ;;  %vm3111_vm13 = vcmp.eq.s32.totalorder %v3109_v58, 0 }
 0x187   : > { %v8424_v47 = vadd.f32 1.0, %v2943_v25  ;;  %vm3114_vm15 = vcmp.eq.s32.totalorder %v3109_v58, 2  ;;  %vm5784_vm7 = vcmp.lt.s32.totalorder %v5783_v4, 0  ;;  %v2803_v44 = vxor.u32 2147483648, %v2797_v28  ;;  %v6943_v48 = vld [vmem:[%s10332_s8 + $0xb4] sm:$0xf0] }
 0x188   : > { %v2807_v57 = vsel %vm2805_vm4, %v2806_v55, %v2797_v28  ;;  %v2950_v30 = vmul.f32 %v2949_v59, %v7957_v18  ;;  %vm2957_vm8 = vcmp.eq.s32.totalorder %v8419_v23, 0  ;;  %v1504_v49 = vsel %vm5784_vm7, 0, %v5783_v4  ;;  %v6974_v18 = vld [vmem:[%s10332_s8 + $0x1b4] sm:$0xf]  ;;  %v6972_v7 = vld [vmem:[%s10332_s8 + $0x1a4] sm:$0xf] }
 0x189   : > { %vm2956_vm3 = vcmp.lt.s32.totalorder %v8419_v23, 2  ;;  %v2961_v43 = vxor.u32 2147483648, %v8424_v47  ;;  %v3116_v15 = vsel %vm3114_vm15, %v2806_v55, %v2797_v28  ;;  %vm3264_vm4 = vcmp.lt.s32.totalorder %v8421_v13, 2  ;;  %v6030_v54 = vld [vmem:[%s10332_s8 + $0x1a8] sm:$0xf0] }
 0x18a   : > { %v1505_v53 = vsub.s32 32, %v1504_v49  ;;  %v1506_v27 = vshll.u32 %v8384_v41, %v1504_v49  ;;  %v1509_v12 = vsub.s32 4294967266, %v1504_v49  ;;  %v2804_v46 = vsel %vm2802_vm0, %v2789_v2, %v2803_v44  ;;  %v8485_v55 = vld [vmem:[%s10332_s8] sm:$0xf]  ;;  %v6934_v49 = vld [vmem:[%s10332_s8 + $0x74] sm:$0xf] }
 0x18b   : > { %vm2953_vm7 = vweird.f32 %v7454_v29  ;;  %v2808_v0 = vsel %vm2801_vm2, %v2804_v46, %v2807_v57  ;;  %v2951_v39 = vadd.f32 1.0, %v2950_v30  ;;  %v3113_v41 = vsel %vm3111_vm13, %v2789_v2, %v2803_v44  ;;  %v8505_v59 = vld [vmem:[%s10332_s8 + $0x100] sm:$0xf]  ;;  %v8510_v44 = vld [vmem:[%s10332_s8 + $0x104] sm:$0xf0] }
 0x18c   : > { %vm3265_vm15 = vcmp.eq.s32.totalorder %v8421_v13, 0  ;;  %v1507_v2 = vshrl.u32 %v8397_v34, %v1505_v53  ;;  %v1510_v63 = vadd.s32 127, %v1509_v12  ;;  %v8473_v38 = vsel %vm2798_vm12, nan, %v2808_v0  ;;  %v8490_v34 = vld [vmem:[%s10332_s8 + $0x4] sm:$0xf0] }
 0x18d   : > { %v3117_v19 = vsel %vm3110_vm6, %v3113_v41, %v3116_v15  ;;  %v10352_v58 = vand.u32 2147483647, %v7886_v45  ;;  %v2952_v25 = vmul.f32 %v2951_v39, %v7863_v36  ;;  %vm3268_vm2 = vcmp.eq.s32.totalorder %v8421_v13, 2  ;;  %v8536_v12 = vld [vmem:[%s10332_s8 + $0x174] sm:$0xf] }
 0x18e   : > { %v3118_v4 = vsel %vm2798_vm12, nan, %v3117_v19  ;;  %v5917_v28 = vor.u32 %v6945_v22, %v5916_v32  ;;  %v1508_v57 = vor.u32 %v1507_v2, %v1506_v27  ;;  %v1511_v30 = vshll.u32 %v1510_v63, 23  ;;  %v8518_v32 = vld [vmem:[%s10332_s8 + $0xa0] sm:$0xf]  ;;  %v8523_v22 = vld [vmem:[%s10332_s8 + $0xa4] sm:$0xf0] }
 0x18f   : > { %vm8494_vm13 = vcmp.le.f32.partialorder %v10352_v58, 0.7853982  ;;  %v3273_v20 = vsel %vm8410_vm5, %v8473_v38, %v3118_v4  ;;  %v6041_v36 = vor.u32 %v6974_v18, %v6038_v3  ;;  %v2958_v15 = vxor.u32 2147483648, %v2952_v25  ;;  %v5878_v3 = vld [vmem:[%s10332_s8 + $0x78] sm:$0xf0] }
 0x190   : > { %v2962_v53 = vsel %vm2960_vm1, %v2961_v43, %v2952_v25  ;;  %v3270_v27 = vsel %vm3268_vm2, %v2961_v43, %v2952_v25  ;;  %3686 = vmatpush.bf16.msra.mxu1 %v5917_v28  ;;  %v5829_v18 = vor.u32 %v6923_v40, %v5828_v60  ;;  %v1512_v46 = vor.u32 4788187, %v1511_v30  ;;  %v6006_v43 = vld [vmem:[%s10332_s8 + $0x178] sm:$0xf0]  ;;  %v6970_v60 = vld [vmem:[%s10332_s8 + $0x194] sm:$0xf] }
 0x191   : > { %v1515_v0 = vcvt.s32.f32 %v1508_v57  ;;  %3771 = vmatpush.bf16.msrb.mxu3 %v6041_v36  ;;  %v5957_v39 = vor.u32 %v6955_v21, %v5956_v10  ;;  %v5909_v41 = vor.u32 %v6943_v48, %v5908_v11  ;;  %v2959_v40 = vsel %vm2957_vm8, %v8424_v47, %v2958_v15  ;;  %v6022_v21 = vld [vmem:[%s10332_s8 + $0x198] sm:$0xf0]  ;;  %v6932_v11 = vld [vmem:[%s10332_s8 + $0x64] sm:$0xf]  ;;  %v5870_v48 = vld [vmem:[%s10332_s8 + $0x68] sm:$0xf0] }
 0x192   : > { %v3267_v2 = vsel %vm3265_vm15, %v8424_v47, %v2958_v15  ;;  %3675 = vmatpush.bf16.msra.mxu0 %v5829_v18  ;;  %v6033_v63 = vor.u32 %v6972_v7, %v6030_v54  ;;  %v5821_v10 = vor.u32 %v8490_v34, %v8485_v55  ;;  %v1513_v38 = vand.u32 2147483647, %v1512_v46  ;;  %v5892_v54 = vld [vmem:[%s10332_s8 + $0x90] sm:$0xf]  ;;  %v6939_v55 = vld [vmem:[%s10332_s8 + $0x94] sm:$0xf0] }
 0x193   : > { %v2963_v47 = vsel %vm2956_vm3, %v2959_v40, %v2962_v53  ;;  %v3271_v19 = vsel %vm3264_vm4, %v3267_v2, %v3270_v27  ;;  %3703 = vmatpush.bf16.msra.mxu2 %v5957_v39  ;;  %v5949_v7 = vor.u32 %v8510_v44, %v8505_v59  ;;  %v8576_v23 = vld [vmem:[%s10332_s8 + $0x164] sm:$0xf]  ;;  %v8581_v13 = vld [vmem:[%s10332_s8 + $0x168] sm:$0xf0]  ;;  %v5901_v25 = vor.u32 %v8523_v22, %v8518_v32  ;;  %v8601_v36 = vld [vmem:[%s10332_s8 + $0x80] sm:$0xf] }
 0x194   : > { %v2964_v34 = vsel %vm2953_vm7, nan, %v2963_v47  ;;  %v3272_v58 = vsel %vm2953_vm7, nan, %v3271_v19  ;;  %3687 = vmatpush.bf16.msra.mxu1 %v5909_v41  ;;  %v5881_v4 = vor.u32 %v6934_v49, %v5878_v3  ;;  %v6968_v28 = vld [vmem:[%s10332_s8 + $0x184] sm:$0xf]  ;;  %v6014_v59 = vld [vmem:[%s10332_s8 + $0x188] sm:$0xf0]  ;;  %v1516_v44 = vmul.f32 %v1515_v0, %v1513_v38 }
 0x195   : > { %v3274_v57 = vsel %vm8410_vm5, %v2964_v34, %v3272_v58  ;;  %3772 = vmatpush.bf16.msrb.mxu3 %v6033_v63  ;;  %v6009_v29 = vor.u32 %v8536_v12, %v6006_v43  ;;  %v6025_v30 = vor.u32 %v6970_v60, %v6022_v21  ;;  %v8606_v32 = vld [vmem:[%s10332_s8 + $0x84] sm:$0xf0]  ;;  %v6930_v22 = vld [vmem:[%s10332_s8 + $0x54] sm:$0xf]  ;;  %v8613_v49 = vmul.f32 %v8257_v31, %v8257_v31  ;;  %v5862_v18 = vld [vmem:[%s10332_s8 + $0x58] sm:$0xf0] }
 0x196   : > { %v8617_v15 = vmul.f32 %v8271_v9, %v8271_v9  ;;  %v8621_v53 = vmul.f32 %v8293_v52, %v8293_v52  ;;  %v8623_v27 = vpack.c.bf16 %v3274_v57, %v3273_v20  ;;  %3676 = vmatpush.bf16.msra.mxu0 %v5821_v10  ;;  %v8631_v3 = vld [vmem:[%s10332_s8 + $0x154] sm:$0xf]  ;;  %v8636_v12 = vld [vmem:[%s10332_s8 + $0x158] sm:$0xf0]  ;;  %v8640_v46 = vmul.f32 %v8393_v50, %v8393_v50  ;;  %v6928_v10 = vld [vmem:[%s10332_s8 + $0x44] sm:$0xf] }
 0x197   : > { %v8646_v20 = vsel %vm8494_vm13, %v7886_v45, %v8402_v61  ;;  %vm10311_vm3 = vcmp.lt.s32.totalorder %v7945_v62, 0  ;;  %3704 = vmatpush.bf16.msra.mxu2 %v5949_v7  ;;  %v5873_v0 = vor.u32 %v6932_v11, %v5870_v48  ;;  %v6950_v39 = vld [vmem:[%s10332_s8 + $0xf4] sm:$0xf]  ;;  %v5942_v41 = vld [vmem:[%s10332_s8 + $0xf8] sm:$0xf0]  ;;  %v1517_v61 = vxor.u32 2147483648, %v1516_v44 }
 0x198   : > { %v10355_v43 = vand.u32 2147483647, %v7945_v62  ;;  %3719 = vmatmul.bf16.vlgmr.msra.gmra.mxu3 %v8623_v27  ;;  %3688 = vmatpush.bf16.msra.mxu1 %v5901_v25  ;;  %v5893_v40 = vor.u32 %v6939_v55, %v5892_v54  ;;  %v6001_v2 = vor.u32 %v8576_v23, %v8581_v13  ;;  %v6017_v63 = vor.u32 %v6968_v28, %v6014_v59  ;;  %v5854_v21 = vld [vmem:[%s10332_s8 + $0x48] sm:$0xf0]  ;;  %v6960_v7 = vld [vmem:[%s10332_s8 + $0x144] sm:$0xf] }
 0x199   : > { %3773 = vmatpush.bf16.msrb.mxu3 %v6025_v30  ;;  %v5885_v11 = vor.u32 %v8606_v32, %v8601_v36  ;;  %v5865_v48 = vor.u32 %v6930_v22, %v5862_v18  ;;  %v5993_v38 = vor.u32 %v8631_v3, %v8636_v12  ;;  %v887_v47 = vsub.s32 4, %v7709_v24  ;;  %v5982_v34 = vld [vmem:[%s10332_s8 + $0x148] sm:$0xf0] }
 0x19a   : > { %3725 = vmatpush.bf16.msrb.mxu0 %v5881_v4  ;;  %vm8657_vm8 = vcmp.le.f32.partialorder %v10355_v43, 0.7853982  ;;  %v5945_v19 = vor.u32 %v6950_v39, %v5942_v41  ;;  %v892_v54 = vmul.f32 -0.001358992, %v8613_v49  ;;  %v899_v55 = vmul.f32 -0.00019511016, %v8613_v49 }
 0x19b   : > { %3753 = vmatpush.bf16.msrb.mxu2 %v6009_v29  ;;  %v1042_v23 = vsub.s32 4, %v7894_v26  ;;  %v5857_v13 = vor.u32 %v6928_v10, %v5854_v21  ;;  %vm10358_vm12 = vcmp.lt.s32.totalorder %v7530_v33, 0  ;;  %v1047_v25 = vmul.f32 -0.001358992, %v8621_v53  ;;  %v5934_v18 = vld [vmem:[%s10332_s8 + $0xe8] sm:$0xf0] }
 0x19c   : > { %v888_v58 = vsel %vm10358_vm12, %v887_v47, %v7709_v24  ;;  %v1054_v4 = vmul.f32 -0.00019511016, %v8621_v53  ;;  %3689 = vmatpush.bf16.msra.mxu1 %v5893_v40  ;;  %v893_v59 = vadd.f32 0.041655596, %v892_v54  ;;  %v900_v57 = vadd.f32 0.008332121, %v899_v55 }
 0x19d   : > { %v890_v28 = vsel %vm8153_vm10, 0, %v888_v58  ;;  %vm10359_vm0 = vcmp.lt.s32.totalorder %v7637_v8, 0  ;;  %3774 = vmatpush.bf16.msrb.mxu3 %v6017_v63  ;;  %v1048_v36 = vadd.f32 0.041655596, %v1047_v25  ;;  %v1518_v22 = vsel %vm10311_vm3, %v1517_v61, %v1516_v44 }
 0x19e   : > { %3726 = vmatpush.bf16.msrb.mxu0 %v5873_v0  ;;  %v1043_v29 = vsel %vm10359_vm0, %v1042_v23, %v7894_v26  ;;  %v907_v30 = vadd.s32 3, %v890_v28  ;;  %v1055_v32 = vadd.f32 0.008332121, %v1054_v4  ;;  %v894_v26 = vmul.f32 %v893_v59, %v8613_v49 }
 0x19f   : > { %3754 = vmatpush.bf16.msrb.mxu2 %v6001_v2  ;;  %v1045_v24 = vsel %vm8179_vm14, 0, %v1043_v29  ;;  %v901_v3 = vmul.f32 %v900_v57, %v8613_v49  ;;  %v5985_v37 = vor.u32 %v6960_v7, %v5982_v34  ;;  %v1049_v39 = vmul.f32 %v1048_v36, %v8621_v53 }
 0x1a0   : > { %v1062_v12 = vadd.s32 3, %v1045_v24  ;;  %v908_v0 = vand.u32 3, %v907_v30  ;;  %v1056_v44 = vmul.f32 %v1055_v32, %v8621_v53  ;;  %3690 = vmatpush.bf16.msra.mxu1 %v5885_v11  ;;  %v895_v41 = vadd.f32 -0.4999988, %v894_v26 }
 0x1a1   : > { %v902_v43 = vadd.f32 -0.16666654, %v901_v3  ;;  %v1217_v40 = vand.u32 3, %v890_v28  ;;  %v8711_v2 = vsel %vm8657_vm8, %v7945_v62, %v1518_v22  ;;  %v5937_v63 = vor.u32 %v6948_v5, %v5934_v18 }
 0x1a2   : > { %3727 = vmatpush.bf16.msrb.mxu0 %v5865_v48  ;;  %v1063_v61 = vand.u32 3, %v1062_v12  ;;  %v1050_v10 = vadd.f32 -0.4999988, %v1049_v39  ;;  %v1371_v21 = vand.u32 3, %v1045_v24  ;;  %v896_v48 = vmul.f32 %v895_v41, %v8613_v49 }
 0x1a3   : > { %3755 = vmatpush.bf16.msrb.mxu2 %v5993_v38  ;;  %v903_v47 = vmul.f32 %v902_v43, %v8613_v49  ;;  %vm910_vm14 = vcmp.eq.s32.totalorder %v908_v0, 0  ;;  %v1057_v11 = vadd.f32 -0.16666654, %v1056_v44  ;;  %vm906_vm6 = vweird.f32 %v7530_v33 }
 0x1a4   : > { %3739 = vmatpush.bf16.msrb.mxu1 %v5945_v19  ;;  %vm913_vm1 = vcmp.eq.s32.totalorder %v908_v0, 2  ;;  %v1051_v7 = vmul.f32 %v1050_v10, %v8621_v53  ;;  %vm1068_vm7 = vcmp.eq.s32.totalorder %v1063_v61, 2  ;;  %v897_v38 = vadd.f32 1.0, %v896_v48 }
 0x1a5   : > { %v904_v19 = vadd.f32 1.0, %v903_v47  ;;  %v1058_v54 = vmul.f32 %v1057_v11, %v8621_v53  ;;  %vm1218_vm2 = vcmp.lt.s32.totalorder %v1217_v40, 2  ;;  %vm1219_vm0 = vcmp.eq.s32.totalorder %v1217_v40, 0 }
 0x1a6   : > { %3728 = vmatpush.bf16.msrb.mxu0 %v5857_v13  ;;  %v1052_v49 = vadd.f32 1.0, %v1051_v7  ;;  %vm1222_vm3 = vcmp.eq.s32.totalorder %v1217_v40, 2  ;;  %v914_v23 = vxor.u32 2147483648, %v897_v38  ;;  %vm1373_vm4 = vcmp.eq.s32.totalorder %v1371_v21, 0 }
 0x1a7   : > { %3756 = vmatpush.bf16.msrb.mxu2 %v5985_v37  ;;  %v905_v55 = vmul.f32 %v904_v19, %v8257_v31  ;;  %v1059_v13 = vadd.f32 1.0, %v1058_v54  ;;  %v2149_v58 = vsub.s32 4, %v7792_v17  ;;  %v2154_v53 = vmul.f32 -0.001358992, %v8617_v15 }
 0x1a8   : > { %3740 = vmatpush.bf16.msrb.mxu1 %v5937_v63  ;;  %v1069_v34 = vxor.u32 2147483648, %v1052_v49  ;;  %v2161_v25 = vmul.f32 -0.00019511016, %v8617_v15  ;;  %3775 = vmatmul.bf16.vlgmr.msrb.gmra.mxu3 %v8623_v27  ;;  %vm1376_vm12 = vcmp.eq.s32.totalorder %v1371_v21, 2  ;;  %vm10360_vm10 = vcmp.lt.s32.totalorder %v7567_v51, 0 }
 0x1a9   : > { %v911_v4 = vxor.u32 2147483648, %v905_v55  ;;  %v915_v28 = vsel %vm913_vm1, %v914_v23, %v905_v55  ;;  %v1060_v59 = vmul.f32 %v1059_v13, %v8293_v52  ;;  %v1224_v57 = vsel %vm1222_vm3, %v914_v23, %v905_v55  ;;  %v6926_v55 = vld [vmem:[%s10332_s8 + $0x34] sm:$0xf] }
 0x1aa   : > { %v2150_v31 = vsel %vm10360_vm10, %v2149_v58, %v7792_v17  ;;  %v2155_v29 = vadd.f32 0.041655596, %v2154_v53  ;;  %v2162_v30 = vadd.f32 0.008332121, %v2161_v25  ;;  %vm10361_vm15 = vcmp.lt.s32.totalorder %v908_v0, 2 }
 0x1ab   : > { %v912_v24 = vsel %vm910_vm14, %v897_v38, %v911_v4  ;;  %v1066_v36 = vxor.u32 2147483648, %v1060_v59  ;;  %v1070_v32 = vsel %vm1068_vm7, %v1069_v34, %v1060_v59  ;;  %v1221_v27 = vsel %vm1219_vm0, %v897_v38, %v911_v4 }
 0x1ac   : > { %v916_v22 = vsel %vm10361_vm15, %v912_v24, %v915_v28  ;;  %v1225_v5 = vsel %vm1218_vm2, %v1221_v27, %v1224_v57  ;;  %v1378_v52 = vsel %vm1376_vm12, %v1069_v34, %v1060_v59  ;;  %v2152_v18 = vsel %vm8167_vm11, 0, %v2150_v31  ;;  %v5926_v27 = vld [vmem:[%s10332_s8 + $0xd8] sm:$0xf0] }
 0x1ad   : > { %v917_v17 = vsel %vm906_vm6, nan, %v916_v22  ;;  %vm10362_vm3 = vcmp.eq.s32.totalorder %v1063_v61, 0  ;;  %v1226_v3 = vsel %vm906_vm6, nan, %v1225_v5  ;;  %v1375_v12 = vsel %vm1373_vm4, %v1052_v49, %v1066_v36 }
 0x1ae   : > { %v1067_v26 = vsel %vm10362_vm3, %v1052_v49, %v1066_v36  ;;  %vm10363_vm10 = vcmp.lt.s32.totalorder %v1063_v61, 2  ;;  %vm10364_vm14 = vcmp.lt.s32.totalorder %v1371_v21, 2  ;;  %v1383_v39 = vsel %vm8410_vm5, %v917_v17, %v1226_v3  ;;  %v6958_v36 = vld [vmem:[%s10332_s8 + $0x134] sm:$0xf]  ;;  %v6956_v3 = vld [vmem:[%s10332_s8 + $0x124] sm:$0xf] }
 0x1af   : > { %v1071_v37 = vsel %vm10363_vm10, %v1067_v26, %v1070_v32  ;;  %v1379_v0 = vsel %vm10364_vm14, %v1375_v12, %v1378_v52  ;;  %v2156_v42 = vmul.f32 %v2155_v29, %v8617_v15  ;;  %vm10365_vm11 = vweird.f32 %v7637_v8  ;;  %v5974_v32 = vld [vmem:[%s10332_s8 + $0x138] sm:$0xf0]  ;;  %v6924_v52 = vld [vmem:[%s10332_s8 + $0x24] sm:$0xf] }
 0x1b0   : > { %v1072_v44 = vsel %vm10365_vm11, nan, %v1071_v37  ;;  %vm10366_vm1 = vmmov %vm10365_vm11  ;;  %v2163_v33 = vmul.f32 %v2162_v30, %v8617_v15  ;;  %v2169_v43 = vadd.s32 3, %v2152_v18  ;;  %v2304_v63 = vsub.s32 4, %v7980_v1 }
 0x1b1   : > { %v1380_v41 = vsel %vm10366_vm1, nan, %v1379_v0  ;;  %v2157_v40 = vadd.f32 -0.4999988, %v2156_v42  ;;  %v2309_v10 = vmul.f32 -0.001358992, %v8640_v46  ;;  %vm10367_vm6 = vcmp.lt.s32.totalorder %v7776_v14, 0 }
 0x1b2   : > { %v1384_v61 = vsel %vm8410_vm5, %v1072_v44, %v1380_v41  ;;  %v2164_v48 = vadd.f32 -0.16666654, %v2163_v33  ;;  %v2316_v47 = vmul.f32 -0.00019511016, %v8640_v46  ;;  %v2305_v8 = vsel %vm10367_vm6, %v2304_v63, %v7980_v1  ;;  %v5846_v1 = vld [vmem:[%s10332_s8 + $0x38] sm:$0xf0] }
 0x1b3   : > { %v8756_v21 = vpack.c.bf16 %v1384_v61, %v1383_v39  ;;  %v2158_v11 = vmul.f32 %v2157_v40, %v8617_v15  ;;  %v2310_v7 = vadd.f32 0.041655596, %v2309_v10  ;;  %v8765_v38 = vmul.f32 %v8646_v20, %v8646_v20  ;;  %v6944_v39 = vld [vmem:[%s10332_s8 + $0xc4] sm:$0xf]  ;;  %v5918_v33 = vld [vmem:[%s10332_s8 + $0xc8] sm:$0xf0] }
 0x1b4   : > { %v8769_v19 = vmul.f32 %v8711_v2, %v8711_v2  ;;  %v2165_v54 = vmul.f32 %v2164_v48, %v8617_v15  ;;  %v2170_v49 = vand.u32 3, %v2169_v43  ;;  %v2307_v13 = vsel %vm8331_vm9, 0, %v2305_v8 }
 0x1b5   : > { %3677 = vmatmul.bf16.vlgmr.msra.gmra.mxu0 %v8756_v21  ;;  %v2159_v23 = vadd.f32 1.0, %v2158_v11  ;;  %v2311_v34 = vmul.f32 %v2310_v7, %v8640_v46  ;;  %v2317_v58 = vadd.f32 0.008332121, %v2316_v47  ;;  %vm2168_vm4 = vweird.f32 %v7567_v51 }
 0x1b6   : > { %v2166_v53 = vadd.f32 1.0, %v2165_v54  ;;  %v2324_v15 = vadd.s32 3, %v2307_v13  ;;  %v2479_v25 = vand.u32 3, %v2152_v18  ;;  %v8783_v4 = vand.u32 3, %v2307_v13  ;;  %v5838_v18 = vld [vmem:[%s10332_s8 + $0x28] sm:$0xf0] }
 0x1b7   : > { %v2176_v28 = vxor.u32 2147483648, %v2159_v23  ;;  %v2312_v59 = vadd.f32 -0.4999988, %v2311_v34  ;;  %v2318_v57 = vmul.f32 %v2317_v58, %v8640_v46  ;;  %v5849_v31 = vor.u32 %v6926_v55, %v5846_v1  ;;  %v10369_v58 = vld [vmem:[#allocation6_spill] sm:$0xff] }
 0x1b8   : > { %v2167_v29 = vmul.f32 %v2166_v53, %v8271_v9  ;;  %vm2171_vm7 = vcmp.lt.s32.totalorder %v2170_v49, 2  ;;  %vm2172_vm15 = vcmp.eq.s32.totalorder %v2170_v49, 0  ;;  %v8787_v35 = vand.u32 3, %v2324_v15  ;;  %v6946_v9 = vld [vmem:[%s10332_s8 + $0xd4] sm:$0xf] }
 0x1b9   : > { %vm2175_vm9 = vcmp.eq.s32.totalorder %v2170_v49, 2  ;;  %v2313_v30 = vmul.f32 %v2312_v59, %v8640_v46  ;;  %v2319_v24 = vadd.f32 -0.16666654, %v2318_v57  ;;  %vm2480_vm2 = vcmp.lt.s32.totalorder %v2479_v25, 2  ;;  %3729 = vmatpush.bf16.msrb.mxu0 %v5849_v31 }
 0x1ba   : > { %v2173_v22 = vxor.u32 2147483648, %v2167_v29  ;;  %v2177_v5 = vsel %vm2175_vm9, %v2176_v28, %v2167_v29  ;;  %vm2481_vm12 = vcmp.eq.s32.totalorder %v2479_v25, 0  ;;  %vm2484_vm0 = vcmp.eq.s32.totalorder %v2479_v25, 2 }
 0x1bb   : > { %v2314_v17 = vadd.f32 1.0, %v2313_v30  ;;  %v2320_v26 = vmul.f32 %v2319_v24, %v8640_v46  ;;  %vm2326_vm3 = vcmp.lt.s32.totalorder %v8787_v35, 2  ;;  %vm2327_vm10 = vcmp.eq.s32.totalorder %v8787_v35, 0  ;;  %v5966_v46 = vld [vmem:[%s10332_s8 + $0x128] sm:$0xf0] }
 0x1bc   : > { %vm2634_vm14 = vcmp.lt.s32.totalorder %v8783_v4, 2  ;;  %v2174_v12 = vsel %vm2172_vm15, %v2159_v23, %v2173_v22  ;;  %vm2323_vm11 = vweird.f32 %v7776_v14  ;;  %vm2330_vm1 = vcmp.eq.s32.totalorder %v8787_v35, 2 }
 0x1bd   : > { %v2483_v37 = vsel %vm2481_vm12, %v2159_v23, %v2173_v22  ;;  %v2486_v0 = vsel %vm2484_vm0, %v2176_v28, %v2167_v29  ;;  %v2178_v42 = vsel %vm2171_vm7, %v2174_v12, %v2177_v5  ;;  %v2321_v44 = vadd.f32 1.0, %v2320_v26 }
 0x1be   : > { %v2331_v41 = vxor.u32 2147483648, %v2314_v17  ;;  %vm2635_vm6 = vcmp.eq.s32.totalorder %v8783_v4, 0  ;;  %v2487_v43 = vsel %vm2480_vm2, %v2483_v37, %v2486_v0  ;;  %vm2638_vm15 = vcmp.eq.s32.totalorder %v8783_v4, 2 }
 0x1bf   : > { %v5977_v61 = vor.u32 %v6958_v36, %v5974_v32  ;;  %v5929_v40 = vor.u32 %v6946_v9, %v5926_v27  ;;  %v2179_v63 = vsel %vm2168_vm4, nan, %v2178_v42  ;;  %v2322_v10 = vmul.f32 %v2321_v44, %v8393_v50 }
 0x1c0   : > { %v5841_v48 = vor.u32 %v6924_v52, %v5838_v18  ;;  %v5969_v47 = vor.u32 %v6956_v3, %v5966_v46  ;;  %v5921_v11 = vor.u32 %v6944_v39, %v5918_v33  ;;  %v1519_v8 = vsub.s32 4, %v8366_v56  ;;  %v6922_v52 = vld [vmem:[%s10332_s8 + $0x14] sm:$0xf]  ;;  %v5830_v18 = vld [vmem:[%s10332_s8 + $0x18] sm:$0xf0] }
 0x1c1   : > { %3757 = vmatpush.bf16.msrb.mxu2 %v5977_v61  ;;  %3741 = vmatpush.bf16.msrb.mxu1 %v5929_v40  ;;  %v1524_v7 = vmul.f32 -0.001358992, %v8769_v19  ;;  %v1531_v54 = vmul.f32 -0.00019511016, %v8769_v19  ;;  %v2328_v49 = vxor.u32 2147483648, %v2322_v10  ;;  %v2332_v55 = vsel %vm2330_vm1, %v2331_v41, %v2322_v10 }
 0x1c2   : > { %v2488_v1 = vsel %vm2168_vm4, nan, %v2487_v43  ;;  %v2640_v50 = vsel %vm2638_vm15, %v2331_v41, %v2322_v10  ;;  %3730 = vmatpush.bf16.msrb.mxu0 %v5841_v48  ;;  %vm10368_vm7 = vcmp.lt.s32.totalorder %v7945_v62, 0  ;;  %v1674_v53 = vsub.s32 4, %v10369_v58  ;;  %v6954_v33 = vld [vmem:[%s10332_s8 + $0x114] sm:$0xf] }
 0x1c3   : > { %v1520_v23 = vsel %vm10368_vm7, %v1519_v8, %v8366_v56  ;;  %v1525_v13 = vadd.f32 0.041655596, %v1524_v7  ;;  %v1532_v34 = vadd.f32 0.008332121, %v1531_v54  ;;  %v2329_v15 = vsel %vm2327_vm10, %v2314_v17, %v2328_v49  ;;  %v5910_v10 = vld [vmem:[%s10332_s8 + $0xb8] sm:$0xf0] }
 0x1c4   : > { %v2637_v25 = vsel %vm2635_vm6, %v2314_v17, %v2328_v49  ;;  %v1522_v51 = vsel %vm8657_vm8, 0, %v1520_v23  ;;  %v1679_v28 = vmul.f32 -0.001358992, %v8765_v38  ;;  %v2333_v59 = vsel %vm2326_vm3, %v2329_v15, %v2332_v55  ;;  %v5822_v54 = vld [vmem:[%s10332_s8 + $0x8] sm:$0xf0] }
 0x1c5   : > { %v2641_v56 = vsel %vm2634_vm14, %v2637_v25, %v2640_v50  ;;  %3758 = vmatpush.bf16.msrb.mxu2 %v5969_v47  ;;  %3742 = vmatpush.bf16.msrb.mxu1 %v5921_v11  ;;  %v1526_v57 = vmul.f32 %v1525_v13, %v8769_v19  ;;  %v1539_v31 = vadd.s32 3, %v1522_v51  ;;  %v2334_v29 = vsel %vm2323_vm11, nan, %v2333_v59  ;;  %v5950_v50 = vld [vmem:[%s10332_s8 + $0x108] sm:$0xf0] }
 0x1c6   : > { %v2642_v60 = vsel %vm2323_vm11, nan, %v2641_v56  ;;  %v1533_v30 = vmul.f32 %v1532_v34, %v8769_v19  ;;  %vm10370_vm8 = vcmp.lt.s32.totalorder %v7886_v45, 0  ;;  %v2643_v4 = vsel %vm8410_vm5, %v2179_v63, %v2488_v1  ;;  %v6942_v63 = vld [vmem:[%s10332_s8 + $0xb4] sm:$0xf]  ;;  %v6952_v1 = vld [vmem:[%s10332_s8 + $0x104] sm:$0xf] }
 0x1c7   : > { %v1675_v35 = vsel %vm10370_vm8, %v1674_v53, %v10369_v58  ;;  %v2644_v24 = vsel %vm8410_vm5, %v2334_v29, %v2642_v60  ;;  %v1527_v36 = vadd.f32 -0.4999988, %v1526_v57  ;;  %v1680_v27 = vadd.f32 0.041655596, %v1679_v28  ;;  %v6940_v58 = vld [vmem:[%s10332_s8 + $0xa4] sm:$0xf] }
 0x1c8   : > { %v1677_v32 = vsel %vm8494_vm13, 0, %v1675_v35  ;;  %v8873_v9 = vpack.c.bf16 %v2644_v24, %v2643_v4  ;;  %v1534_v14 = vadd.f32 -0.16666654, %v1533_v30  ;;  %v1686_v22 = vmul.f32 -0.00019511016, %v8765_v38 }
 0x1c9   : > { %v1528_v5 = vmul.f32 %v1527_v36, %v8769_v19  ;;  %v1540_v17 = vand.u32 3, %v1539_v31  ;;  %v1681_v26 = vmul.f32 %v1680_v27, %v8765_v38  ;;  %v1694_v37 = vadd.s32 3, %v1677_v32  ;;  %v5902_v53 = vld [vmem:[%s10332_s8 + $0xa8] sm:$0xf0]  ;;  %v6938_v29 = vld [vmem:[%s10332_s8 + $0x94] sm:$0xf] }
 0x1ca   : > { %3705 = vmatmul.bf16.vlgmr.msra.gmra.mxu2 %v8873_v9  ;;  %v1535_v6 = vmul.f32 %v1534_v14, %v8769_v19  ;;  %v1687_v3 = vadd.f32 0.008332121, %v1686_v22  ;;  %v1849_v0 = vand.u32 3, %v1522_v51  ;;  %v5833_v44 = vor.u32 %v6922_v52, %v5830_v18  ;;  %v5958_v19 = vld [vmem:[%s10332_s8 + $0x118] sm:$0xf0] }
 0x1cb   : > { %v1529_v12 = vadd.f32 1.0, %v1528_v5  ;;  %v1682_v39 = vadd.f32 -0.4999988, %v1681_v26  ;;  %vm1541_vm13 = vcmp.lt.s32.totalorder %v1540_v17, 2  ;;  %vm1542_vm4 = vcmp.eq.s32.totalorder %v1540_v17, 0 }
 0x1cc   : > { %v1536_v46 = vadd.f32 1.0, %v1535_v6  ;;  %v1688_v42 = vmul.f32 %v1687_v3, %v8765_v38  ;;  %3731 = vmatpush.bf16.msrb.mxu0 %v5833_v44  ;;  %vm1545_vm9 = vcmp.eq.s32.totalorder %v1540_v17, 2  ;;  %v1695_v48 = vand.u32 3, %v1694_v37  ;;  %v5886_v18 = vld [vmem:[%s10332_s8 + $0x88] sm:$0xf0] }
 0x1cd   : > { %v1546_v41 = vxor.u32 2147483648, %v1529_v12  ;;  %v1683_v61 = vmul.f32 %v1682_v39, %v8765_v38  ;;  %v2003_v47 = vand.u32 3, %v1677_v32  ;;  %vm1850_vm2 = vcmp.lt.s32.totalorder %v1849_v0, 2  ;;  %v6998_v3 = vld [vmem:[%s10275_s9 + $0x74] sm:$0xf] }
 0x1ce   : > { %v1537_v43 = vmul.f32 %v1536_v46, %v8711_v2  ;;  %v1689_v40 = vadd.f32 -0.16666654, %v1688_v42  ;;  %v6920_v2 = vld [vmem:[%s10332_s8 + $0x4] sm:$0xf]  ;;  %vm1851_vm12 = vcmp.eq.s32.totalorder %v1849_v0, 0  ;;  %vm1854_vm0 = vcmp.eq.s32.totalorder %v1849_v0, 2 }
 0x1cf   : > { %v1684_v8 = vadd.f32 1.0, %v1683_v61  ;;  %v5961_v55 = vor.u32 %v6954_v33, %v5958_v19  ;;  %v5913_v51 = vor.u32 %v6942_v63, %v5910_v10  ;;  %v5825_v28 = vor.u32 %v6920_v2, %v5822_v54  ;;  %v6124_v0 = vld [vmem:[%s10275_s9 + $0x60] sm:$0xf]  ;;  %v6997_v46 = vld [vmem:[%s10275_s9 + $0x64] sm:$0xf0] }
 0x1d0   : > { %v1543_v11 = vxor.u32 2147483648, %v1537_v43  ;;  %v1690_v7 = vmul.f32 %v1689_v40, %v8765_v38  ;;  %v1547_v49 = vsel %vm1545_vm9, %v1546_v41, %v1537_v43  ;;  %v1856_v34 = vsel %vm1854_vm0, %v1546_v41, %v1537_v43  ;;  %v6996_v39 = vld [vmem:[%s10275_s9 + $0x64] sm:$0xf]  ;;  %v6126_v44 = vld [vmem:[%s10275_s9 + $0x68] sm:$0xf0] }
 0x1d1   : > { %3759 = vmatpush.bf16.msrb.mxu2 %v5961_v55  ;;  %v1701_v56 = vxor.u32 2147483648, %v1684_v8  ;;  %v5953_v57 = vor.u32 %v6952_v1, %v5950_v50  ;;  %vm1538_vm3 = vweird.f32 %v7945_v62  ;;  %vm1693_vm10 = vweird.f32 %v7886_v45  ;;  %3743 = vmatpush.bf16.msrb.mxu1 %v5913_v51  ;;  %v6132_v45 = vld [vmem:[%s10275_s9 + $0x70] sm:$0xf]  ;;  %v6995_v33 = vld [vmem:[%s10275_s9 + $0x54] sm:$0xf0] }
 0x1d2   : > { %v1544_v23 = vsel %vm1542_vm4, %v1529_v12, %v1543_v11  ;;  %v1691_v38 = vadd.f32 1.0, %v1690_v7  ;;  %v1853_v13 = vsel %vm1851_vm12, %v1529_v12, %v1543_v11  ;;  %vm1696_vm14 = vcmp.lt.s32.totalorder %v1695_v48, 2  ;;  %3732 = vmatpush.bf16.msrb.mxu0 %v5825_v28  ;;  %v6134_v12 = vld [vmem:[%s10275_s9 + $0x78] sm:$0xf0]  ;;  %v6116_v41 = vld [vmem:[%s10275_s9 + $0x50] sm:$0xf] }
 0x1d3   : > { %v1548_v15 = vsel %vm1541_vm13, %v1544_v23, %v1547_v49  ;;  %v1857_v25 = vsel %vm1850_vm2, %v1853_v13, %v1856_v34  ;;  %v5905_v31 = vor.u32 %v6940_v58, %v5902_v53  ;;  %vm1697_vm11 = vcmp.eq.s32.totalorder %v1695_v48, 0  ;;  %v6994_v43 = vld [vmem:[%s10275_s9 + $0x54] sm:$0xf]  ;;  %v6118_v61 = vld [vmem:[%s10275_s9 + $0x58] sm:$0xf0] }
 0x1d4   : > { %v1692_v59 = vmul.f32 %v1691_v38, %v8646_v20  ;;  %v1549_v60 = vsel %vm1538_vm3, nan, %v1548_v15  ;;  %v1858_v35 = vsel %vm1538_vm3, nan, %v1857_v25  ;;  %v5894_v20 = vld [vmem:[%s10332_s8 + $0x98] sm:$0xf0]  ;;  %vm1700_vm1 = vcmp.eq.s32.totalorder %v1695_v48, 2 }
 0x1d5   : > { %vm2004_vm6 = vcmp.lt.s32.totalorder %v2003_v47, 2  ;;  %vm2005_vm15 = vcmp.eq.s32.totalorder %v2003_v47, 0  ;;  %vm2008_vm7 = vcmp.eq.s32.totalorder %v2003_v47, 2  ;;  %3760 = vmatpush.bf16.msrb.mxu2 %v5953_v57  ;;  %3733 = vmatmul.bf16.vlgmr.msrb.gmra.mxu0 %v8756_v21  ;;  %v2013_v27 = vsel %vm8410_vm5, %v1549_v60, %v1858_v35  ;;  %v6936_v21 = vld [vmem:[%s10332_s8 + $0x84] sm:$0xf] }
 0x1d6   : > { %v1698_v30 = vxor.u32 2147483648, %v1692_v59  ;;  %v1702_v4 = vsel %vm1700_vm1, %v1701_v56, %v1692_v59  ;;  %v2010_v36 = vsel %vm2008_vm7, %v1701_v56, %v1692_v59  ;;  %3744 = vmatpush.bf16.msrb.mxu1 %v5905_v31  ;;  %v5897_v22 = vor.u32 %v6938_v29, %v5894_v20  ;;  %v6108_v10 = vld [vmem:[%s10275_s9 + $0x40] sm:$0xf]  ;;  %v6993_v48 = vld [vmem:[%s10275_s9 + $0x44] sm:$0xf0] }
 0x1d7   : > { %v5889_v26 = vor.u32 %v6936_v21, %v5886_v18  ;;  %v6137_v37 = vor.u32 %v6998_v3, %v6134_v12  ;;  %v6125_v42 = vor.u32 %v6997_v46, %v6124_v0  ;;  %v6129_v19 = vor.u32 %v6996_v39, %v6126_v44  ;;  %v6992_v47 = vld [vmem:[%s10275_s9 + $0x44] sm:$0xf]  ;;  %v6110_v11 = vld [vmem:[%s10275_s9 + $0x48] sm:$0xf0]  ;;  %v6991_v7 = vld [vmem:[%s10275_s9 + $0x34] sm:$0xf0] }
 0x1d8   : > { %v1699_v62 = vsel %vm1697_vm11, %v1684_v8, %v1698_v30  ;;  %v2007_v24 = vsel %vm2005_vm15, %v1684_v8, %v1698_v30  ;;  %v6117_v40 = vor.u32 %v6995_v33, %v6116_v41  ;;  %v6121_v63 = vor.u32 %v6994_v43, %v6118_v61  ;;  %v6100_v8 = vld [vmem:[%s10275_s9 + $0x30] sm:$0xf]  ;;  %v7015_v55 = vld [vmem:[%s10275_s9 + $0xf4] sm:$0xf0]  ;;  %v6990_v1 = vld [vmem:[%s10275_s9 + $0x34] sm:$0xf] }
 0x1d9   : > { %v1703_v32 = vsel %vm1696_vm14, %v1699_v62, %v1702_v4  ;;  %v2011_v14 = vsel %vm2004_vm6, %v2007_v24, %v2010_v36  ;;  %4013 = vmatpush.bf16.msra.mxu2 %v6137_v37  ;;  %v6109_v2 = vor.u32 %v6993_v48, %v6108_v10  ;;  %v6113_v54 = vor.u32 %v6992_v47, %v6110_v11  ;;  %v6196_v49 = vld [vmem:[%s10275_s9 + $0xf0] sm:$0xf]  ;;  %v6102_v38 = vld [vmem:[%s10275_s9 + $0x38] sm:$0xf0]  ;;  %v7014_v13 = vld [vmem:[%s10275_s9 + $0xf4] sm:$0xf] }
 0x1da   : > { %v1704_v5 = vsel %vm1693_vm10, nan, %v1703_v32  ;;  %v2012_v52 = vsel %vm1693_vm10, nan, %v2011_v14  ;;  %3761 = vmatmul.bf16.vlgmr.msrb.gmra.mxu2 %v8873_v9  ;;  %3745 = vmatpush.bf16.msrb.mxu1 %v5897_v22  ;;  %v6999_v9 = vld [vmem:[%s10275_s9 + $0x74] sm:$0xf0]  ;;  %v6101_v50 = vor.u32 %v6991_v7, %v6100_v8  ;;  %v6197_v23 = vor.u32 %v7015_v55, %v6196_v49  ;;  %v6198_v34 = vld [vmem:[%s10275_s9 + $0xf8] sm:$0xf0] }
 0x1db   : > { %v2014_v6 = vsel %vm8410_vm5, %v1704_v5, %v2012_v52  ;;  %v6133_v16 = vor.u32 %v6999_v9, %v6132_v45  ;;  %v6105_v58 = vor.u32 %v6990_v1, %v6102_v38  ;;  %v6201_v53 = vor.u32 %v7014_v13, %v6198_v34  ;;  %v6092_v15 = vld [vmem:[%s10275_s9 + $0x20] sm:$0xf]  ;;  %v6989_v25 = vld [vmem:[%s10275_s9 + $0x24] sm:$0xf0]  ;;  %v6988_v56 = vld [vmem:[%s10275_s9 + $0x24] sm:$0xf] }
 0x1dc   : > { %v3276_v17 = vpack.c.bf16 %v2014_v6, %v2013_v27  ;;  %v6188_v51 = vld [vmem:[%s10275_s9 + $0xe0] sm:$0xf]  ;;  %v6093_v28 = vor.u32 %v6989_v25, %v6092_v15  ;;  %v7013_v59 = vld [vmem:[%s10275_s9 + $0xe4] sm:$0xf0]  ;;  %v6094_v57 = vld [vmem:[%s10275_s9 + $0x28] sm:$0xf0] }
 0x1dd   : > { %3985 = vmatpush.bf16.msra.mxu0 %v6133_v16  ;;  %4014 = vmatpush.bf16.msra.mxu2 %v6129_v19  ;;  %v6189_v31 = vor.u32 %v7013_v59, %v6188_v51  ;;  %v6097_v29 = vor.u32 %v6988_v56, %v6094_v57  ;;  %v7012_v60 = vld [vmem:[%s10275_s9 + $0xe4] sm:$0xf]  ;;  %v6190_v30 = vld [vmem:[%s10275_s9 + $0xe8] sm:$0xf0]  ;;  %v6084_v35 = vld [vmem:[%s10275_s9 + $0x10] sm:$0xf] }
 0x1de   : > { %3691 = vmatmul.bf16.vlgmr.msra.gmra.mxu1 %v3276_v17  ;;  %4027 = vmatpush.bf16.msra.mxu3 %v6201_v53  ;;  %v6193_v20 = vor.u32 %v7012_v60, %v6190_v30  ;;  %v6987_v62 = vld [vmem:[%s10275_s9 + $0x14] sm:$0xf0]  ;;  %v6180_v4 = vld [vmem:[%s10275_s9 + $0xd0] sm:$0xf]  ;;  %v6986_v14 = vld [vmem:[%s10275_s9 + $0x14] sm:$0xf] }
 0x1df   : > { %3746 = vmatpush.bf16.msrb.mxu1 %v5889_v26  ;;  %v7011_v24 = vld [vmem:[%s10275_s9 + $0xd4] sm:$0xf0]  ;;  %v6085_v36 = vor.u32 %v6987_v62, %v6084_v35  ;;  %v6086_v27 = vld [vmem:[%s10275_s9 + $0x18] sm:$0xf0]  ;;  %v7010_v22 = vld [vmem:[%s10275_s9 + $0xd4] sm:$0xf] }
 0x1e0   : > { %v6181_v32 = vor.u32 %v7011_v24, %v6180_v4  ;;  %v6089_v52 = vor.u32 %v6986_v14, %v6086_v27  ;;  %v6182_v21 = vld [vmem:[%s10275_s9 + $0xd8] sm:$0xf0]  ;;  %v6076_v6 = vld [vmem:[%s10275_s9] sm:$0xf]  ;;  %v7009_v9 = vld [vmem:[%s10275_s9 + $0xc4] sm:$0xf0] }
 0x1e1   : > { %3986 = vmatpush.bf16.msra.mxu0 %v6125_v42  ;;  %4015 = vmatpush.bf16.msra.mxu2 %v6121_v63  ;;  %v6185_v18 = vor.u32 %v7010_v22, %v6182_v21  ;;  %v6172_v26 = vld [vmem:[%s10275_s9 + $0xc0] sm:$0xf]  ;;  %v6984_v3 = vld [vmem:[%s10275_s9 + $0x4] sm:$0xf]  ;;  %v6078_v16 = vld [vmem:[%s10275_s9 + $0x8] sm:$0xf0] }
 0x1e2   : > { %4028 = vmatpush.bf16.msra.mxu3 %v6193_v20  ;;  %v6173_v12 = vor.u32 %v7009_v9, %v6172_v26  ;;  %v6081_v37 = vor.u32 %v6984_v3, %v6078_v16  ;;  %v7008_v0 = vld [vmem:[%s10275_s9 + $0xc4] sm:$0xf]  ;;  %v6174_v46 = vld [vmem:[%s10275_s9 + $0xc8] sm:$0xf0]  ;;  %v9095_v39 = vld [vmem:[%s10371_s28] sm:$0x3] }
 0x1e3   : > { %3999 = vmatpush.bf16.msra.mxu1 %v6197_v23  ;;  %v6177_v42 = vor.u32 %v7008_v0, %v6174_v46  ;;  %v6164_v44 = vld [vmem:[%s10275_s9 + $0xb0] sm:$0xf]  ;;  %v7007_v41 = vld [vmem:[%s10275_s9 + $0xb4] sm:$0xf0]  ;;  %v7006_v33 = vld [vmem:[%s10275_s9 + $0xb4] sm:$0xf] }
 0x1e4   : > { %v6166_v19 = vld [vmem:[%s10275_s9 + $0xb8] sm:$0xf0]  ;;  %v3345_v61 = vperm.slane %v9095_v39, 0  ;;  %v6156_v11 = vld [vmem:[%s10275_s9 + $0xa0] sm:$0xf]  ;;  %v3346_v4 = vperm.slane %v9095_v39, 1 }
 0x1e5   : > { %3987 = vmatpush.bf16.msra.mxu0 %v6117_v40  ;;  %4016 = vmatpush.bf16.msra.mxu2 %v6113_v54  ;;  %v6165_v40 = vor.u32 %v7007_v41, %v6164_v44  ;;  %v6169_v10 = vor.u32 %v7006_v33, %v6166_v19  ;;  %v7005_v8 = vld [vmem:[%s10275_s9 + $0xa4] sm:$0xf0]  ;;  %v7004_v7 = vld [vmem:[%s10275_s9 + $0xa4] sm:$0xf]  ;;  %v6158_v49 = vld [vmem:[%s10275_s9 + $0xa8] sm:$0xf0] }
 0x1e6   : > { %4029 = vmatpush.bf16.msra.mxu3 %v6185_v18  ;;  %v6157_v54 = vor.u32 %v7005_v8, %v6156_v11  ;;  %v6148_v55 = vld [vmem:[%s10275_s9 + $0x90] sm:$0xf]  ;;  %v7003_v1 = vld [vmem:[%s10275_s9 + $0x94] sm:$0xf0]  ;;  %v6161_v23 = vor.u32 %v7004_v7, %v6158_v49  ;;  %v7002_v38 = vld [vmem:[%s10275_s9 + $0x94] sm:$0xf] }
 0x1e7   : > { %4000 = vmatpush.bf16.msra.mxu1 %v6189_v31  ;;  %v6150_v13 = vld [vmem:[%s10275_s9 + $0x98] sm:$0xf0]  ;;  %v6149_v34 = vor.u32 %v7003_v1, %v6148_v55  ;;  %v6140_v15 = vld [vmem:[%s10275_s9 + $0x80] sm:$0xf]  ;;  %v7001_v25 = vld [vmem:[%s10275_s9 + $0x84] sm:$0xf0] }
 0x1e8   : > { %v6153_v53 = vor.u32 %v7002_v38, %v6150_v13  ;;  %v7000_v59 = vld [vmem:[%s10275_s9 + $0x84] sm:$0xf]  ;;  %v6142_v56 = vld [vmem:[%s10275_s9 + $0x88] sm:$0xf0]  ;;  %v6141_v60 = vor.u32 %v7001_v25, %v6140_v15 }
 0x1e9   : > { %3988 = vmatpush.bf16.msra.mxu0 %v6109_v2  ;;  %4017 = vmatpush.bf16.msra.mxu2 %v6105_v58  ;;  %v6145_v35 = vor.u32 %v7000_v59, %v6142_v56 }
 0x1ea   : > { %4030 = vmatpush.bf16.msra.mxu3 %v6177_v42  ;;  %v3819_v42 = vld [vmem:[%s10276_s10] sm:$0x3] }
 0x1eb   : > { %4001 = vmatpush.bf16.msra.mxu1 %v6181_v32  ;;  %v3821_v41 = vperm.slane %v3819_v42, 0 }
 0x1ed   : > { %3989 = vmatpush.bf16.msra.mxu0 %v6101_v50  ;;  %4018 = vmatpush.bf16.msra.mxu2 %v6097_v29 }
 0x1ee   : > { %3747 = vmatmul.bf16.vlgmr.msrb.gmra.mxu1 %v3276_v17  ;;  %v6985_v17 = vld [vmem:[%s10275_s9 + $0x4] sm:$0xf0]  ;;  %4031 = vmatpush.bf16.msra.mxu3 %v6169_v10 }
 0x1ef   : > { %v6077_v45 = vor.u32 %v6985_v17, %v6076_v6  ;;  %4002 = vmatpush.bf16.msra.mxu1 %v6173_v12 }
 0x1f1   : > { %3990 = vmatpush.bf16.msra.mxu0 %v6093_v28  ;;  %4019 = vmatpush.bf16.msra.mxu2 %v6089_v52 }
 0x1f2   : > { %4032 = vmatpush.bf16.msra.mxu3 %v6161_v23 }
 0x1f3   : > { %4003 = vmatpush.bf16.msra.mxu1 %v6165_v40 }
 0x1f5   : > { %3991 = vmatpush.bf16.msra.mxu0 %v6085_v36  ;;  %4020 = vmatpush.bf16.msra.mxu2 %v6081_v37 }
 0x1f6   : > { %4033 = vmatpush.bf16.msra.mxu3 %v6153_v53 }
 0x1f7   : > { %4004 = vmatpush.bf16.msra.mxu1 %v6157_v54 }
 0x1f9   : > { %3992 = vmatpush.bf16.msra.mxu0 %v6077_v45 }
 0x1fa   : > { %4034 = vmatpush.bf16.msra.mxu3 %v6145_v35 }
 0x1fb   : > { %4005 = vmatpush.bf16.msra.mxu1 %v6149_v34 }
 0x1ff   : > { %4006 = vmatpush.bf16.msra.mxu1 %v6141_v60 }
 0x21b   : > { %v3720_v63 = vpop.f32.mrf.mxu3 }
 0x223   : > { %v3722_v57 = vpop.f32.mrf.mxu3 }
 0x22b   : > { %v3776_v52 = vpop.f32.mrf.mxu3 }
 0x232   : > { %v3678_v5 = vpop.f32.mrf.mxu0 }
 0x233   : > { %v3679_v2 = vadd.f32 %v3678_v5, %v3345_v61  ;;  %v3778_v12 = vpop.f32.mrf.mxu3 }
 0x23a   : > { %v3680_v48 = vpop.f32.mrf.mxu0 }
 0x23b   : > { %v3681_v51 = vadd.f32 %v3680_v48, %v3345_v61  ;;  %v3822_v61 = vperm.slane %v3819_v42, 1 }
 0x24d   : > { %v3706_v43 = vpop.f32.mrf.mxu2 }
 0x252   : > { %v3734_v30 = vpop.f32.mrf.mxu0 }
 0x253   : > { %v3735_v22 = vadd.f32 %v3734_v30, %v3346_v4 }
 0x255   : > { %v3708_v58 = vpop.f32.mrf.mxu2 }
 0x25a   : > { %v3736_v18 = vpop.f32.mrf.mxu0 }
 0x25b   : > { %v3692_v47 = vpop.f32.mrf.mxu1  ;;  %v3737_v6 = vadd.f32 %v3736_v18, %v3346_v4 }
 0x25c   : > { %v3693_v50 = vadd.f32 %v3692_v47, %v3679_v2 }
 0x25d   : > { %v3762_v14 = vpop.f32.mrf.mxu2 }
 0x25e   : > { %v3707_v28 = vadd.f32 %v3706_v43, %v3693_v50 }
 0x260   : > { %v3721_v20 = vadd.f32 %v3720_v63, %v3707_v28 }
 0x262   : > { %v3781_v36 = vmax.f32 %v3721_v20, 0.0 }
 0x263   : > { %v3694_v31 = vpop.f32.mrf.mxu1 }
 0x264   : > { %v3695_v29 = vadd.f32 %v3694_v31, %v3681_v51 }
 0x265   : > { %v3764_v9 = vpop.f32.mrf.mxu2 }
 0x266   : > { %v3709_v62 = vadd.f32 %v3708_v58, %v3695_v29 }
 0x268   : > { %v3723_v24 = vadd.f32 %v3722_v57, %v3709_v62 }
 0x26a   : > { %v3783_v32 = vmax.f32 %v3723_v24, 0.0 }
 0x26b   : > { %v3748_v27 = vpop.f32.mrf.mxu1 }
 0x26c   : > { %v3785_v5 = vpack.c.bf16 %v3783_v32, %v3781_v36  ;;  %v3749_v21 = vadd.f32 %v3748_v27, %v3735_v22 }
 0x26e   : > { %3993 = vmatmul.bf16.vlgmr.msra.gmra.mxu0 %v3785_v5  ;;  %4021 = vmatmul.bf16.vlgmr.msra.gmra.mxu2 %v3785_v5  ;;  %v3763_v17 = vadd.f32 %v3762_v14, %v3749_v21 }
 0x270   : > { %v3777_v3 = vadd.f32 %v3776_v52, %v3763_v17 }
 0x272   : > { %v3782_v0 = vmax.f32 %v3777_v3, 0.0 }
 0x273   : > { %v3750_v26 = vpop.f32.mrf.mxu1 }
 0x274   : > { %v3751_v45 = vadd.f32 %v3750_v26, %v3737_v6 }
 0x276   : > { %v3765_v16 = vadd.f32 %v3764_v9, %v3751_v45 }
 0x278   : > { %v3779_v37 = vadd.f32 %v3778_v12, %v3765_v16 }
 0x27a   : > { %v3784_v46 = vmax.f32 %v3779_v37, 0.0 }
 0x27c   : > { %v3786_v39 = vpack.c.bf16 %v3784_v46, %v3782_v0 }
 0x27e   : > { %4007 = vmatmul.bf16.vlgmr.msra.gmra.mxu1 %v3786_v39  ;;  %4035 = vmatmul.bf16.vlgmr.msra.gmra.mxu3 %v3786_v39 }
 0x2eb   : > { %v3994_v44 = vpop.f32.mrf.mxu0 }
 0x2ec   : > { %v3995_v33 = vadd.f32 %v3994_v44, %v3821_v41 }
 0x2f1   : > { %v4022_v19 = vpop.f32.mrf.mxu2 }
 0x2f2   : > { %v4023_v10 = vadd.f32 %v4022_v19, %v3822_v61 }
 0x2f3   : > { %v3996_v63 = vpop.f32.mrf.mxu0 }
 0x2f4   : > { %v3997_v47 = vadd.f32 %v3996_v63, %v3821_v41 }
 0x2f9   : > { %v4024_v7 = vpop.f32.mrf.mxu2 }
 0x2fa   : > { %v4025_v54 = vadd.f32 %v4024_v7, %v3822_v61 }
 0x2fb   : > { %v4008_v43 = vpop.f32.mrf.mxu1 }
 0x2fc   : > { %v4009_v40 = vadd.f32 %v4008_v43, %v3995_v33 }
 0x2fe   : > { %4041 = vst [vmem:[#allocation2 + $0x10] sm:$0xff] %v4009_v40 }
 0x301   : > { %v4036_v48 = vpop.f32.mrf.mxu3 }
 0x302   : > { %v4037_v2 = vadd.f32 %v4036_v48, %v4023_v10 }
 0x303   : > { %v4010_v11 = vpop.f32.mrf.mxu1 }
 0x304   : > { %4042 = vst [vmem:[#allocation2] sm:$0xff] %v4037_v2  ;;  %v4011_v8 = vadd.f32 %v4010_v11, %v3997_v47 }
 0x306   : > { %4043 = vst [vmem:[#allocation2 + $0x18] sm:$0xff] %v4011_v8 }
 0x309   : > { %v4038_v49 = vpop.f32.mrf.mxu3 }
 0x30a   : > { %v4039_v55 = vadd.f32 %v4038_v49, %v4025_v54 }
 0x30c   : > { %4044 = vst [vmem:[#allocation2 + $0x8] sm:$0xff] %v4039_v55 }
 0x30d PF: > { %v6260_v1 = vld [vmem:[%s10277_s11 + $0x70] sm:$0xf]  ;;  %v7031_v50 = vld [vmem:[%s10277_s11 + $0x74] sm:$0xf0]  ;;  %v7030_v34 = vld [vmem:[%s10277_s11 + $0x74] sm:$0xf] }
 0x30e   : > { %v6324_v23 = vld [vmem:[%s10277_s11 + $0xf0] sm:$0xf]  ;;  %v6261_v38 = vor.u32 %v7031_v50, %v6260_v1  ;;  %v7047_v13 = vld [vmem:[%s10277_s11 + $0xf4] sm:$0xf0]  ;;  %v6262_v58 = vld [vmem:[%s10277_s11 + $0x78] sm:$0xf0] }
 0x30f   : > { %v6325_v53 = vor.u32 %v7047_v13, %v6324_v23  ;;  %v6265_v15 = vor.u32 %v7030_v34, %v6262_v58  ;;  %v7046_v25 = vld [vmem:[%s10277_s11 + $0xf4] sm:$0xf]  ;;  %v6326_v51 = vld [vmem:[%s10277_s11 + $0xf8] sm:$0xf0]  ;;  %v6252_v28 = vld [vmem:[%s10277_s11 + $0x60] sm:$0xf] }
 0x310   : > { %4253 = vmatpush.bf16.msra.mxu0 %v6261_v38  ;;  %v6329_v59 = vor.u32 %v7046_v25, %v6326_v51  ;;  %v7029_v56 = vld [vmem:[%s10277_s11 + $0x64] sm:$0xf0]  ;;  %v6316_v57 = vld [vmem:[%s10277_s11 + $0xe0] sm:$0xf]  ;;  %v7028_v30 = vld [vmem:[%s10277_s11 + $0x64] sm:$0xf] }
 0x311   : > { %v7045_v31 = vld [vmem:[%s10277_s11 + $0xe4] sm:$0xf0]  ;;  %4267 = vmatpush.bf16.msra.mxu1 %v6325_v53  ;;  %4281 = vmatpush.bf16.msra.mxu2 %v6265_v15  ;;  %v6253_v29 = vor.u32 %v7029_v56, %v6252_v28  ;;  %v6254_v35 = vld [vmem:[%s10277_s11 + $0x68] sm:$0xf0]  ;;  %v7044_v20 = vld [vmem:[%s10277_s11 + $0xe4] sm:$0xf] }
 0x312   : > { %v6317_v60 = vor.u32 %v7045_v31, %v6316_v57  ;;  %4295 = vmatpush.bf16.msra.mxu3 %v6329_v59  ;;  %v6257_v62 = vor.u32 %v7028_v30, %v6254_v35  ;;  %v6318_v4 = vld [vmem:[%s10277_s11 + $0xe8] sm:$0xf0]  ;;  %v6244_v24 = vld [vmem:[%s10277_s11 + $0x50] sm:$0xf]  ;;  %v7027_v36 = vld [vmem:[%s10277_s11 + $0x54] sm:$0xf0] }
 0x313   : > { %v6321_v32 = vor.u32 %v7044_v20, %v6318_v4  ;;  %v6308_v14 = vld [vmem:[%s10277_s11 + $0xd0] sm:$0xf]  ;;  %v7043_v27 = vld [vmem:[%s10277_s11 + $0xd4] sm:$0xf0]  ;;  %v7026_v22 = vld [vmem:[%s10277_s11 + $0x54] sm:$0xf]  ;;  %v6245_v5 = vor.u32 %v7027_v36, %v6244_v24 }
 0x314   : > { %4254 = vmatpush.bf16.msra.mxu0 %v6253_v29  ;;  %v6246_v52 = vld [vmem:[%s10277_s11 + $0x58] sm:$0xf0]  ;;  %v7042_v21 = vld [vmem:[%s10277_s11 + $0xd4] sm:$0xf]  ;;  %v6309_v6 = vor.u32 %v7043_v27, %v6308_v14  ;;  %v6236_v26 = vld [vmem:[%s10277_s11 + $0x40] sm:$0xf] }
 0x315   : > { %v6310_v18 = vld [vmem:[%s10277_s11 + $0xd8] sm:$0xf0]  ;;  %4268 = vmatpush.bf16.msra.mxu1 %v6317_v60  ;;  %4282 = vmatpush.bf16.msra.mxu2 %v6257_v62  ;;  %v6249_v17 = vor.u32 %v7026_v22, %v6246_v52  ;;  %v7025_v45 = vld [vmem:[%s10277_s11 + $0x44] sm:$0xf0]  ;;  %v6300_v9 = vld [vmem:[%s10277_s11 + $0xc0] sm:$0xf] }
 0x316   : > { %4296 = vmatpush.bf16.msra.mxu3 %v6321_v32  ;;  %v6313_v3 = vor.u32 %v7042_v21, %v6310_v18  ;;  %v7041_v16 = vld [vmem:[%s10277_s11 + $0xc4] sm:$0xf0]  ;;  %v7024_v12 = vld [vmem:[%s10277_s11 + $0x44] sm:$0xf]  ;;  %v6238_v37 = vld [vmem:[%s10277_s11 + $0x48] sm:$0xf0]  ;;  %v6237_v39 = vor.u32 %v7025_v45, %v6236_v26 }
 0x317   : > { %v7040_v0 = vld [vmem:[%s10277_s11 + $0xc4] sm:$0xf]  ;;  %v6302_v46 = vld [vmem:[%s10277_s11 + $0xc8] sm:$0xf0]  ;;  %v6301_v42 = vor.u32 %v7041_v16, %v6300_v9  ;;  %v6241_v44 = vor.u32 %v7024_v12, %v6238_v37  ;;  %v6228_v41 = vld [vmem:[%s10277_s11 + $0x30] sm:$0xf] }
 0x318   : > { %4255 = vmatpush.bf16.msra.mxu0 %v6245_v5  ;;  %v7023_v33 = vld [vmem:[%s10277_s11 + $0x34] sm:$0xf0]  ;;  %v6292_v19 = vld [vmem:[%s10277_s11 + $0xb0] sm:$0xf]  ;;  %v6305_v43 = vor.u32 %v7040_v0, %v6302_v46  ;;  %v7022_v40 = vld [vmem:[%s10277_s11 + $0x34] sm:$0xf] }
 0x319   : > { %4269 = vmatpush.bf16.msra.mxu1 %v6309_v6  ;;  %4283 = vmatpush.bf16.msra.mxu2 %v6249_v17  ;;  %v7039_v61 = vld [vmem:[%s10277_s11 + $0xb4] sm:$0xf0]  ;;  %v6230_v63 = vld [vmem:[%s10277_s11 + $0x38] sm:$0xf0]  ;;  %v7038_v10 = vld [vmem:[%s10277_s11 + $0xb4] sm:$0xf]  ;;  %v6229_v47 = vor.u32 %v7023_v33, %v6228_v41 }
 0x31a   : > { %4297 = vmatpush.bf16.msra.mxu3 %v6313_v3  ;;  %v6294_v48 = vld [vmem:[%s10277_s11 + $0xb8] sm:$0xf0]  ;;  %v6293_v2 = vor.u32 %v7039_v61, %v6292_v19  ;;  %v6233_v11 = vor.u32 %v7022_v40, %v6230_v63  ;;  %v6220_v8 = vld [vmem:[%s10277_s11 + $0x20] sm:$0xf]  ;;  %v7021_v7 = vld [vmem:[%s10277_s11 + $0x24] sm:$0xf0] }
 0x31b   : > { %v6284_v54 = vld [vmem:[%s10277_s11 + $0xa0] sm:$0xf]  ;;  %v6297_v49 = vor.u32 %v7038_v10, %v6294_v48  ;;  %v7037_v55 = vld [vmem:[%s10277_s11 + $0xa4] sm:$0xf0]  ;;  %v7020_v1 = vld [vmem:[%s10277_s11 + $0x24] sm:$0xf]  ;;  %v6221_v13 = vor.u32 %v7021_v7, %v6220_v8 }
 0x31c   : > { %4256 = vmatpush.bf16.msra.mxu0 %v6237_v39  ;;  %v6222_v50 = vld [vmem:[%s10277_s11 + $0x28] sm:$0xf0]  ;;  %v7036_v23 = vld [vmem:[%s10277_s11 + $0xa4] sm:$0xf]  ;;  %v6212_v34 = vld [vmem:[%s10277_s11 + $0x10] sm:$0xf]  ;;  %v6285_v58 = vor.u32 %v7037_v55, %v6284_v54 }
 0x31d   : > { %4270 = vmatpush.bf16.msra.mxu1 %v6301_v42  ;;  %4284 = vmatpush.bf16.msra.mxu2 %v6241_v44  ;;  %v6286_v38 = vld [vmem:[%s10277_s11 + $0xa8] sm:$0xf0]  ;;  %v6225_v53 = vor.u32 %v7020_v1, %v6222_v50  ;;  %v7019_v15 = vld [vmem:[%s10277_s11 + $0x14] sm:$0xf0]  ;;  %v6276_v25 = vld [vmem:[%s10277_s11 + $0x90] sm:$0xf] }
 0x31e   : > { %4298 = vmatpush.bf16.msra.mxu3 %v6305_v43  ;;  %v7035_v51 = vld [vmem:[%s10277_s11 + $0x94] sm:$0xf0]  ;;  %v6289_v28 = vor.u32 %v7036_v23, %v6286_v38  ;;  %v7018_v59 = vld [vmem:[%s10277_s11 + $0x14] sm:$0xf]  ;;  %v6214_v56 = vld [vmem:[%s10277_s11 + $0x18] sm:$0xf0]  ;;  %v6213_v29 = vor.u32 %v7019_v15, %v6212_v34 }
 0x31f   : > { %v7034_v57 = vld [vmem:[%s10277_s11 + $0x94] sm:$0xf]  ;;  %v6278_v31 = vld [vmem:[%s10277_s11 + $0x98] sm:$0xf0]  ;;  %v6204_v60 = vld [vmem:[%s10277_s11] sm:$0xf]  ;;  %v6277_v35 = vor.u32 %v7035_v51, %v6276_v25  ;;  %v6217_v20 = vor.u32 %v7018_v59, %v6214_v56 }
 0x320   : > { %4257 = vmatpush.bf16.msra.mxu0 %v6229_v47  ;;  %v7017_v30 = vld [vmem:[%s10277_s11 + $0x4] sm:$0xf0]  ;;  %v6268_v62 = vld [vmem:[%s10277_s11 + $0x80] sm:$0xf]  ;;  %v7016_v24 = vld [vmem:[%s10277_s11 + $0x4] sm:$0xf]  ;;  %v6281_v36 = vor.u32 %v7034_v57, %v6278_v31 }
 0x321   : > { %4271 = vmatpush.bf16.msra.mxu1 %v6293_v2  ;;  %4285 = vmatpush.bf16.msra.mxu2 %v6233_v11  ;;  %v7033_v4 = vld [vmem:[%s10277_s11 + $0x84] sm:$0xf0]  ;;  %v6206_v32 = vld [vmem:[%s10277_s11 + $0x8] sm:$0xf0]  ;;  %v7032_v14 = vld [vmem:[%s10277_s11 + $0x84] sm:$0xf]  ;;  %v6205_v21 = vor.u32 %v7017_v30, %v6204_v60 }
 0x322   : > { %4299 = vmatpush.bf16.msra.mxu3 %v6297_v49  ;;  %v6270_v27 = vld [vmem:[%s10277_s11 + $0x88] sm:$0xf0]  ;;  %v6388_v5 = vld [vmem:[%s10279_s13 + $0x70] sm:$0xf]  ;;  %v7063_v52 = vld [vmem:[%s10279_s13 + $0x74] sm:$0xf0]  ;;  %v6269_v26 = vor.u32 %v7033_v4, %v6268_v62  ;;  %v6209_v45 = vor.u32 %v7016_v24, %v6206_v32 }
 0x323   : > { %v9342_v22 = vld [vmem:[#allocation3] sm:$0xff]  ;;  %v9350_v18 = vld [vmem:[#allocation3 + $0x10] sm:$0xff]  ;;  %v7062_v6 = vld [vmem:[%s10279_s13 + $0x74] sm:$0xf]  ;;  %v6273_v16 = vor.u32 %v7032_v14, %v6270_v27  ;;  %v6389_v12 = vor.u32 %v7063_v52, %v6388_v5  ;;  %s4569_s4 = scalar_select %p702_p3, 1.0, 0.0 }
 0x324   : > { %4258 = vmatpush.bf16.msra.mxu0 %v6221_v13  ;;  %v6390_v17 = vld [vmem:[%s10279_s13 + $0x78] sm:$0xf0]  ;;  %v9358_v9 = vld [vmem:[#allocation3 + $0x8] sm:$0xff]  ;;  %v9360_v3 = vld [vmem:[#allocation3 + $0x18] sm:$0xff]  ;;  %v4053_v39 = vpack.c.bf16 %v9350_v18, %v9342_v22  ;;  %vm4751_vm5 = vcmask 785920   ;;  %s10372_s0 = sld [smem:[#allocation10_spill]] }
 0x325   : > { %4272 = vmatpush.bf16.msra.mxu1 %v6285_v58  ;;  %4286 = vmatpush.bf16.msra.mxu2 %v6225_v53  ;;  %v6380_v37 = vld [vmem:[%s10279_s13 + $0x60] sm:$0xf]  ;;  %v6452_v0 = vld [vmem:[%s10279_s13 + $0xf0] sm:$0xf]  ;;  %v7079_v46 = vld [vmem:[%s10279_s13 + $0xf4] sm:$0xf0]  ;;  %v6393_v42 = vor.u32 %v7062_v6, %v6390_v17  ;;  %v4054_v19 = vpack.c.bf16 %v9360_v3, %v9358_v9 }
 0x326   : > { %4300 = vmatpush.bf16.msra.mxu3 %v6289_v28  ;;  %v7061_v44 = vld [vmem:[%s10279_s13 + $0x64] sm:$0xf0]  ;;  %v7078_v41 = vld [vmem:[%s10279_s13 + $0xf4] sm:$0xf]  ;;  %v6454_v33 = vld [vmem:[%s10279_s13 + $0xf8] sm:$0xf0]  ;;  %v6453_v40 = vor.u32 %v7079_v46, %v6452_v0 }
 0x327   : > { %v7060_v43 = vld [vmem:[%s10279_s13 + $0x64] sm:$0xf]  ;;  %v6382_v61 = vld [vmem:[%s10279_s13 + $0x68] sm:$0xf0]  ;;  %v6381_v63 = vor.u32 %v7061_v44, %v6380_v37  ;;  %v6457_v10 = vor.u32 %v7078_v41, %v6454_v33  ;;  %v6372_v48 = vld [vmem:[%s10279_s13 + $0x50] sm:$0xf] }
 0x328   : > { %4259 = vmatpush.bf16.msra.mxu0 %v6213_v29  ;;  %v6444_v47 = vld [vmem:[%s10279_s13 + $0xe0] sm:$0xf]  ;;  %v7077_v2 = vld [vmem:[%s10279_s13 + $0xe4] sm:$0xf0]  ;;  %v6385_v11 = vor.u32 %v7060_v43, %v6382_v61  ;;  %v7059_v8 = vld [vmem:[%s10279_s13 + $0x54] sm:$0xf0] }
 0x329   : > { %4273 = vmatpush.bf16.msra.mxu1 %v6277_v35  ;;  %4287 = vmatpush.bf16.msra.mxu2 %v6217_v20  ;;  %v7076_v7 = vld [vmem:[%s10279_s13 + $0xe4] sm:$0xf]  ;;  %v6446_v54 = vld [vmem:[%s10279_s13 + $0xe8] sm:$0xf0]  ;;  %v7058_v49 = vld [vmem:[%s10279_s13 + $0x54] sm:$0xf]  ;;  %v6445_v1 = vor.u32 %v7077_v2, %v6444_v47  ;;  %v6373_v50 = vor.u32 %v7059_v8, %v6372_v48 }
 0x32a   : > { %4301 = vmatpush.bf16.msra.mxu3 %v6281_v36  ;;  %v6374_v55 = vld [vmem:[%s10279_s13 + $0x58] sm:$0xf0]  ;;  %v6449_v23 = vor.u32 %v7076_v7, %v6446_v54  ;;  %v6364_v13 = vld [vmem:[%s10279_s13 + $0x40] sm:$0xf]  ;;  %v7057_v34 = vld [vmem:[%s10279_s13 + $0x44] sm:$0xf0] }
 0x32b   : > { %v6377_v38 = vor.u32 %v7058_v49, %v6374_v55  ;;  %v7056_v58 = vld [vmem:[%s10279_s13 + $0x44] sm:$0xf]  ;;  %v6366_v53 = vld [vmem:[%s10279_s13 + $0x48] sm:$0xf0]  ;;  %v6365_v15 = vor.u32 %v7057_v34, %v6364_v13  ;;  %v6436_v51 = vld [vmem:[%s10279_s13 + $0xd0] sm:$0xf] }
 0x32c   : > { %4260 = vmatpush.bf16.msra.mxu0 %v6205_v21  ;;  %v6369_v25 = vor.u32 %v7056_v58, %v6366_v53  ;;  %v7075_v28 = vld [vmem:[%s10279_s13 + $0xd4] sm:$0xf0]  ;;  %v7074_v59 = vld [vmem:[%s10279_s13 + $0xd4] sm:$0xf]  ;;  %v6438_v57 = vld [vmem:[%s10279_s13 + $0xd8] sm:$0xf0] }
 0x32d   : > { %4274 = vmatpush.bf16.msra.mxu1 %v6269_v26  ;;  %4288 = vmatpush.bf16.msra.mxu2 %v6209_v45  ;;  %v6437_v56 = vor.u32 %v7075_v28, %v6436_v51  ;;  %v6441_v31 = vor.u32 %v7074_v59, %v6438_v57  ;;  %v6356_v29 = vld [vmem:[%s10279_s13 + $0x30] sm:$0xf]  ;;  %v7055_v60 = vld [vmem:[%s10279_s13 + $0x34] sm:$0xf0]  ;;  %v7054_v30 = vld [vmem:[%s10279_s13 + $0x34] sm:$0xf] }
 0x32e   : > { %4302 = vmatpush.bf16.msra.mxu3 %v6273_v16  ;;  %v6357_v35 = vor.u32 %v7055_v60, %v6356_v29  ;;  %v6358_v20 = vld [vmem:[%s10279_s13 + $0x38] sm:$0xf0]  ;;  %v6428_v4 = vld [vmem:[%s10279_s13 + $0xc0] sm:$0xf]  ;;  %v7073_v24 = vld [vmem:[%s10279_s13 + $0xc4] sm:$0xf0] }
 0x32f   : > { %4261 = vmatmul.bf16.vlgmr.msra.gmra.mxu0 %v4053_v39  ;;  %v6361_v62 = vor.u32 %v7054_v30, %v6358_v20  ;;  %v7072_v36 = vld [vmem:[%s10279_s13 + $0xc4] sm:$0xf]  ;;  %v6429_v32 = vor.u32 %v7073_v24, %v6428_v4  ;;  %v6430_v14 = vld [vmem:[%s10279_s13 + $0xc8] sm:$0xf0]  ;;  %v6348_v5 = vld [vmem:[%s10279_s13 + $0x20] sm:$0xf] }
 0x330   : > { %4513 = vmatpush.bf16.msrb.mxu0 %v6389_v12  ;;  %4275 = vmatmul.bf16.vlgmr.msra.gmra.mxu1 %v4054_v19  ;;  %v6433_v27 = vor.u32 %v7072_v36, %v6430_v14  ;;  %v7053_v52 = vld [vmem:[%s10279_s13 + $0x24] sm:$0xf0]  ;;  %v7052_v6 = vld [vmem:[%s10279_s13 + $0x24] sm:$0xf]  ;;  %v6350_v17 = vld [vmem:[%s10279_s13 + $0x28] sm:$0xf0] }
 0x331   : > { %4541 = vmatpush.bf16.msrb.mxu2 %v6393_v42  ;;  %4303 = vmatmul.bf16.vlgmr.msra.gmra.mxu3 %v4054_v19  ;;  %v6349_v21 = vor.u32 %v7053_v52, %v6348_v5  ;;  %v6353_v26 = vor.u32 %v7052_v6, %v6350_v17  ;;  %v6420_v45 = vld [vmem:[%s10279_s13 + $0xb0] sm:$0xf]  ;;  %v7071_v16 = vld [vmem:[%s10279_s13 + $0xb4] sm:$0xf0]  ;;  %v7070_v12 = vld [vmem:[%s10279_s13 + $0xb4] sm:$0xf] }
 0x332   : > { %4289 = vmatmul.bf16.vlgmr.msra.gmra.mxu2 %v4053_v39  ;;  %4527 = vmatpush.bf16.msrb.mxu1 %v6453_v40  ;;  %v6421_v37 = vor.u32 %v7071_v16, %v6420_v45  ;;  %v6422_v0 = vld [vmem:[%s10279_s13 + $0xb8] sm:$0xf0]  ;;  %v6340_v39 = vld [vmem:[%s10279_s13 + $0x10] sm:$0xf]  ;;  %v7051_v42 = vld [vmem:[%s10279_s13 + $0x14] sm:$0xf0] }
 0x333   : > { %4555 = vmatpush.bf16.msrb.mxu3 %v6457_v10  ;;  %v6425_v46 = vor.u32 %v7070_v12, %v6422_v0  ;;  %v7050_v44 = vld [vmem:[%s10279_s13 + $0x14] sm:$0xf]  ;;  %v6341_v41 = vor.u32 %v7051_v42, %v6340_v39  ;;  %v6342_v33 = vld [vmem:[%s10279_s13 + $0x18] sm:$0xf0]  ;;  %v6412_v43 = vld [vmem:[%s10279_s13 + $0xa0] sm:$0xf] }
 0x334   : > { %4514 = vmatpush.bf16.msrb.mxu0 %v6381_v63  ;;  %v6345_v19 = vor.u32 %v7050_v44, %v6342_v33  ;;  %v7069_v61 = vld [vmem:[%s10279_s13 + $0xa4] sm:$0xf0]  ;;  %v7068_v40 = vld [vmem:[%s10279_s13 + $0xa4] sm:$0xf]  ;;  %v6414_v10 = vld [vmem:[%s10279_s13 + $0xa8] sm:$0xf0] }
 0x335   : > { %4542 = vmatpush.bf16.msrb.mxu2 %v6385_v11  ;;  %v6413_v63 = vor.u32 %v7069_v61, %v6412_v43  ;;  %v6417_v48 = vor.u32 %v7068_v40, %v6414_v10  ;;  %v6332_v47 = vld [vmem:[%s10279_s13] sm:$0xf]  ;;  %v7049_v2 = vld [vmem:[%s10279_s13 + $0x4] sm:$0xf0]  ;;  %v7048_v11 = vld [vmem:[%s10279_s13 + $0x4] sm:$0xf] }
 0x336   : > { %4528 = vmatpush.bf16.msrb.mxu1 %v6445_v1  ;;  %v6333_v8 = vor.u32 %v7049_v2, %v6332_v47  ;;  %v6334_v7 = vld [vmem:[%s10279_s13 + $0x8] sm:$0xf0]  ;;  %v6404_v49 = vld [vmem:[%s10279_s13 + $0x90] sm:$0xf]  ;;  %v7067_v55 = vld [vmem:[%s10279_s13 + $0x94] sm:$0xf0] }
 0x337   : > { %4556 = vmatpush.bf16.msrb.mxu3 %v6449_v23  ;;  %v6337_v54 = vor.u32 %v7048_v11, %v6334_v7  ;;  %v7066_v1 = vld [vmem:[%s10279_s13 + $0x94] sm:$0xf]  ;;  %v6406_v23 = vld [vmem:[%s10279_s13 + $0x98] sm:$0xf0]  ;;  %v6396_v13 = vld [vmem:[%s10279_s13 + $0x80] sm:$0xf] }
 0x338   : > { %4515 = vmatpush.bf16.msrb.mxu0 %v6373_v50  ;;  %v6405_v50 = vor.u32 %v7067_v55, %v6404_v49  ;;  %v7065_v34 = vld [vmem:[%s10279_s13 + $0x84] sm:$0xf0]  ;;  %v7064_v58 = vld [vmem:[%s10279_s13 + $0x84] sm:$0xf]  ;;  %v7087_v51 = vld [vmem:[%s10281_s15 + $0x38] sm:$0xff]  ;;  %s4570_s1 = ssub.f32 1.0, %s4569_s4 }
 0x339   : > { %4543 = vmatpush.bf16.msrb.mxu2 %v6377_v38  ;;  %v6409_v38 = vor.u32 %v7066_v1, %v6406_v23  ;;  %v6397_v53 = vor.u32 %v7065_v34, %v6396_v13  ;;  %v4087_v28 = vld [vmem:[%s10278_s12] sm:$0x3]  ;;  %v7086_v12 = vld [vmem:[%s10281_s15 + $0x30] sm:$0xff]  ;;  %v7085_v0 = vld [vmem:[%s10281_s15 + $0x28] sm:$0xff]  ;;  %s7292_s27 = smov 64   ;;  %vm4774_vm8 = vcmask 261120  }
 0x33a   : > { %4529 = vmatpush.bf16.msrb.mxu1 %v6437_v56  ;;  %v4089_v56 = vperm.slane %v4087_v28, 0  ;;  %v4090_v60 = vperm.slane %v4087_v28, 1  ;;  %v7084_v39 = vld [vmem:[%s10281_s15 + $0x20] sm:$0xff]  ;;  %v7093_v42 = vld [vmem:[%s10281_s15 + $0x68] sm:$0xff]  ;;  %v7083_v44 = vld [vmem:[%s10281_s15 + $0x18] sm:$0xff]  ;;  %v4571_v55 = vstv %s4570_s1  ;;  %s10373_s29 = sld [smem:[#allocation11_spill]] }
 0x33b   : > { %4557 = vmatpush.bf16.msrb.mxu3 %v6441_v31  ;;  %v7082_v33 = vld [vmem:[%s10281_s15 + $0x10] sm:$0xff]  ;;  %v7081_v43 = vld [vmem:[%s10281_s15 + $0x8] sm:$0xff]  ;;  %v7080_v40 = vld [vmem:[%s10281_s15] sm:$0xff]  ;;  %vm5714_vm13 = vcmask 523264   ;;  %vm5717_vm4 = vcmask 785408   ;;  %vm4867_vm9 = vcmask 1043456  }
 0x33c   : > { %4516 = vmatpush.bf16.msrb.mxu0 %v6365_v15  ;;  %v6398_v15 = vld [vmem:[%s10279_s13 + $0x88] sm:$0xf0]  ;;  %v7090_v61 = vld [vmem:[%s10281_s15 + $0x50] sm:$0xff]  ;;  %v7088_v10 = vld [vmem:[%s10281_s15 + $0x40] sm:$0xff]  ;;  %s10375_s3 = sld [smem:[#allocation12_spill]]  ;;  %vm4860_vm2 = vcmask 31744  }
 0x33d   : > { %4544 = vmatpush.bf16.msrb.mxu2 %v6369_v25  ;;  %v6401_v25 = vor.u32 %v7064_v58, %v6398_v15  ;;  %s7293_s1 = smov [#allocation3]   ;;  %s5729_s30 = sshll.u32 %s10289_s23, 4  ;;  %s5730_s30 = int_to_ptr.hbm [resolvable:$true] %s5729_s30 }
 0x33e   : > { %4530 = vmatpush.bf16.msrb.mxu1 %v6429_v32  ;;  %s5727_s28 = sshll.u32 %s7293_s1, 4  ;;  %p7196_p5 = scmp.eq.s32.totalorder %s7427_s26, 1  ;;  %s5728_s28 = int_to_ptr.vmem [resolvable:$true] %s5727_s28 }
 0x33f   : > { %4558 = vmatpush.bf16.msrb.mxu3 %v6433_v27 }
 0x340   : > { %4517 = vmatpush.bf16.msrb.mxu0 %v6357_v35 }
 0x341   : > { %4545 = vmatpush.bf16.msrb.mxu2 %v6361_v62 }
 0x342   : > { %4531 = vmatpush.bf16.msrb.mxu1 %v6421_v37  ;;  %v7095_v37 = vld [vmem:[%s10281_s15 + $0x78] sm:$0xff] }
 0x343   : > { %4559 = vmatpush.bf16.msrb.mxu3 %v6425_v46  ;;  %v7094_v46 = vld [vmem:[%s10281_s15 + $0x70] sm:$0xff] }
 0x344   : > { %4518 = vmatpush.bf16.msrb.mxu0 %v6349_v21 }
 0x345   : > { %4546 = vmatpush.bf16.msrb.mxu2 %v6353_v26 }
 0x346   : > { %4532 = vmatpush.bf16.msrb.mxu1 %v6413_v63  ;;  %v7089_v63 = vld [vmem:[%s10281_s15 + $0x48] sm:$0xff] }
 0x347   : > { %4560 = vmatpush.bf16.msrb.mxu3 %v6417_v48  ;;  %v4347_v48 = vld [vmem:[%s10280_s14] sm:$0x3] }
 0x348   : > { %4519 = vmatpush.bf16.msrb.mxu0 %v6341_v41  ;;  %v7092_v41 = vld [vmem:[%s10281_s15 + $0x60] sm:$0xff]  ;;  %v4349_v2 = vperm.slane %v4347_v48, 0  ;;  %v4350_v49 = vperm.slane %v4347_v48, 1 }
 0x349   : > { %4547 = vmatpush.bf16.msrb.mxu2 %v6345_v19  ;;  %v7091_v19 = vld [vmem:[%s10281_s15 + $0x58] sm:$0xff] }
 0x34a   : > { %4533 = vmatpush.bf16.msrb.mxu1 %v6405_v50 }
 0x34b   : > { %4561 = vmatpush.bf16.msrb.mxu3 %v6409_v38  ;;  %v4576_v38 = vstv %s4569_s4  ;;  %s10374_s4 = sld [smem:[#allocation13_spill]] }
 0x34c   : > { %4520 = vmatpush.bf16.msrb.mxu0 %v6333_v8 }
 0x34d   : > { %4548 = vmatpush.bf16.msrb.mxu2 %v6337_v54 }
 0x34e   : > { %4534 = vmatpush.bf16.msrb.mxu1 %v6397_v53 }
 0x34f   : > { %4562 = vmatpush.bf16.msrb.mxu3 %v6401_v25 }
 0x350   : > { %4723 = vmatpush.bf16.msra.mxu0 %v7087_v51  ;;  %v4049_v51 = vld [vmem:[#allocation2 + $0x10] sm:$0xff] }
 0x352   : > { %4737 = vmatpush.bf16.msra.mxu1 %v7095_v37 }
 0x354   : > { %4724 = vmatpush.bf16.msra.mxu0 %v7086_v12 }
 0x356   : > { %4738 = vmatpush.bf16.msra.mxu1 %v7094_v46 }
 0x358   : > { %4725 = vmatpush.bf16.msra.mxu0 %v7085_v0 }
 0x35a   : > { %4739 = vmatpush.bf16.msra.mxu1 %v7093_v42 }
 0x35c   : > { %4726 = vmatpush.bf16.msra.mxu0 %v7084_v39 }
 0x35e   : > { %4740 = vmatpush.bf16.msra.mxu1 %v7092_v41  ;;  %v4765_v41 = vld [vmem:[%s10372_s0 + $0x8] sm:$0xff] }
 0x360   : > { %4727 = vmatpush.bf16.msra.mxu0 %v7083_v44  ;;  %v4766_v44 = vld [vmem:[%s10372_s0 + $0x10] sm:$0xff] }
 0x362   : > { %4741 = vmatpush.bf16.msra.mxu1 %v7091_v19 }
 0x364   : > { %4728 = vmatpush.bf16.msra.mxu0 %v7082_v33  ;;  %v4764_v33 = vld [vmem:[%s10372_s0] sm:$0xff] }
 0x366   : > { %4742 = vmatpush.bf16.msra.mxu1 %v7090_v61 }
 0x368   : > { %4729 = vmatpush.bf16.msra.mxu0 %v7081_v43 }
 0x36a   : > { %4743 = vmatpush.bf16.msra.mxu1 %v7089_v63 }
 0x36c   : > { %4730 = vmatpush.bf16.msra.mxu0 %v7080_v40 }
 0x36e   : > { %4744 = vmatpush.bf16.msra.mxu1 %v7088_v10 }
 0x3ac   : > { %v4262_v59 = vpop.f32.mrf.mxu0 }
 0x3ad   : > { %v4276_v57 = vpop.f32.mrf.mxu1  ;;  %v4263_v31 = vadd.f32 %v4262_v59, %v4089_v56 }
 0x3af   : > { %v4277_v20 = vadd.f32 %v4276_v57, %v4263_v31  ;;  %v4051_v57 = vld [vmem:[#allocation2 + $0x18] sm:$0xff] }
 0x3b1   : > { %v4309_v32 = vmax.f32 %v4277_v20, 0.0 }
 0x3b4   : > { %v4304_v30 = vpop.f32.mrf.mxu3  ;;  %v4264_v35 = vpop.f32.mrf.mxu0 }
 0x3b5   : > { %v4290_v29 = vpop.f32.mrf.mxu2  ;;  %v4265_v62 = vadd.f32 %v4264_v35, %v4089_v56  ;;  %v4278_v4 = vpop.f32.mrf.mxu1 }
 0x3b6   : > { %v4291_v36 = vadd.f32 %v4290_v29, %v4090_v60 }
 0x3b7   : > { %v4279_v24 = vadd.f32 %v4278_v4, %v4265_v62  ;;  %v4050_v4 = vld [vmem:[#allocation2] sm:$0xff] }
 0x3b8   : > { %v4305_v52 = vadd.f32 %v4304_v30, %v4291_v36 }
 0x3b9   : > { %v4311_v14 = vmax.f32 %v4279_v24, 0.0 }
 0x3ba   : > { %v4310_v26 = vmax.f32 %v4305_v52, 0.0 }
 0x3bb   : > { %v4313_v27 = vpack.c.bf16 %v4311_v14, %v4309_v32  ;;  %v4052_v14 = vld [vmem:[#allocation2 + $0x8] sm:$0xff] }
 0x3bc   : > { %v4306_v6 = vpop.f32.mrf.mxu3 }
 0x3bd   : > { %v4292_v5 = vpop.f32.mrf.mxu2  ;;  %4521 = vmatmul.bf16.vlgmr.msrb.gmra.mxu0 %v4313_v27  ;;  %4549 = vmatmul.bf16.vlgmr.msrb.gmra.mxu2 %v4313_v27 }
 0x3be   : > { %v4293_v21 = vadd.f32 %v4292_v5, %v4090_v60 }
 0x3c0   : > { %v4307_v17 = vadd.f32 %v4306_v6, %v4293_v21 }
 0x3c2   : > { %v4312_v45 = vmax.f32 %v4307_v17, 0.0 }
 0x3c4   : > { %v4314_v16 = vpack.c.bf16 %v4312_v45, %v4310_v26 }
 0x3c6   : > { %4535 = vmatmul.bf16.vlgmr.msrb.gmra.mxu1 %v4314_v16  ;;  %4563 = vmatmul.bf16.vlgmr.msrb.gmra.mxu3 %v4314_v16 }
 0x43a   : > { %v4522_v47 = vpop.f32.mrf.mxu0 }
 0x43b   : > { %v4523_v11 = vadd.f32 %v4522_v47, %v4349_v2 }
 0x440   : > { %v4550_v7 = vpop.f32.mrf.mxu2 }
 0x441   : > { %v4551_v23 = vadd.f32 %v4550_v7, %v4350_v49 }
 0x442   : > { %v4524_v1 = vpop.f32.mrf.mxu0 }
 0x443   : > { %v4536_v8 = vpop.f32.mrf.mxu1  ;;  %v4525_v34 = vadd.f32 %v4524_v1, %v4349_v2  ;;  %v4816_v1 = vld [vmem:[%s10373_s29 + $0x10] sm:$0xff] }
 0x444   : > { %v4537_v54 = vadd.f32 %v4536_v8, %v4523_v11 }
 0x446   : > { %v4572_v50 = vmul.f32 %v4571_v55, %v4537_v54 }
 0x448   : > { %v4577_v15 = vadd.f32 %v4576_v38, %v4572_v50  ;;  %v4552_v28 = vpop.f32.mrf.mxu2  ;;  %v4815_v50 = vld [vmem:[%s10373_s29 + $0x8] sm:$0xff] }
 0x449   : > { %v4564_v13 = vpop.f32.mrf.mxu3  ;;  %v4553_v60 = vadd.f32 %v4552_v28, %v4350_v49  ;;  %v4855_v28 = vld [vmem:[%s10374_s4] sm:$0xff] }
 0x44a   : > { %v4565_v58 = vadd.f32 %v4564_v13, %v4551_v23  ;;  %v4581_v31 = vmul.f32 %v4577_v15, %v4049_v51  ;;  %v4814_v23 = vld [vmem:[%s10373_s29] sm:$0xff]  ;;  %4857 = vst [vmem:[#allocation1] ss:$2 sm:$0xff] %v4855_v28 }
 0x44b   : > { %v4538_v53 = vpop.f32.mrf.mxu1 }
 0x44c   : > { %v4539_v25 = vadd.f32 %v4538_v53, %v4525_v34  ;;  %v4573_v59 = vmul.f32 %v4571_v55, %v4565_v58  ;;  %v4585_v24 = vadd.f32 %v4581_v31, %v9342_v22  ;;  %v7229_v22 = vld [vmem:[%s10282_s16] ss:$0 sm:$0xff] }
 0x44e   : > { %v4574_v56 = vmul.f32 %v4571_v55, %v4539_v25  ;;  %v4578_v35 = vadd.f32 %v4576_v38, %v4573_v59 }
 0x450   : > { %v4579_v29 = vadd.f32 %v4576_v38, %v4574_v56  ;;  %v4582_v27 = vmul.f32 %v4578_v35, %v4050_v4  ;;  %v6592_v4 = vld [vmem:[%s10283_s17 + $0x78] sm:$0xf0] }
 0x451   : > { %v4566_v30 = vpop.f32.mrf.mxu3  ;;  %v4858_v59 = vld.sshfl [vmem:[#allocation1] sm:$0xff pattern:$0x75316420]  ;;  %v4859_v56 = vld.sshfl [vmem:[#allocation1 + $0x8] sm:$0xff pattern:$0x75316420] }
 0x452   : > { %v4583_v20 = vmul.f32 %v4579_v29, %v4051_v57  ;;  %v4567_v62 = vadd.f32 %v4566_v30, %v4553_v60  ;;  %v4586_v6 = vadd.f32 %v4582_v27, %v9358_v9  ;;  %v6590_v29 = vld [vmem:[%s10283_s17 + $0x70] sm:$0xf]  ;;  %v7111_v60 = vld [vmem:[%s10283_s17 + $0x74] sm:$0xf0]  ;;  %v6582_v27 = vld [vmem:[%s10283_s17 + $0x60] sm:$0xf] }
 0x453   : > { %v6654_v30 = vld [vmem:[%s10283_s17 + $0xf0] sm:$0xf]  ;;  %v6591_v35 = vor.u32 %v7111_v60, %v6590_v29 }
 0x454   : > { %v4587_v36 = vadd.f32 %v4583_v20, %v9350_v18  ;;  %v4575_v32 = vmul.f32 %v4571_v55, %v4567_v62  ;;  %v4817_v55 = vld [vmem:[%s10373_s29 + $0x18] sm:$0xff]  ;;  %v7110_v62 = vld [vmem:[%s10283_s17 + $0x74] sm:$0xf] }
 0x455   : > { %4840 = vmatpush.msra.mxu3 %v4817_v55  ;;  %v7127_v20 = vld [vmem:[%s10283_s17 + $0xf4] sm:$0xf0]  ;;  %5116 = vmatpush.bf16.msrb.mxu0 %v6591_v35  ;;  %v6558_v55 = vld [vmem:[%s10283_s17 + $0x30] sm:$0xf]  ;;  %v7101_v35 = vld [vmem:[%s10283_s17 + $0x24] sm:$0xf0] }
 0x456   : > { %v4580_v5 = vadd.f32 %v4576_v38, %v4575_v32  ;;  %v4589_v52 = vpack.c.bf16 %v4587_v36, %v4585_v24  ;;  %v6655_v24 = vor.u32 %v7127_v20, %v6654_v30  ;;  %v6595_v36 = vor.u32 %v7110_v62, %v6592_v4  ;;  %v7126_v32 = vld [vmem:[%s10283_s17 + $0xf4] sm:$0xf]  ;;  %v6550_v30 = vld [vmem:[%s10283_s17 + $0x20] sm:$0xf]  ;;  %v7117_v4 = vld [vmem:[%s10283_s17 + $0xa4] sm:$0xf0] }
 0x457   : > { %4841 = vmatpush.msra.mxu3 %v4816_v1  ;;  %v7103_v1 = vld [vmem:[%s10283_s17 + $0x34] sm:$0xf0]  ;;  %v6614_v20 = vld [vmem:[%s10283_s17 + $0xa0] sm:$0xf]  ;;  %v6551_v62 = vor.u32 %v7101_v35, %v6550_v30 }
 0x458   : > { %v4584_v21 = vmul.f32 %v4580_v5, %v4052_v14  ;;  %4731 = vmatmul.bf16.vlgmr.msra.gmra.mxu0 %v4589_v52  ;;  %v6656_v14 = vld [vmem:[%s10283_s17 + $0xf8] sm:$0xf0]  ;;  %v7109_v52 = vld [vmem:[%s10283_s17 + $0x64] sm:$0xf0]  ;;  %5130 = vmatpush.bf16.msrb.mxu1 %v6655_v24  ;;  %v7100_v24 = vld [vmem:[%s10283_s17 + $0x24] sm:$0xf] }
 0x459   : > { %4842 = vmatpush.msra.mxu3 %v4815_v50  ;;  %v6659_v5 = vor.u32 %v7126_v32, %v6656_v14  ;;  %v6622_v50 = vld [vmem:[%s10283_s17 + $0xb0] sm:$0xf]  ;;  %v6615_v32 = vor.u32 %v7117_v4, %v6614_v20  ;;  %v6694_v20 = vld [vmem:[%s10285_s19 + $0x40] sm:$0xf]  ;;  %v7136_v4 = vld [vmem:[%s10285_s19 + $0x44] sm:$0xf] }
 0x45a   : > { %v4588_v17 = vadd.f32 %v4584_v21, %v9360_v3  ;;  %v4767_v3 = vld [vmem:[%s10372_s0 + $0x18] sm:$0xff]  ;;  %v6646_v21 = vld [vmem:[%s10283_s17 + $0xe0] sm:$0xf]  ;;  %s7295_s0 = smov 16  }
 0x45b   : > { %4791 = vmatpush.msra.mxu2 %v4767_v3  ;;  %4843 = vmatpush.msra.mxu3 %v4814_v23 }
 0x45c   : > { %v4590_v26 = vpack.c.bf16 %v4588_v17, %v4586_v6  ;;  %v7125_v6 = vld [vmem:[%s10283_s17 + $0xe4] sm:$0xf0]  ;;  %v6583_v17 = vor.u32 %v7109_v52, %v6582_v27  ;;  %v7116_v27 = vld [vmem:[%s10283_s17 + $0xa4] sm:$0xf]  ;;  %v6542_v52 = vld [vmem:[%s10283_s17 + $0x10] sm:$0xf] }
 0x45d   : > { %4792 = vmatpush.msra.mxu2 %v4766_v44  ;;  %6529 = vmatpush.msk.msrb.mxu3 %vm4867_vm9, %v4859_v56  ;;  %v6576_v44 = vld [vmem:[%s10283_s17 + $0x58] sm:$0xf0] }
 0x45e   : > { %4745 = vmatmul.bf16.vlgmr.msra.gmra.mxu1 %v4590_v26  ;;  %v6647_v26 = vor.u32 %v7125_v6, %v6646_v21  ;;  %5117 = vmatpush.bf16.msrb.mxu0 %v6583_v17  ;;  %v7099_v6 = vld [vmem:[%s10283_s17 + $0x14] sm:$0xf0]  ;;  %v6606_v17 = vld [vmem:[%s10283_s17 + $0x90] sm:$0xf] }
 0x45f   : > { %4793 = vmatpush.msra.mxu2 %v4765_v41  ;;  %v7122_v41 = vld [vmem:[%s10283_s17 + $0xd4] sm:$0xf] }
 0x460   : > { %5131 = vmatpush.bf16.msrb.mxu1 %v6647_v26  ;;  %v7115_v26 = vld [vmem:[%s10283_s17 + $0x94] sm:$0xf0] }
 0x461   : > { %4794 = vmatpush.msra.mxu2 %v4764_v33  ;;  %v6640_v33 = vld [vmem:[%s10283_s17 + $0xd8] sm:$0xf0] }
 0x463   : > { %6526 = vmatpush.msk.msrb.mxu2 %vm4867_vm9, %v4858_v59  ;;  %v4851_v59 = vld [vmem:[%s10375_s3] sm:$0xff] }
 0x4d5   : > { %v4732_v45 = vpop.f32.mrf.mxu0 }
 0x4d6   : > { %v4733_v16 = vadd.f32 %v7229_v22, %v4732_v45  ;;  %v7108_v45 = vld [vmem:[%s10283_s17 + $0x64] sm:$0xf] }
 0x4db   : > { %v4746_v18 = vpop.f32.mrf.mxu1 }
 0x4dc   : > { %v4747_v12 = vadd.f32 %v4746_v18, %v4733_v16  ;;  %v7124_v16 = vld [vmem:[%s10283_s17 + $0xe4] sm:$0xf] }
 0x4dd   : > { %v4734_v0 = vpop.f32.mrf.mxu0 }
 0x4de   : > { %v4752_v37 = vsel %vm4751_vm5, %v4747_v12, -inf  ;;  %v4735_v46 = vadd.f32 %v7229_v22, %v4734_v0  ;;  %v6584_v22 = vld [vmem:[%s10283_s17 + $0x68] sm:$0xf0]  ;;  %v7107_v0 = vld [vmem:[%s10283_s17 + $0x54] sm:$0xf0] }
 0x4df   : > { %4753 = vmax.xlane.f32.xlu0 %v4752_v37  ;;  %v6587_v18 = vor.u32 %v7108_v45, %v6584_v22  ;;  %v6574_v37 = vld [vmem:[%s10283_s17 + $0x50] sm:$0xf]  ;;  %v6543_v45 = vor.u32 %v7099_v6, %v6542_v52  ;;  %v6607_v22 = vor.u32 %v7115_v26, %v6606_v17 }
 0x4e0   : > { %v6575_v3 = vor.u32 %v7107_v0, %v6574_v37  ;;  %v6608_v0 = vld [vmem:[%s10283_s17 + $0x98] sm:$0xf0] }
 0x4e2   : > { %5118 = vmatpush.bf16.msrb.mxu0 %v6575_v3 }
 0x4e3   : > { %v4748_v39 = vpop.f32.mrf.mxu1 }
 0x4e4   : > { %v4749_v42 = vadd.f32 %v4748_v39, %v4735_v46  ;;  %v6638_v39 = vld [vmem:[%s10283_s17 + $0xd0] sm:$0xf] }
 0x4e6   : > { %v4755_v9 = vsel %vm4751_vm5, %v4749_v42, -inf }
 0x4e7   : > { %4756 = vmax.xlane.f32.xlu0 %v4755_v9  ;;  %v7106_v9 = vld [vmem:[%s10283_s17 + $0x54] sm:$0xf] }
 0x552   : > { %v4754_v19 = vpop.xlane.xlu0 %4753 }
 0x553   : > { %v4758_v43 = vsub.f32 %v4747_v12, %v4754_v19 }
 0x555   : > { %v4760_v61 = vmul.f32 1.442695, %v4758_v43  ;;  %v6579_v43 = vor.u32 %v7106_v9, %v6576_v44  ;;  %v6598_v9 = vld [vmem:[%s10283_s17 + $0x80] sm:$0xf]  ;;  %v7113_v44 = vld [vmem:[%s10283_s17 + $0x84] sm:$0xf0] }
 0x557   : > { %7230 = vpow2.f32 %v4760_v61  ;;  %v6566_v61 = vld [vmem:[%s10283_s17 + $0x40] sm:$0xf] }
 0x55a   : > { %v4757_v40 = vpop.xlane.xlu0 %4756 }
 0x55b   : > { %v4759_v63 = vsub.f32 %v4749_v42, %v4757_v40  ;;  %v7105_v40 = vld [vmem:[%s10283_s17 + $0x44] sm:$0xf0] }
 0x55d   : > { %v7231_v10 = vpop.eup %7230  ;;  %v4762_v48 = vmul.f32 1.442695, %v4759_v63  ;;  %v6630_v63 = vld [vmem:[%s10283_s17 + $0xc0] sm:$0xf] }
 0x55e   : > { %4770 = vrot.lane.b32.xlu1 %v7231_v10, %s7292_s27 }
 0x55f   : > { %7232 = vpow2.f32 %v4762_v48  ;;  %v7121_v48 = vld [vmem:[%s10283_s17 + $0xc4] sm:$0xf0] }
 0x565   : > { %v7233_v47 = vpop.eup %7232 }
 0x566   : > { %4772 = vrot.lane.b32.xlu1 %v7233_v47, %s7292_s27 }
 0x5d0   : > { %v4771_v2 = vpop.permute.xlu1 %4770 }
 0x5d1   : > { %6522 = vmatmul.msk.f32.vlgmr.msra.gmra.mxu2 %vm4774_vm8, %v4771_v2  ;;  %v6568_v2 = vld [vmem:[%s10283_s17 + $0x48] sm:$0xf0] }
 0x5d2   : > { %5144 = vmatpush.bf16.msra.mxu2 %v6595_v36  ;;  %v6552_v36 = vld [vmem:[%s10283_s17 + $0x28] sm:$0xf0] }
 0x5d3   : > { %v6555_v14 = vor.u32 %v7100_v24, %v6552_v36  ;;  %v6696_v24 = vld [vmem:[%s10285_s19 + $0x48] sm:$0xf0] }
 0x5d6   : > { %5145 = vmatpush.bf16.msra.mxu2 %v6587_v18  ;;  %v6544_v18 = vld [vmem:[%s10283_s17 + $0x18] sm:$0xf0] }
 0x5d8   : > { %v4773_v11 = vpop.permute.xlu1 %4772 }
 0x5d9   : > { %6523 = vmatmul.msk.f32.gmra.mxu2 %vm4774_vm8, %v4773_v11  ;;  %v7120_v11 = vld [vmem:[%s10283_s17 + $0xc4] sm:$0xf] }
 0x5da   : > { %5146 = vmatpush.bf16.msra.mxu2 %v6579_v43 }
 0x654   : > { %v4796_v8 = vpop.f32.mrf.mxu2 }
 0x655   : > { %7234 = vrcp.f32 %v4796_v8  ;;  %v6632_v8 = vld [vmem:[%s10283_s17 + $0xc8] sm:$0xf0] }
 0x656   : > { %v6635_v23 = vor.u32 %v7120_v11, %v6632_v8  ;;  %v6720_v11 = vld [vmem:[%s10285_s19 + $0x78] sm:$0xf0]  ;;  %v6710_v8 = vld [vmem:[%s10285_s19 + $0x60] sm:$0xf] }
 0x65b   : > { %v7235_v7 = vpop.eup %7234 }
 0x65c   : > { %4806 = vrot.lane.b32.xlu2 %v7235_v7, %s7292_s27  ;;  %v4799_v54 = vpop.f32.mrf.mxu2  ;;  %v6567_v7 = vor.u32 %v7105_v40, %v6566_v61  ;;  %v7112_v61 = vld [vmem:[%s10283_s17 + $0x84] sm:$0xf]  ;;  %v6600_v40 = vld [vmem:[%s10283_s17 + $0x88] sm:$0xf0] }
 0x65d   : > { %7236 = vrcp.f32 %v4799_v54  ;;  %v6631_v54 = vor.u32 %v7121_v48, %v6630_v63  ;;  %v6603_v63 = vor.u32 %v7112_v61, %v6600_v40  ;;  %v7143_v48 = vld [vmem:[%s10285_s19 + $0x74] sm:$0xf0]  ;;  %v6760_v40 = vld [vmem:[%s10285_s19 + $0xc8] sm:$0xf0] }
 0x65e   : > { %5119 = vmatpush.bf16.msrb.mxu0 %v6567_v7  ;;  %v7141_v7 = vld [vmem:[%s10285_s19 + $0x64] sm:$0xf0] }
 0x663   : > { %v7237_v49 = vpop.eup %7236 }
 0x664   : > { %4808 = vrot.lane.b32.xlu2 %v7237_v49, %s7292_s27 }
 0x6b6   : > { %v4807_v38 = vpop.permute.xlu2 %4806 }
 0x6b7   : > { %v4812_v13 = vmul.f32 %v7231_v10, %v4807_v38  ;;  %v6643_v10 = vor.u32 %v7122_v41, %v6640_v33  ;;  %v7119_v38 = vld [vmem:[%s10283_s17 + $0xb4] sm:$0xf0]  ;;  %v7096_v41 = vld [vmem:[%s10283_s17 + $0x4] sm:$0xf]  ;;  %v6536_v33 = vld [vmem:[%s10283_s17 + $0x8] sm:$0xf0] }
 0x6b8   : > { %v6539_v43 = vor.u32 %v7096_v41, %v6536_v33  ;;  %v6758_v33 = vld [vmem:[%s10285_s19 + $0xc0] sm:$0xf] }
 0x6b9   : > { %v5715_v34 = vsel %vm5714_vm13, %v4747_v12, %v4812_v13  ;;  %4820 = vrot.lane.b32.xlu0 %v4812_v13, %s7292_s27  ;;  %v6648_v12 = vld [vmem:[%s10283_s17 + $0xe8] sm:$0xf0]  ;;  %v7102_v13 = vld [vmem:[%s10283_s17 + $0x34] sm:$0xf] }
 0x6ba   : > { %v5718_v58 = vsel %vm5717_vm4, %v5715_v34, 0.0  ;;  %v6651_v46 = vor.u32 %v7124_v16, %v6648_v12  ;;  %v6560_v34 = vld [vmem:[%s10283_s17 + $0x38] sm:$0xf0]  ;;  %v7098_v16 = vld [vmem:[%s10283_s17 + $0x14] sm:$0xf] }
 0x6bb   : > { %5720 = vst [vmem:[%s10290_s24] sm:$0xff] %v5718_v58  ;;  %v7118_v58 = vld [vmem:[%s10283_s17 + $0xb4] sm:$0xf]  ;;  %v6547_v37 = vor.u32 %v7098_v16, %v6544_v18  ;;  %v6766_v16 = vld [vmem:[%s10285_s19 + $0xd0] sm:$0xf]  ;;  %v7155_v18 = vld [vmem:[%s10285_s19 + $0xd4] sm:$0xf0] }
 0x6bc   : > { %v7114_v12 = vld [vmem:[%s10283_s17 + $0x94] sm:$0xf] }
 0x6be   : > { %v4809_v53 = vpop.permute.xlu2 %4808 }
 0x6bf   : > { %v4813_v15 = vmul.f32 %v7233_v47, %v4809_v53  ;;  %v7104_v47 = vld [vmem:[%s10283_s17 + $0x44] sm:$0xf]  ;;  %v6624_v53 = vld [vmem:[%s10283_s17 + $0xb8] sm:$0xf0] }
 0x6c0   : > { %v6571_v49 = vor.u32 %v7104_v47, %v6568_v2  ;;  %v6627_v28 = vor.u32 %v7118_v58, %v6624_v53  ;;  %v7142_v47 = vld [vmem:[%s10285_s19 + $0x74] sm:$0xf] }
 0x6c1   : > { %v5716_v25 = vsel %vm5714_vm13, %v4749_v42, %v4813_v15  ;;  %4822 = vrot.lane.b32.xlu1 %v4813_v15, %s7292_s27  ;;  %v7123_v42 = vld [vmem:[%s10283_s17 + $0xd4] sm:$0xf0]  ;;  %v6559_v15 = vor.u32 %v7103_v1, %v6558_v55  ;;  %v6712_v55 = vld [vmem:[%s10285_s19 + $0x68] sm:$0xf0]  ;;  %v6782_v1 = vld [vmem:[%s10285_s19 + $0xf0] sm:$0xf] }
 0x6c2   : > { %v5719_v51 = vsel %vm5717_vm4, %v5716_v25, 0.0  ;;  %v6639_v19 = vor.u32 %v7123_v42, %v6638_v39  ;;  %5147 = vmatpush.bf16.msra.mxu2 %v6571_v49  ;;  %v6623_v25 = vor.u32 %v7119_v38, %v6622_v50  ;;  %v6534_v39 = vld [vmem:[%s10283_s17] sm:$0xf]  ;;  %v7097_v42 = vld [vmem:[%s10283_s17 + $0x4] sm:$0xf0]  ;;  %v6711_v50 = vor.u32 %v7141_v7, %v6710_v8 }
 0x6c3   : > { %5721 = vst [vmem:[%s10290_s24 + $0x8] sm:$0xff] %v5719_v51  ;;  %v6563_v51 = vor.u32 %v7102_v13, %v6560_v34  ;;  %5120 = vmatpush.bf16.msrb.mxu0 %v6559_v15  ;;  %v6535_v3 = vor.u32 %v7097_v42, %v6534_v39  ;;  %v7140_v49 = vld [vmem:[%s10285_s19 + $0x64] sm:$0xf]  ;;  %v7158_v38 = vld [vmem:[%s10285_s19 + $0xf4] sm:$0xf] }
 0x6c4   : > { %5132 = vmatpush.bf16.msrb.mxu1 %v6639_v19  ;;  %v6599_v19 = vor.u32 %v7113_v44, %v6598_v9  ;;  %v6784_v13 = vld [vmem:[%s10285_s19 + $0xf8] sm:$0xf0]  ;;  %v6715_v34 = vor.u32 %v7140_v49, %v6712_v55  ;;  %v6702_v15 = vld [vmem:[%s10285_s19 + $0x50] sm:$0xf]  ;;  %v7135_v42 = vld [vmem:[%s10285_s19 + $0x34] sm:$0xf0] }
 0x6c5   : > { %v6787_v53 = vor.u32 %v7158_v38, %v6784_v13  ;;  %v6686_v39 = vld [vmem:[%s10285_s19 + $0x30] sm:$0xf]  ;;  %v7134_v9 = vld [vmem:[%s10285_s19 + $0x34] sm:$0xf]  ;;  %v6688_v44 = vld [vmem:[%s10285_s19 + $0x38] sm:$0xf0] }
 0x6c6   : > { %5148 = vmatpush.bf16.msra.mxu2 %v6563_v51  ;;  %v7138_v51 = vld [vmem:[%s10285_s19 + $0x54] sm:$0xf]  ;;  %v6691_v41 = vor.u32 %v7134_v9, %v6688_v44  ;;  %v6750_v7 = vld [vmem:[%s10285_s19 + $0xb0] sm:$0xf]  ;;  %v7131_v38 = vld [vmem:[%s10285_s19 + $0x14] sm:$0xf0] }
 0x6c7   : > { %5121 = vmatpush.bf16.msrb.mxu0 %v6551_v62  ;;  %v7137_v62 = vld [vmem:[%s10285_s19 + $0x44] sm:$0xf0]  ;;  %v7150_v49 = vld [vmem:[%s10285_s19 + $0xb4] sm:$0xf]  ;;  %v7191_v9 = vld [vmem:[%s10287_s21 + $0xf4] sm:$0xf0] }
 0x6c8   : > { %5133 = vmatpush.bf16.msrb.mxu1 %v6631_v54  ;;  %v6723_v54 = vor.u32 %v7142_v47, %v6720_v11  ;;  %v6695_v36 = vor.u32 %v7137_v62, %v6694_v20  ;;  %v6680_v11 = vld [vmem:[%s10285_s19 + $0x28] sm:$0xf0]  ;;  %v7130_v13 = vld [vmem:[%s10285_s19 + $0x14] sm:$0xf]  ;;  %v6734_v20 = vld [vmem:[%s10285_s19 + $0x90] sm:$0xf] }
 0x6c9   : > { %v7147_v62 = vld [vmem:[%s10285_s19 + $0x94] sm:$0xf0]  ;;  %v6912_v44 = vld [vmem:[%s10287_s21 + $0xf8] sm:$0xf0] }
 0x6ca   : > { %5149 = vmatpush.bf16.msra.mxu2 %v6555_v14 }
 0x6cb   : > { %5122 = vmatpush.bf16.msrb.mxu0 %v6543_v45 }
 0x6cc   : > { %5134 = vmatpush.bf16.msrb.mxu1 %v6623_v25  ;;  %v7139_v25 = vld [vmem:[%s10285_s19 + $0x54] sm:$0xf0] }
 0x6ce   : > { %5150 = vmatpush.bf16.msra.mxu2 %v6547_v37  ;;  %v6767_v37 = vor.u32 %v7155_v18, %v6766_v16  ;;  %v6848_v16 = vld [vmem:[%s10287_s21 + $0x78] sm:$0xf0]  ;;  %v6838_v18 = vld [vmem:[%s10287_s21 + $0x60] sm:$0xf] }
 0x6cf   : > { %5123 = vmatpush.bf16.msrb.mxu0 %v6535_v3  ;;  %v6687_v3 = vor.u32 %v7135_v42, %v6686_v39  ;;  %v6910_v39 = vld [vmem:[%s10287_s21 + $0xf0] sm:$0xf] }
 0x6d0   : > { %5135 = vmatpush.bf16.msrb.mxu1 %v6615_v32  ;;  %v6699_v32 = vor.u32 %v7136_v4, %v6696_v24  ;;  %v7146_v4 = vld [vmem:[%s10285_s19 + $0x94] sm:$0xf]  ;;  %v6735_v24 = vor.u32 %v7147_v62, %v6734_v20  ;;  %v6902_v62 = vld [vmem:[%s10287_s21 + $0xe0] sm:$0xf] }
 0x6d2   : > { %5151 = vmatpush.bf16.msra.mxu2 %v6539_v43  ;;  %v7152_v43 = vld [vmem:[%s10285_s19 + $0xc4] sm:$0xf] }
 0x6d4   : > { %5136 = vmatpush.bf16.msrb.mxu1 %v6607_v22 }
 0x6d8   : > { %5137 = vmatpush.bf16.msrb.mxu1 %v6599_v19  ;;  %v7153_v19 = vld [vmem:[%s10285_s19 + $0xc4] sm:$0xf0] }
 0x6d9   : > { %v6759_v61 = vor.u32 %v7153_v19, %v6758_v33  ;;  %v6911_v33 = vor.u32 %v7191_v9, %v6910_v39 }
 0x72b   : > { %v4821_v57 = vpop.permute.xlu0 %4820 }
 0x72c   : > { %6524 = vmatmul.msk.f32.vlgmr.msra.gmra.mxu3 %vm4774_vm8, %v4821_v57 }
 0x72d   : > { %5158 = vmatpush.bf16.msra.mxu3 %v6659_v5  ;;  %v6616_v5 = vld [vmem:[%s10283_s17 + $0xa8] sm:$0xf0] }
 0x72e   : > { %v6619_v21 = vor.u32 %v7116_v27, %v6616_v5 }
 0x731   : > { %5159 = vmatpush.bf16.msra.mxu3 %v6651_v46  ;;  %v6611_v46 = vor.u32 %v7114_v12, %v6608_v0  ;;  %v7154_v12 = vld [vmem:[%s10285_s19 + $0xd4] sm:$0xf]  ;;  %v6768_v0 = vld [vmem:[%s10285_s19 + $0xd8] sm:$0xf0] }
 0x733   : > { %v4823_v31 = vpop.permute.xlu1 %4822 }
 0x734   : > { %6525 = vmatmul.msk.f32.gmra.mxu3 %vm4774_vm8, %v4823_v31  ;;  %v4852_v31 = vld [vmem:[%s10375_s3 + $0x8] sm:$0xff]  ;;  %s7294_s3 = smov 256  }
 0x735   : > { %5160 = vmatpush.bf16.msra.mxu3 %v6643_v10  ;;  %v6718_v10 = vld [vmem:[%s10285_s19 + $0x70] sm:$0xf] }
 0x736   : > { %v6719_v2 = vor.u32 %v7143_v48, %v6718_v10  ;;  %v6678_v10 = vld [vmem:[%s10285_s19 + $0x20] sm:$0xf]  ;;  %v7133_v48 = vld [vmem:[%s10285_s19 + $0x24] sm:$0xf0] }
 0x737   : > { %v6679_v47 = vor.u32 %v7133_v48, %v6678_v10 }
 0x738   : > { %5386 = vmatpush.bf16.msra.mxu0 %v6719_v2  ;;  %v7132_v2 = vld [vmem:[%s10285_s19 + $0x24] sm:$0xf] }
 0x739   : > { %5161 = vmatpush.bf16.msra.mxu3 %v6635_v23  ;;  %v7159_v23 = vld [vmem:[%s10285_s19 + $0xf4] sm:$0xf0]  ;;  %v6683_v8 = vor.u32 %v7132_v2, %v6680_v11 }
 0x73a   : > { %v6783_v58 = vor.u32 %v7159_v23, %v6782_v1  ;;  %v6752_v1 = vld [vmem:[%s10285_s19 + $0xb8] sm:$0xf0]  ;;  %v6670_v23 = vld [vmem:[%s10285_s19 + $0x10] sm:$0xf] }
 0x73c   : > { %5400 = vmatpush.bf16.msra.mxu1 %v6783_v58  ;;  %5387 = vmatpush.bf16.msra.mxu0 %v6711_v50  ;;  %v6755_v50 = vor.u32 %v7150_v49, %v6752_v1  ;;  %v6672_v58 = vld [vmem:[%s10285_s19 + $0x18] sm:$0xf0]  ;;  %v7238_v1 = vld [vmem:[#allocation3] sm:$0xff] }
 0x73d   : > { %5162 = vmatpush.bf16.msra.mxu3 %v6627_v28  ;;  %v6704_v28 = vld [vmem:[%s10285_s19 + $0x58] sm:$0xf0] }
 0x73e   : > { %v6707_v35 = vor.u32 %v7138_v51, %v6704_v28  ;;  %v7148_v28 = vld [vmem:[%s10285_s19 + $0xa4] sm:$0xf] }
 0x741   : > { %5163 = vmatpush.bf16.msra.mxu3 %v6619_v21 }
 0x745   : > { %5164 = vmatpush.bf16.msra.mxu3 %v6611_v46  ;;  %v6771_v46 = vor.u32 %v7154_v12, %v6768_v0  ;;  %v7173_v12 = vld [vmem:[%s10287_s21 + $0x64] sm:$0xf0]  ;;  %v7172_v0 = vld [vmem:[%s10287_s21 + $0x64] sm:$0xf] }
 0x746   : > { %v6839_v42 = vor.u32 %v7173_v12, %v6838_v18  ;;  %v6896_v18 = vld [vmem:[%s10287_s21 + $0xd8] sm:$0xf0] }
 0x749   : > { %5165 = vmatpush.bf16.msra.mxu3 %v6603_v63  ;;  %v6763_v63 = vor.u32 %v7152_v43, %v6760_v40  ;;  %v6830_v43 = vld [vmem:[%s10287_s21 + $0x50] sm:$0xf]  ;;  %v7170_v40 = vld [vmem:[%s10287_s21 + $0x54] sm:$0xf] }
 0x7af   : > { %v4845_v56 = vpop.f32.mrf.mxu3 }
 0x7b0   : > { %v4853_v57 = vmul.f32 %v4851_v59, %v4845_v56  ;;  %v6774_v59 = vld [vmem:[%s10285_s19 + $0xe0] sm:$0xf]  ;;  %v7157_v56 = vld [vmem:[%s10285_s19 + $0xe4] sm:$0xf0] }
 0x7b2   : > { %6527 = vmatmul.msk.f32.vlgmr.msrb.gmra.mxu2 %vm4860_vm2, %v4853_v57  ;;  %6530 = vmatmul.msk.f32.vlgmr.msrb.gmra.mxu3 %vm4860_vm2, %v4853_v57  ;;  %v6775_v57 = vor.u32 %v7157_v56, %v6774_v59  ;;  %v6744_v59 = vld [vmem:[%s10285_s19 + $0xa8] sm:$0xf0] }
 0x7b3   : > { %5414 = vmatpush.bf16.msrb.mxu2 %v6723_v54  ;;  %5428 = vmatpush.bf16.msrb.mxu3 %v6787_v53  ;;  %v7151_v54 = vld [vmem:[%s10285_s19 + $0xb4] sm:$0xf0]  ;;  %v6675_v53 = vor.u32 %v7130_v13, %v6672_v58  ;;  %v6747_v56 = vor.u32 %v7148_v28, %v6744_v59  ;;  %v7240_v59 = vld [vmem:[#allocation3 + $0x8] sm:$0xff] }
 0x7b4   : > { %5401 = vmatpush.bf16.msra.mxu1 %v6775_v57  ;;  %v6751_v55 = vor.u32 %v7151_v54, %v6750_v7  ;;  %v6662_v57 = vld [vmem:[%s10285_s19] sm:$0xf]  ;;  %v7239_v13 = vld [vmem:[#allocation3 + $0x10] sm:$0xff] }
 0x7b7   : > { %v4848_v29 = vpop.f32.mrf.mxu3  ;;  %5415 = vmatpush.bf16.msrb.mxu2 %v6715_v34  ;;  %v6671_v34 = vor.u32 %v7131_v38, %v6670_v23 }
 0x7b8   : > { %v4854_v60 = vmul.f32 %v4852_v31, %v4848_v29  ;;  %v7156_v31 = vld [vmem:[%s10285_s19 + $0xe4] sm:$0xf]  ;;  %v6776_v29 = vld [vmem:[%s10285_s19 + $0xe8] sm:$0xf0]  ;;  %5402 = vmatpush.bf16.msra.mxu1 %v6767_v37 }
 0x7b9   : > { %v6779_v30 = vor.u32 %v7156_v31, %v6776_v29  ;;  %v7129_v31 = vld [vmem:[%s10285_s19 + $0x4] sm:$0xf0]  ;;  %v7128_v29 = vld [vmem:[%s10285_s19 + $0x4] sm:$0xf] }
 0x7ba   : > { %6528 = vmatmul.msk.f32.gmra.mxu2 %vm4860_vm2, %v4854_v60  ;;  %6531 = vmatmul.msk.f32.gmra.mxu3 %vm4860_vm2, %v4854_v60  ;;  %v6703_v60 = vor.u32 %v7139_v25, %v6702_v15  ;;  %v6742_v15 = vld [vmem:[%s10285_s19 + $0xa0] sm:$0xf]  ;;  %v7149_v25 = vld [vmem:[%s10285_s19 + $0xa4] sm:$0xf0] }
 0x7bb   : > { %5429 = vmatpush.bf16.msrb.mxu3 %v6779_v30  ;;  %5416 = vmatpush.bf16.msrb.mxu2 %v6707_v35  ;;  %v6743_v51 = vor.u32 %v7149_v25, %v6742_v15  ;;  %v6664_v30 = vld [vmem:[%s10285_s19 + $0x8] sm:$0xf0] }
 0x7bc   : > { %5388 = vmatpush.bf16.msra.mxu0 %v6703_v60  ;;  %5403 = vmatpush.bf16.msra.mxu1 %v6759_v61  ;;  %v6663_v60 = vor.u32 %v7129_v31, %v6662_v57  ;;  %v6667_v35 = vor.u32 %v7128_v29, %v6664_v30  ;;  %v7171_v61 = vld [vmem:[%s10287_s21 + $0x54] sm:$0xf0]  ;;  %v7241_v29 = vld [vmem:[#allocation3 + $0x18] sm:$0xff] }
 0x7bd   : > { %v6831_v10 = vor.u32 %v7171_v61, %v6830_v43  ;;  %v6806_v61 = vld [vmem:[%s10287_s21 + $0x20] sm:$0xf] }
 0x7bf   : > { %5417 = vmatpush.bf16.msrb.mxu2 %v6699_v32  ;;  %5430 = vmatpush.bf16.msrb.mxu3 %v6771_v46  ;;  %v6840_v46 = vld [vmem:[%s10287_s21 + $0x68] sm:$0xf0] }
 0x7c0   : > { %5389 = vmatpush.bf16.msra.mxu0 %v6695_v36  ;;  %5404 = vmatpush.bf16.msra.mxu1 %v6751_v55  ;;  %v6736_v36 = vld [vmem:[%s10285_s19 + $0x98] sm:$0xf0] }
 0x7c1   : > { %v6739_v32 = vor.u32 %v7146_v4, %v6736_v36  ;;  %v7189_v4 = vld [vmem:[%s10287_s21 + $0xe4] sm:$0xf0] }
 0x7c2   : > { %v6903_v36 = vor.u32 %v7189_v4, %v6902_v62  ;;  %v6862_v62 = vld [vmem:[%s10287_s21 + $0x90] sm:$0xf]  ;;  %v7179_v4 = vld [vmem:[%s10287_s21 + $0x94] sm:$0xf0] }
 0x7c3   : > { %5418 = vmatpush.bf16.msrb.mxu2 %v6691_v41  ;;  %5431 = vmatpush.bf16.msrb.mxu3 %v6763_v63  ;;  %v6843_v41 = vor.u32 %v7172_v0, %v6840_v46  ;;  %v6832_v63 = vld [vmem:[%s10287_s21 + $0x58] sm:$0xf0]  ;;  %v7167_v0 = vld [vmem:[%s10287_s21 + $0x34] sm:$0xf0]  ;;  %v7166_v46 = vld [vmem:[%s10287_s21 + $0x34] sm:$0xf] }
 0x7c4   : > { %5390 = vmatpush.bf16.msra.mxu0 %v6687_v3  ;;  %5405 = vmatpush.bf16.msra.mxu1 %v6743_v51  ;;  %v7190_v3 = vld [vmem:[%s10287_s21 + $0xf4] sm:$0xf]  ;;  %v6835_v2 = vor.u32 %v7170_v40, %v6832_v63  ;;  %v7165_v40 = vld [vmem:[%s10287_s21 + $0x24] sm:$0xf0]  ;;  %v7164_v63 = vld [vmem:[%s10287_s21 + $0x24] sm:$0xf] }
 0x7c5   : > { %v6915_v19 = vor.u32 %v7190_v3, %v6912_v44  ;;  %v6886_v3 = vld [vmem:[%s10287_s21 + $0xc0] sm:$0xf]  ;;  %v7185_v44 = vld [vmem:[%s10287_s21 + $0xc4] sm:$0xf0] }
 0x7c7   : > { %5419 = vmatpush.bf16.msrb.mxu2 %v6683_v8  ;;  %5432 = vmatpush.bf16.msrb.mxu3 %v6755_v50  ;;  %v5176_v8 = vld [vmem:[%s10284_s18] sm:$0x3] }
 0x7c8   : > { %5391 = vmatpush.bf16.msra.mxu0 %v6679_v47  ;;  %5406 = vmatpush.bf16.msra.mxu1 %v6735_v24  ;;  %v5178_v23 = vperm.slane %v5176_v8, 0  ;;  %v5179_v57 = vperm.slane %v5176_v8, 1  ;;  %v7188_v24 = vld [vmem:[%s10287_s21 + $0xe4] sm:$0xf]  ;;  %v7182_v8 = vld [vmem:[%s10287_s21 + $0xb4] sm:$0xf] }
 0x7cb   : > { %5420 = vmatpush.bf16.msrb.mxu2 %v6675_v53  ;;  %5433 = vmatpush.bf16.msrb.mxu3 %v6747_v56 }
 0x7cc   : > { %5392 = vmatpush.bf16.msra.mxu0 %v6671_v34 }
 0x7cf   : > { %5421 = vmatpush.bf16.msrb.mxu2 %v6667_v35  ;;  %5434 = vmatpush.bf16.msrb.mxu3 %v6739_v32  ;;  %v6904_v32 = vld [vmem:[%s10287_s21 + $0xe8] sm:$0xf0] }
 0x7d0   : > { %5393 = vmatpush.bf16.msra.mxu0 %v6663_v60 }
 0x835   : > { %v4889_v14 = vpop.f32.mrf.mxu2  ;;  %v4912_v27 = vpop.f32.mrf.mxu3 }
 0x836   : > { %v4918_v21 = vmul.f32 0.125, %v4889_v14  ;;  %v4919_v6 = vmul.f32 0.125, %v4912_v27  ;;  %v6726_v14 = vld [vmem:[%s10285_s19 + $0x80] sm:$0xf]  ;;  %v7145_v27 = vld [vmem:[%s10285_s19 + $0x84] sm:$0xf0] }
 0x83d   : > { %v4892_v5 = vpop.f32.mrf.mxu2  ;;  %v4915_v52 = vpop.f32.mrf.mxu3 }
 0x83e   : > { %v4920_v17 = vmul.f32 0.125, %v4892_v5  ;;  %v4921_v26 = vmul.f32 0.125, %v4915_v52  ;;  %v7144_v5 = vld [vmem:[%s10285_s19 + $0x84] sm:$0xf]  ;;  %v6727_v52 = vor.u32 %v7145_v27, %v6726_v14  ;;  %v6907_v14 = vor.u32 %v7188_v24, %v6904_v32  ;;  %v6822_v27 = vld [vmem:[%s10287_s21 + $0x40] sm:$0xf] }
 0x83f   : > { %v7178_v24 = vld [vmem:[%s10287_s21 + $0x94] sm:$0xf]  ;;  %v6864_v32 = vld [vmem:[%s10287_s21 + $0x98] sm:$0xf0] }
 0x840   : > { %v4922_v45 = vpack.c.bf16 %v4920_v17, %v4918_v21  ;;  %v4923_v22 = vpack.c.bf16 %v4921_v26, %v4919_v6  ;;  %v6728_v21 = vld [vmem:[%s10285_s19 + $0x88] sm:$0xf0]  ;;  %5407 = vmatpush.bf16.msra.mxu1 %v6727_v52  ;;  %v6846_v17 = vld [vmem:[%s10287_s21 + $0x70] sm:$0xf]  ;;  %v7175_v26 = vld [vmem:[%s10287_s21 + $0x74] sm:$0xf0] }
 0x841   : > { %v6731_v6 = vor.u32 %v7144_v5, %v6728_v21  ;;  %v7169_v5 = vld [vmem:[%s10287_s21 + $0x44] sm:$0xf0]  ;;  %v7168_v52 = vld [vmem:[%s10287_s21 + $0x44] sm:$0xf] }
 0x842   : > { %5124 = vmatmul.bf16.vlgmr.msrb.gmra.mxu0 %v4922_v45  ;;  %5138 = vmatmul.bf16.vlgmr.msrb.gmra.mxu1 %v4923_v22  ;;  %v6823_v21 = vor.u32 %v7169_v5, %v6822_v27  ;;  %v6854_v27 = vld [vmem:[%s10287_s21 + $0x80] sm:$0xf]  ;;  %v7177_v5 = vld [vmem:[%s10287_s21 + $0x84] sm:$0xf0] }
 0x843   : > { %5152 = vmatmul.bf16.vlgmr.msra.gmra.mxu2 %v4922_v45  ;;  %5166 = vmatmul.bf16.vlgmr.msra.gmra.mxu3 %v4923_v22  ;;  %v7174_v45 = vld [vmem:[%s10287_s21 + $0x74] sm:$0xf]  ;;  %v6847_v22 = vor.u32 %v7175_v26, %v6846_v17  ;;  %v6894_v17 = vld [vmem:[%s10287_s21 + $0xd0] sm:$0xf]  ;;  %v7187_v26 = vld [vmem:[%s10287_s21 + $0xd4] sm:$0xf0] }
 0x844   : > { %5435 = vmatpush.bf16.msrb.mxu3 %v6731_v6  ;;  %v6851_v37 = vor.u32 %v7174_v45, %v6848_v16  ;;  %5654 = vmatpush.bf16.msrb.mxu1 %v6911_v33  ;;  %v6824_v6 = vld [vmem:[%s10287_s21 + $0x48] sm:$0xf0]  ;;  %v7186_v16 = vld [vmem:[%s10287_s21 + $0xd4] sm:$0xf]  ;;  %v7184_v33 = vld [vmem:[%s10287_s21 + $0xc4] sm:$0xf] }
 0x845   : > { %5640 = vmatpush.bf16.msrb.mxu0 %v6847_v22  ;;  %v6827_v45 = vor.u32 %v7168_v52, %v6824_v6  ;;  %v6895_v22 = vor.u32 %v7187_v26, %v6894_v17  ;;  %v6899_v12 = vor.u32 %v7186_v16, %v6896_v18  ;;  %v7176_v52 = vld [vmem:[%s10287_s21 + $0x84] sm:$0xf]  ;;  %v6856_v6 = vld [vmem:[%s10287_s21 + $0x88] sm:$0xf0] }
 0x846   : > { %5668 = vmatpush.bf16.msra.mxu2 %v6851_v37  ;;  %v6814_v37 = vld [vmem:[%s10287_s21 + $0x30] sm:$0xf]  ;;  %v6859_v17 = vor.u32 %v7176_v52, %v6856_v6 }
 0x847   : > { %v6815_v39 = vor.u32 %v7167_v0, %v6814_v37 }
 0x848   : > { %5682 = vmatpush.bf16.msra.mxu3 %v6915_v19  ;;  %5655 = vmatpush.bf16.msrb.mxu1 %v6903_v36  ;;  %v6888_v19 = vld [vmem:[%s10287_s21 + $0xc8] sm:$0xf0]  ;;  %v6863_v36 = vor.u32 %v7179_v4, %v6862_v62 }
 0x849   : > { %5641 = vmatpush.bf16.msrb.mxu0 %v6839_v42  ;;  %v6816_v42 = vld [vmem:[%s10287_s21 + $0x38] sm:$0xf0]  ;;  %v6891_v43 = vor.u32 %v7184_v33, %v6888_v19 }
 0x84a   : > { %5669 = vmatpush.bf16.msra.mxu2 %v6843_v41  ;;  %v6819_v9 = vor.u32 %v7166_v46, %v6816_v42  ;;  %v6887_v41 = vor.u32 %v7185_v44, %v6886_v3 }
 0x84c   : > { %5683 = vmatpush.bf16.msra.mxu3 %v6907_v14  ;;  %5656 = vmatpush.bf16.msrb.mxu1 %v6895_v22  ;;  %v6867_v14 = vor.u32 %v7178_v24, %v6864_v32 }
 0x84d   : > { %5642 = vmatpush.bf16.msrb.mxu0 %v6831_v10  ;;  %v6807_v10 = vor.u32 %v7165_v40, %v6806_v61 }
 0x84e   : > { %5670 = vmatpush.bf16.msra.mxu2 %v6835_v2  ;;  %v6878_v2 = vld [vmem:[%s10287_s21 + $0xb0] sm:$0xf] }
 0x850   : > { %5684 = vmatpush.bf16.msra.mxu3 %v6899_v12  ;;  %5657 = vmatpush.bf16.msrb.mxu1 %v6887_v41 }
 0x851   : > { %5643 = vmatpush.bf16.msrb.mxu0 %v6823_v21  ;;  %v6855_v21 = vor.u32 %v7177_v5, %v6854_v27 }
 0x852   : > { %5671 = vmatpush.bf16.msra.mxu2 %v6827_v45  ;;  %v5220_v45 = vld [vmem:[%s10286_s20] sm:$0x3] }
 0x853   : > { %v5222_v18 = vperm.slane %v5220_v45, 0 }
 0x854   : > { %5685 = vmatpush.bf16.msra.mxu3 %v6891_v43 }
 0x855   : > { %5644 = vmatpush.bf16.msrb.mxu0 %v6815_v39  ;;  %v5223_v39 = vperm.slane %v5220_v45, 1 }
 0x856   : > { %5672 = vmatpush.bf16.msra.mxu2 %v6819_v9 }
 0x859   : > { %5645 = vmatpush.bf16.msrb.mxu0 %v6807_v10 }
 0x8bf   : > { %v5125_v48 = vpop.f32.mrf.mxu0  ;;  %v5139_v47 = vpop.f32.mrf.mxu1 }
 0x8c0   : > { %v5140_v11 = vadd.f32 %v5139_v47, %v5125_v48  ;;  %v6808_v48 = vld [vmem:[%s10287_s21 + $0x28] sm:$0xf0] }
 0x8c1   : > { %v6811_v47 = vor.u32 %v7164_v63, %v6808_v48 }
 0x8c2   : > { %v5172_v50 = vadd.f32 %v7238_v1, %v5140_v11  ;;  %v7183_v11 = vld [vmem:[%s10287_s21 + $0xb4] sm:$0xf0] }
 0x8c3   : > { %5673 = vmatpush.bf16.msra.mxu2 %v6811_v47  ;;  %v7163_v1 = vld [vmem:[%s10287_s21 + $0x14] sm:$0xf0] }
 0x8c4   : > { %v10093_v53 = vadd.f32 %v5178_v23, %v5172_v50  ;;  %v7162_v50 = vld [vmem:[%s10287_s21 + $0x14] sm:$0xf] }
 0x8c6   : > { %v5153_v7 = vpop.f32.mrf.mxu2  ;;  %v5167_v54 = vpop.f32.mrf.mxu3 }
 0x8c7   : > { %v5127_v49 = vpop.f32.mrf.mxu0  ;;  %v5141_v55 = vpop.f32.mrf.mxu1  ;;  %v5168_v58 = vadd.f32 %v5167_v54, %v5153_v7  ;;  %v6879_v7 = vor.u32 %v7183_v11, %v6878_v2  ;;  %v6880_v54 = vld [vmem:[%s10287_s21 + $0xb8] sm:$0xf0] }
 0x8c8   : > { %v5142_v38 = vadd.f32 %v5141_v55, %v5127_v49  ;;  %v6883_v49 = vor.u32 %v7182_v8, %v6880_v54  ;;  %v6798_v55 = vld [vmem:[%s10287_s21 + $0x10] sm:$0xf]  ;;  %v5700_v8 = vld [vmem:[%s10288_s22] sm:$0x3] }
 0x8c9   : > { %v5173_v56 = vadd.f32 %v7240_v59, %v5168_v58  ;;  %5658 = vmatpush.bf16.msrb.mxu1 %v6879_v7  ;;  %v7181_v58 = vld [vmem:[%s10287_s21 + $0xa4] sm:$0xf0] }
 0x8ca   : > { %v5174_v34 = vadd.f32 %v7239_v13, %v5142_v38  ;;  %v6800_v38 = vld [vmem:[%s10287_s21 + $0x18] sm:$0xf0]  ;;  %5686 = vmatpush.bf16.msra.mxu3 %v6883_v49  ;;  %v5702_v49 = vperm.slane %v5700_v8, 0 }
 0x8cb   : > { %v10099_v30 = vadd.f32 %v5179_v57, %v5173_v56  ;;  %v6803_v13 = vor.u32 %v7162_v50, %v6800_v38  ;;  %v6790_v56 = vld [vmem:[%s10287_s21] sm:$0xf] }
 0x8cc   : > { %v10095_v15 = vadd.f32 %v5178_v23, %v5174_v34  ;;  %v6799_v23 = vor.u32 %v7163_v1, %v6798_v55  ;;  %v6870_v34 = vld [vmem:[%s10287_s21 + $0xa0] sm:$0xf] }
 0x8cd   : > { %5674 = vmatpush.bf16.msra.mxu2 %v6803_v13  ;;  %v5703_v13 = vperm.slane %v5700_v8, 1 }
 0x8ce   : > { %v5186_v25 = vpack.c.bf16 %v10095_v15, %v10093_v53  ;;  %v5155_v51 = vpop.f32.mrf.mxu2  ;;  %v5169_v28 = vpop.f32.mrf.mxu3  ;;  %5646 = vmatpush.bf16.msrb.mxu0 %v6799_v23 }
 0x8cf   : > { %v5170_v31 = vadd.f32 %v5169_v28, %v5155_v51  ;;  %v6871_v51 = vor.u32 %v7181_v58, %v6870_v34  ;;  %v6872_v28 = vld [vmem:[%s10287_s21 + $0xa8] sm:$0xf0] }
 0x8d0   : > { %5394 = vmatmul.bf16.vlgmr.msra.gmra.mxu0 %v5186_v25  ;;  %5422 = vmatmul.bf16.vlgmr.msrb.gmra.mxu2 %v5186_v25  ;;  %v7180_v25 = vld [vmem:[%s10287_s21 + $0xa4] sm:$0xf] }
 0x8d1   : > { %v5175_v60 = vadd.f32 %v7241_v29, %v5170_v31  ;;  %v6875_v59 = vor.u32 %v7180_v25, %v6872_v28  ;;  %v7160_v31 = vld [vmem:[%s10287_s21 + $0x4] sm:$0xf]  ;;  %5659 = vmatpush.bf16.msrb.mxu1 %v6871_v51 }
 0x8d3   : > { %v10101_v35 = vadd.f32 %v5179_v57, %v5175_v60  ;;  %v7161_v57 = vld [vmem:[%s10287_s21 + $0x4] sm:$0xf0]  ;;  %v6792_v60 = vld [vmem:[%s10287_s21 + $0x8] sm:$0xf0]  ;;  %5687 = vmatpush.bf16.msra.mxu3 %v6875_v59 }
 0x8d4   : > { %v6791_v29 = vor.u32 %v7161_v57, %v6790_v56 }
 0x8d5   : > { %v5187_v20 = vpack.c.bf16 %v10101_v35, %v10099_v30  ;;  %5660 = vmatpush.bf16.msrb.mxu1 %v6863_v36 }
 0x8d6   : > { %5647 = vmatpush.bf16.msrb.mxu0 %v6791_v29 }
 0x8d7   : > { %5408 = vmatmul.bf16.vlgmr.msra.gmra.mxu1 %v5187_v20  ;;  %5436 = vmatmul.bf16.vlgmr.msrb.gmra.mxu3 %v5187_v20  ;;  %v6795_v20 = vor.u32 %v7160_v31, %v6792_v60 }
 0x8d8   : > { %5688 = vmatpush.bf16.msra.mxu3 %v6867_v14 }
 0x8d9   : > { %5675 = vmatpush.bf16.msra.mxu2 %v6795_v20  ;;  %5661 = vmatpush.bf16.msrb.mxu1 %v6855_v21 }
 0x8dc   : > { %5689 = vmatpush.bf16.msra.mxu3 %v6859_v17 }
 0x94d   : > { %v5395_v26 = vpop.f32.mrf.mxu0 }
 0x94e   : > { %v5396_v37 = vadd.f32 %v5395_v26, %v5222_v18 }
 0x953   : > { %v5423_v16 = vpop.f32.mrf.mxu2 }
 0x954   : > { %v5409_v22 = vpop.f32.mrf.mxu1  ;;  %v5424_v33 = vadd.f32 %v5423_v16, %v5223_v39 }
 0x955   : > { %v5397_v12 = vpop.f32.mrf.mxu0  ;;  %v5410_v46 = vadd.f32 %v5409_v22, %v5396_v37 }
 0x956   : > { %v5398_v42 = vadd.f32 %v5397_v12, %v5222_v18 }
 0x957   : > { %v5442_v41 = vmax.f32 %v5410_v46, 0.0 }
 0x95a   : > { %v5437_v0 = vpop.f32.mrf.mxu3 }
 0x95b   : > { %v5425_v44 = vpop.f32.mrf.mxu2  ;;  %v5438_v43 = vadd.f32 %v5437_v0, %v5424_v33 }
 0x95c   : > { %v5411_v9 = vpop.f32.mrf.mxu1  ;;  %v5426_v40 = vadd.f32 %v5425_v44, %v5223_v39 }
 0x95d   : > { %v5412_v3 = vadd.f32 %v5411_v9, %v5398_v42  ;;  %v5443_v48 = vmax.f32 %v5438_v43, 0.0 }
 0x95f   : > { %v5444_v19 = vmax.f32 %v5412_v3, 0.0 }
 0x961   : > { %v5446_v61 = vpack.c.bf16 %v5444_v19, %v5442_v41 }
 0x962   : > { %v5439_v63 = vpop.f32.mrf.mxu3 }
 0x963   : > { %v5440_v10 = vadd.f32 %v5439_v63, %v5426_v40  ;;  %5648 = vmatmul.bf16.vlgmr.msrb.gmra.mxu0 %v5446_v61  ;;  %5676 = vmatmul.bf16.vlgmr.msra.gmra.mxu2 %v5446_v61 }
 0x965   : > { %v5445_v47 = vmax.f32 %v5440_v10, 0.0 }
 0x967   : > { %v5447_v2 = vpack.c.bf16 %v5445_v47, %v5443_v48 }
 0x969   : > { %5662 = vmatmul.bf16.vlgmr.msrb.gmra.mxu1 %v5447_v2  ;;  %5690 = vmatmul.bf16.vlgmr.msra.gmra.mxu3 %v5447_v2 }
 0x9e0   : > { %v5649_v11 = vpop.f32.mrf.mxu0 }
 0x9e6   : > { %v5663_v7 = vpop.f32.mrf.mxu1  ;;  %v5677_v1 = vpop.f32.mrf.mxu2 }
 0x9e7   : > { %v5664_v54 = vadd.f32 %v5663_v7, %v5649_v11 }
 0x9e8   : > { %v5651_v34 = vpop.f32.mrf.mxu0 }
 0x9e9   : > { %v5696_v55 = vadd.f32 %v5664_v54, %v10093_v53 }
 0x9eb   : > { %v5706_v50 = vadd.f32 %v5702_v49, %v5696_v55 }
 0x9ec   : > { %v5691_v23 = vpop.f32.mrf.mxu3 }
 0x9ed   : > { %5710 = vst [vmem:[#allocation3] sm:$0xff] %v5706_v50  ;;  %v5692_v38 = vadd.f32 %v5691_v23, %v5677_v1 }
 0x9ee   : > { %v5665_v58 = vpop.f32.mrf.mxu1  ;;  %v5679_v57 = vpop.f32.mrf.mxu2 }
 0x9ef   : > { %v5697_v25 = vadd.f32 %v5692_v38, %v10099_v30  ;;  %v5666_v51 = vadd.f32 %v5665_v58, %v5651_v34 }
 0x9f1   : > { %v5707_v28 = vadd.f32 %v5703_v13, %v5697_v25  ;;  %v5698_v59 = vadd.f32 %v5666_v51, %v10095_v15 }
 0x9f3   : > { %5711 = vst [vmem:[#allocation3 + $0x8] sm:$0xff] %v5707_v28  ;;  %v5708_v56 = vadd.f32 %v5702_v49, %v5698_v59 }
 0x9f4   : > { %v5693_v31 = vpop.f32.mrf.mxu3 }
 0x9f5   : > { %5712 = vst [vmem:[#allocation3 + $0x10] sm:$0xff] %v5708_v56  ;;  %v5694_v53 = vadd.f32 %v5693_v31, %v5679_v57 }
 0x9f7   : > { %v5699_v29 = vadd.f32 %v5694_v53, %v10101_v35 }
 0x9f9   : > { %v5709_v30 = vadd.f32 %v5703_v13, %v5699_v29 }
 0x9fb   : > { %5713 = vst [vmem:[#allocation3 + $0x18] sm:$0xff] %v5709_v30 }
 0x9fc   : > { %7193 = dma.vmem_to_hbm [thread:$0]  (%p7196_p5), %s5728_s28, 512, %s5730_s30, [#allocation4], %s7294_s3, %s7294_s3, %s7295_s0  }
 0x9fd   : > { %7275 = dma.done.wait (%p7196_p5), [#allocation4], 512  }
 0x9fe   : > { %7277 = vsyncadd (%p7196_p5), [#allocation4], 4294966784 }
 0x9ff PF: > { %s36_s5 = sadd.s32 1, %s7280_s5  }
 0xa00   : > { %p33_p6 = scmp.ge.s32.totalorder %s36_s5, 4  }
 0xa02   :  { %35 = sbr.rel (!%p33_p6) target bundleno = 11 (0xb), region = 148 }
 0xa07   :  { %5752 = vsyncpa [#allocation4], 1 }
 0xa08   :  { %5754 = vsyncpa [#allocation4 + $0x1], 1 }

</bundles_post_ra>
